<compile_context>
chip_gen: v7x
topology: tpu7x:2x2x1
jax: 0.10.0
libtpu: 0.0.40
codegen_flags: <defaults>
</compile_context>

<pallas_src>
import math
from functools import partial

import jax
import jax.numpy as jnp
from jax.experimental import pallas as pl
from jax.experimental.pallas import tpu as pltpu


# ----------------------------------------------------------------------------
# helpers
# ----------------------------------------------------------------------------
def _pick_row_tile(n, target=256):
    """Largest multiple-of-8 tile <= target that divides n (falls back to n)."""
    if n <= target:
        return n
    t = (target // 8) * 8
    while t > 8 and n % t:
        t -= 8
    return t if (t > 0 and n % t == 0) else n


# ----------------------------------------------------------------------------
# Tiled linear projection kernel (bf16 operands, f32 accumulate)
# ----------------------------------------------------------------------------
def _linear_kernel(x_ref, wt_ref, b_ref, o_ref):
    x = x_ref[...].astype(jnp.bfloat16)
    acc = jax.lax.dot_general(
        x, wt_ref[...],
        dimension_numbers=(((1,), (0,)), ((), ())),
        preferred_element_type=jnp.float32)
    o_ref[...] = (acc + b_ref[...]).astype(o_ref.dtype)


def linear(x2d, wt_bf16, bias_row):
    """y = x2d @ wt + bias.  wt is pre-transposed bf16, bias is (1, out)."""
    n, e_in = x2d.shape
    e_out = wt_bf16.shape[1]
    tile = _pick_row_tile(n, 256)
    return pl.pallas_call(
        _linear_kernel,
        out_shape=jax.ShapeDtypeStruct((n, e_out), jnp.float32),
        grid=(n // tile,),
        in_specs=[
            pl.BlockSpec((tile, e_in), lambda i: (i, 0)),
            pl.BlockSpec((e_in, e_out), lambda i: (0, 0)),
            pl.BlockSpec((1, e_out), lambda i: (0, 0)),
        ],
        out_specs=pl.BlockSpec((tile, e_out), lambda i: (i, 0)),
        compiler_params=pltpu.CompilerParams(
            dimension_semantics=("parallel",)),
    )(x2d, wt_bf16, bias_row)


# ----------------------------------------------------------------------------
# DERF attention kernel: block-diag feature map for all heads, softmax
# accumulation over kv tiles (no running max needed: scores are in [0, 1]),
# fused output projection at finalize.  Output is lane-dense (B, S, E).
# ----------------------------------------------------------------------------
def _derf_attn_kernel(q_ref, k_ref, v_ref, bt_ref, bias_ref, ones_ref,
                      wo_ref, bo_ref, o_ref,
                      qf_sc, l_sc, acc_sc, *, num_heads, head_dim):
    ki = pl.program_id(2)
    n_kv = pl.num_programs(2)
    H, dk = num_heads, head_dim

    bt_bd = bt_ref[0]            # (E, E) bf16 block-diagonal B^T (all heads)
    bias = bias_ref[0]           # (1, E) f32
    ones_bd = ones_ref[...]      # (E, E) f32 block-diag ones (per-head sums)

    def feature_map(x):
        # exp(x @ blockdiag(B^T) + bias) for all heads in one matmul.
        # Row-max stabilisation cancels under the per-head L2 norm below but
        # prevents f32 overflow.  Per-head squared sums come from one more
        # matmul against the block-diag ones mask (already broadcast across
        # each head's dk lanes), so no per-head slicing is needed here.
        z = jnp.dot(x.astype(jnp.bfloat16), bt_bd,
                    preferred_element_type=jnp.float32) + bias
        z = z - jnp.max(z, axis=-1, keepdims=True)
        f = jnp.exp(z)
        sums = jnp.dot(f * f, ones_bd, preferred_element_type=jnp.float32)
        return f * jax.lax.rsqrt(jnp.maximum(sums, 1e-30))

    @pl.when(ki == 0)
    def _init():
        l_sc[...] = jnp.zeros_like(l_sc)
        acc_sc[...] = jnp.zeros_like(acc_sc)
        qf_sc[...] = feature_map(q_ref[0]).astype(jnp.bfloat16)   # (tq, E)

    kf = feature_map(k_ref[0]).astype(jnp.bfloat16)               # (tk, E)
    v_all = v_ref[0]                                              # (tk, E)
    qf_all = qf_sc[...]                                           # (tq, E)
    for h in range(H):
        sl = slice(h * dk, (h + 1) * dk)
        # features are unit-norm & non-negative => scores in [0, 1]; exp is
        # safe without an online running max.
        s = jax.lax.dot_general(
            qf_all[:, sl], kf[:, sl],
            dimension_numbers=(((1,), (1,)), ((), ())),
            preferred_element_type=jnp.float32)                   # (tq, tk)
        p = jnp.exp(s)
        l_sc[h] = l_sc[h] + jnp.sum(p, axis=-1, keepdims=True)
        acc_sc[h] = acc_sc[h] + jnp.dot(
            p.astype(jnp.bfloat16), v_all[:, sl].astype(jnp.bfloat16),
            preferred_element_type=jnp.float32)

    @pl.when(ki == n_kv - 1)
    def _fin():
        parts = []
        for h in range(H):
            inv_l = pl.reciprocal(l_sc[h], approx=True)           # (tq, 1)
            parts.append(acc_sc[h] * inv_l)
        # head h lands in columns [h*dk, (h+1)*dk) -> matches torch's
        # transpose(1,2).contiguous().view(B, S, E).  Output projection is
        # fused here (saves a pallas_call + HBM round-trip of the context).
        ctx = jnp.concatenate(parts, axis=-1)                     # (tq, E)
        out = jnp.dot(ctx.astype(jnp.bfloat16), wo_ref[...],
                      preferred_element_type=jnp.float32) + bo_ref[...]
        o_ref[0] = out.astype(o_ref.dtype)


def derf_attention_core(q, k, v, bt_bd, bias_row, ones_bd, w_o_t, b_o,
                        num_heads):
    """q/k/v: (B,S,E) f32; bt_bd: (B,E,E) bf16; bias_row: (B,1,E) f32."""
    bsz, s_len, e = q.shape
    dk = e // num_heads
    tq = _pick_row_tile(s_len, 256)
    tk = _pick_row_tile(s_len, 512)
    grid = (bsz, s_len // tq, s_len // tk)

    kernel = partial(_derf_attn_kernel, num_heads=num_heads, head_dim=dk)
    return pl.pallas_call(
        kernel,
        out_shape=jax.ShapeDtypeStruct((bsz, s_len, e), jnp.float32),
        grid=grid,
        in_specs=[
            pl.BlockSpec((1, tq, e), lambda b, qi, ki: (b, qi, 0)),
            pl.BlockSpec((1, tk, e), lambda b, qi, ki: (b, ki, 0)),
            pl.BlockSpec((1, tk, e), lambda b, qi, ki: (b, ki, 0)),
            pl.BlockSpec((1, e, e), lambda b, qi, ki: (b, 0, 0)),
            pl.BlockSpec((1, 1, e), lambda b, qi, ki: (b, 0, 0)),
            pl.BlockSpec((e, e), lambda b, qi, ki: (0, 0)),
            pl.BlockSpec((e, e), lambda b, qi, ki: (0, 0)),
            pl.BlockSpec((1, e), lambda b, qi, ki: (0, 0)),
        ],
        out_specs=pl.BlockSpec((1, tq, e), lambda b, qi, ki: (b, qi, 0)),
        scratch_shapes=[
            pltpu.VMEM((tq, e), jnp.bfloat16),               # cached q features
            pltpu.VMEM((num_heads, tq, 1), jnp.float32),     # softmax denom
            pltpu.VMEM((num_heads, tq, dk), jnp.float32),    # softmax numerator
        ],
        compiler_params=pltpu.CompilerParams(
            dimension_semantics=("parallel", "parallel", "arbitrary")),
    )(q, k, v, bt_bd, bias_row, ones_bd, w_o_t, b_o)


# ----------------------------------------------------------------------------
# Parameter init (deterministic, mirrors the module's __init__ shapes)
# ----------------------------------------------------------------------------
def init_params(key, embed_dim, num_heads, num_random_features):
    dk = embed_dim // num_heads
    scale = 1.0 / math.sqrt(dk)
    ks = jax.random.split(key, 10)

    def linear_init(kw, kb, fan_in, fan_out):
        bound = 1.0 / math.sqrt(fan_in)
        w = jax.random.uniform(kw, (fan_out, fan_in), jnp.float32, -bound, bound)
        b = jax.random.uniform(kb, (fan_out,), jnp.float32, -bound, bound)
        return w, b

    wq, bq = linear_init(ks[0], ks[1], embed_dim, embed_dim)
    wk, bk = linear_init(ks[2], ks[3], embed_dim, embed_dim)
    wv, bv = linear_init(ks[4], ks[5], embed_dim, embed_dim)
    wo, bo = linear_init(ks[6], ks[7], embed_dim, embed_dim)

    # Fused QKV projection: pre-transposed once, 1/sqrt(dk) scale folded into
    # the q/k halves, stored bf16 for the MXU; bias kept f32.
    w_qkv_t = jnp.concatenate(
        [wq.T * scale, wk.T * scale, wv.T], axis=1).astype(jnp.bfloat16)
    b_qkv = jnp.concatenate([bq * scale, bk * scale, bv]).reshape(1, -1)
    w_o_t = wo.T.astype(jnp.bfloat16)
    b_o = bo.reshape(1, -1)

    # SymmetricRandomFeatures.__init__: eigvectors of randn(dk, M) @ randn(dk, M).T
    rm = jax.random.normal(ks[8], (dk, num_random_features), jnp.float32)
    _, eig_vecs = jnp.linalg.eigh(rm @ rm.T)                    # (dk, dk)
    # plays the role of torch.randn(M, dk).t() in forward (fixed for determinism)
    omega_g = jax.random.normal(ks[9], (dk, num_random_features), jnp.float32)

    return dict(w_qkv_t=w_qkv_t, b_qkv=b_qkv, w_o_t=w_o_t, b_o=b_o,
                random_matrix=eig_vecs, omega_g=omega_g)


# ----------------------------------------------------------------------------
# Forward pass
# ----------------------------------------------------------------------------
def derf_attention_forward(params, x, *, num_heads):
    bsz, s_len, embed_dim = x.shape
    dk = embed_dim // num_heads

    # Fused (pre-scaled) q/k/v projection: one (B*S, E) x (E, 3E) matmul.
    x2d = x.reshape(bsz * s_len, embed_dim)
    qkv = linear(x2d, params["w_qkv_t"], params["b_qkv"])
    qkv = qkv.reshape(bsz, s_len, 3 * embed_dim)
    q = qkv[:, :, :embed_dim]
    k = qkv[:, :, embed_dim:2 * embed_dim]
    v = qkv[:, :, 2 * embed_dim:]

    # ---- SymmetricRandomFeatures data-dependent parameters (plain JAX glue) ----
    # TODO(synk): torch.linalg.svd-based in-forward .data mutation has no
    #             Pallas equivalent; computed here on (B, H, dk, dk) matrices.
    q4 = q.reshape(bsz, s_len, num_heads, dk)
    k4 = k.reshape(bsz, s_len, num_heads, dk)
    m1 = jnp.einsum("bshd,bshe->bhde", q4, q4) / s_len
    m2 = jnp.einsum("bshd,bshe->bhde", k4, k4) / s_len
    mu4 = jnp.mean(q4, axis=1)                                  # (B, H, dk)
    mu5 = jnp.mean(k4, axis=1)
    mat = (m1 + mu4[..., :, None] * mu5[..., None, :]
           + mu5[..., :, None] * mu4[..., None, :] + m2)        # (B, H, dk, dk)
    u, s_vals, _ = jnp.linalg.svd(mat)
    a_diag = (1.0 / 16.0) * (1.0 - 2.0 * s_vals
                             - jnp.sqrt((2.0 * s_vals + 1.0) ** 2 + 8.0 * s_vals))
    one_m4a = 1.0 - 4.0 * a_diag                                # (B, H, dk) >= 1
    # B_h = diag(sqrt(1-4A_h)) @ Q3_h.T  ->  B_h^T = Q3_h * sqrt(1-4A_h)
    bt_heads = u * jnp.sqrt(one_m4a)[..., None, :]              # (B, H, dk, dk)
    d_val = jnp.prod(one_m4a, axis=-1) ** 0.25                  # det(I-4A)^(1/4)

    # Pack per-head B^T into one block-diagonal (E, E) matrix per batch so the
    # kernel's feature map for all heads is a single lane-dense matmul.
    bt_bd = jnp.zeros((bsz, embed_dim, embed_dim), jnp.float32)
    for h in range(num_heads):
        sl = slice(h * dk, (h + 1) * dk)
        bt_bd = bt_bd.at[:, sl, sl].set(bt_heads[:, h])
    bt_bd = bt_bd.astype(jnp.bfloat16)

    # omega = random_matrix @ randn(M, dk).T -> (dk, M);  bias = 0.5*sum(omega^2,0)+D
    omega = params["random_matrix"] @ params["omega_g"]         # (dk, M), M == dk
    omega_sq = 0.5 * jnp.sum(omega ** 2, axis=0)                # (dk,)
    bias_row = (jnp.tile(omega_sq, num_heads)[None, :]
                + jnp.repeat(d_val, dk, axis=-1))               # (B, E)
    bias_row = bias_row.reshape(bsz, 1, embed_dim).astype(jnp.float32)

    # Block-diag ones mask: (f*f) @ ones_bd gives per-head L2 sums broadcast
    # across each head's dk lanes.
    hid = jnp.arange(embed_dim) // dk
    ones_bd = (hid[:, None] == hid[None, :]).astype(jnp.float32)

    # ---- Pallas attention core (all heads, lane-dense, fused out-proj) ----
    out = derf_attention_core(q, k, v, bt_bd, bias_row, ones_bd,
                              params["w_o_t"], params["b_o"], num_heads)
    return out


# ----------------------------------------------------------------------------
if __name__ == "__main__":
    embed_dim = 32
    num_heads = 2
    head_dim = embed_dim // num_heads
    num_random_features = head_dim   # reference broadcast requires M == dk
    batch, seq = 2, 8

    key = jax.random.PRNGKey(0)
    k_x, k_p = jax.random.split(key)
    params = init_params(k_p, embed_dim, num_heads, num_random_features)
    x = jax.random.normal(k_x, (batch, seq, embed_dim), jnp.float32)

    fwd = jax.jit(partial(derf_attention_forward, num_heads=num_heads))
    out = jax.block_until_ready(fwd(params, x))

    assert out.shape == (batch, seq, embed_dim)
    assert bool(jnp.all(jnp.isfinite(out)))
    print("KERNEL_OK")
</pallas_src>

<mosaic_0001>
module attributes {stable_mosaic.version = 11 : i64} {
  func.func @_linear_kernel(%arg0: i32, %arg1: memref<16x32xf32, #tpu.memory_space<vmem>>, %arg2: memref<32x96xbf16, #tpu.memory_space<vmem>>, %arg3: memref<1x96xf32, #tpu.memory_space<vmem>>, %arg4: memref<16x96xf32, #tpu.memory_space<vmem>>) attributes {dimension_semantics = [#tpu.dimension_semantics<parallel>], iteration_bounds = array<i64: 1>, scalar_prefetch = 0 : i64, scratch_operands = 0 : i64, tpu.core_type = #tpu.core_type<tc>, window_params = [{transform_indices = @transform_0, window_bounds = array<i64: 16, 32>}, {pipeline_mode = #tpu.pipeline_mode<synchronous>, transform_indices = @transform_1, window_bounds = array<i64: 32, 96>}, {pipeline_mode = #tpu.pipeline_mode<synchronous>, transform_indices = @transform_2, window_bounds = array<i64: 1, 96>}, {transform_indices = @transform_3, window_bounds = array<i64: 16, 96>}]} {
    %c0 = arith.constant 0 : index
    %c0_0 = arith.constant 0 : index
    %0 = vector.load %arg1[%c0, %c0_0] : memref<16x32xf32, #tpu.memory_space<vmem>>, vector<16x32xf32>
    %1 = arith.truncf %0 : vector<16x32xf32> to vector<16x32xbf16>
    %c0_1 = arith.constant 0 : index
    %c0_2 = arith.constant 0 : index
    %2 = vector.load %arg2[%c0_1, %c0_2] : memref<32x96xbf16, #tpu.memory_space<vmem>>, vector<32x96xbf16>
    %cst = arith.constant dense<0.000000e+00> : vector<16x96xf32>
    %3 = tpu.matmul %1, %2, %cst {dimension_numbers = #tpu.dot_dimension_numbers<[1], [0], [0], [1], [0, 0, 1, 1], [], []>} : vector<16x32xbf16>, vector<32x96xbf16>, vector<16x96xf32> -> vector<16x96xf32>
    %c0_3 = arith.constant 0 : index
    %c0_4 = arith.constant 0 : index
    %4 = vector.load %arg3[%c0_3, %c0_4] : memref<1x96xf32, #tpu.memory_space<vmem>>, vector<1x96xf32>
    %5 = vector.broadcast %4 : vector<1x96xf32> to vector<16x96xf32>
    %6 = arith.addf %3, %5 : vector<16x96xf32>
    %c0_5 = arith.constant 0 : index
    %c0_6 = arith.constant 0 : index
    %7 = vector.load %arg4[%c0_5, %c0_6] : memref<16x96xf32, #tpu.memory_space<vmem>>, vector<16x96xf32>
    tpu.vector_store %arg4[%c0_5, %c0_6], %6 {strides = array<i32>} : memref<16x96xf32, #tpu.memory_space<vmem>>, vector<16x96xf32>,
    return
  }
  func.func @transform_0(%arg0: i32) -> (i32, i32) {
    %c0_i32 = arith.constant 0 : i32
    %c0_i32_0 = arith.constant 0 : i32
    return %arg0, %c0_i32 : i32, i32
  }
  func.func @transform_1(%arg0: i32) -> (i32, i32) {
    %c0_i32 = arith.constant 0 : i32
    %c0_i32_0 = arith.constant 0 : i32
    %c0_i32_1 = arith.constant 0 : i32
    return %c0_i32, %c0_i32_0 : i32, i32
  }
  func.func @transform_2(%arg0: i32) -> (i32, i32) {
    %c0_i32 = arith.constant 0 : i32
    %c0_i32_0 = arith.constant 0 : i32
    %c0_i32_1 = arith.constant 0 : i32
    return %c0_i32, %c0_i32_0 : i32, i32
  }
  func.func @transform_3(%arg0: i32) -> (i32, i32) {
    %c0_i32 = arith.constant 0 : i32
    %c0_i32_0 = arith.constant 0 : i32
    return %arg0, %c0_i32 : i32, i32
  }
}

module attributes {stable_mosaic.version = 11 : i64} {
  func.func @_derf_attn_kernel(%arg0: i32, %arg1: i32, %arg2: i32, %arg3: memref<1x8x32xf32, #tpu.memory_space<vmem>>, %arg4: memref<1x8x32xf32, #tpu.memory_space<vmem>>, %arg5: memref<1x8x32xf32, #tpu.memory_space<vmem>>, %arg6: memref<1x32x32xbf16, #tpu.memory_space<vmem>>, %arg7: memref<1x1x32xf32, #tpu.memory_space<vmem>>, %arg8: memref<32x32xf32, #tpu.memory_space<vmem>>, %arg9: memref<32x32xbf16, #tpu.memory_space<vmem>>, %arg10: memref<1x32xf32, #tpu.memory_space<vmem>>, %arg11: memref<1x8x32xf32, #tpu.memory_space<vmem>>, %arg12: memref<8x32xbf16, #tpu.memory_space<vmem>>, %arg13: memref<2x8x1xf32, #tpu.memory_space<vmem>>, %arg14: memref<2x8x16xf32, #tpu.memory_space<vmem>>) attributes {dimension_semantics = [#tpu.dimension_semantics<parallel>, #tpu.dimension_semantics<parallel>, #tpu.dimension_semantics<arbitrary>], iteration_bounds = array<i64: 2, 1, 1>, scalar_prefetch = 0 : i64, scratch_operands = 3 : i64, tpu.core_type = #tpu.core_type<tc>, window_params = [{transform_indices = @transform_0, window_bounds = array<i64: 1, 8, 32>}, {transform_indices = @transform_1, window_bounds = array<i64: 1, 8, 32>}, {transform_indices = @transform_2, window_bounds = array<i64: 1, 8, 32>}, {transform_indices = @transform_3, window_bounds = array<i64: 1, 32, 32>}, {transform_indices = @transform_4, window_bounds = array<i64: 1, 1, 32>}, {pipeline_mode = #tpu.pipeline_mode<synchronous>, transform_indices = @transform_5, window_bounds = array<i64: 32, 32>}, {pipeline_mode = #tpu.pipeline_mode<synchronous>, transform_indices = @transform_6, window_bounds = array<i64: 32, 32>}, {pipeline_mode = #tpu.pipeline_mode<synchronous>, transform_indices = @transform_7, window_bounds = array<i64: 1, 32>}, {transform_indices = @transform_8, window_bounds = array<i64: 1, 8, 32>}]} {
    %c0 = arith.constant 0 : index
    %c0_0 = arith.constant 0 : index
    %c0_1 = arith.constant 0 : index
    %0 = vector.load %arg6[%c0, %c0_0, %c0_1] : memref<1x32x32xbf16, #tpu.memory_space<vmem>>, vector<1x32x32xbf16>
    %1 = vector.shape_cast %0 : vector<1x32x32xbf16> to vector<32x32xbf16>
    %c0_2 = arith.constant 0 : index
    %c0_3 = arith.constant 0 : index
    %c0_4 = arith.constant 0 : index
    %2 = vector.load %arg7[%c0_2, %c0_3, %c0_4] : memref<1x1x32xf32, #tpu.memory_space<vmem>>, vector<1x1x32xf32>
    %3 = vector.shape_cast %2 : vector<1x1x32xf32> to vector<1x32xf32>
    %c0_5 = arith.constant 0 : index
    %c0_6 = arith.constant 0 : index
    %4 = vector.load %arg8[%c0_5, %c0_6] : memref<32x32xf32, #tpu.memory_space<vmem>>, vector<32x32xf32>
    %c0_i32 = arith.constant 0 : i32
    %5 = arith.cmpi eq, %arg2, %c0_i32 : i32
    %6 = arith.extui %5 : i1 to i32
    %c0_i32_7 = arith.constant 0 : i32
    %7 = arith.cmpi ne, %6, %c0_i32_7 : i32
    scf.if %7 {
      %cst_50 = arith.constant 0.000000e+00 : f32
      %76 = vector.broadcast %cst_50 : f32 to vector<2x8x1xf32>
      %c0_51 = arith.constant 0 : index
      %c0_52 = arith.constant 0 : index
      %c0_53 = arith.constant 0 : index
      %77 = vector.load %arg13[%c0_51, %c0_52, %c0_53] : memref<2x8x1xf32, #tpu.memory_space<vmem>>, vector<2x8x1xf32>
      tpu.vector_store %arg13[%c0_51, %c0_52, %c0_53], %76 {strides = array<i32>} : memref<2x8x1xf32, #tpu.memory_space<vmem>>, vector<2x8x1xf32>,
      %cst_54 = arith.constant 0.000000e+00 : f32
      %78 = vector.broadcast %cst_54 : f32 to vector<2x8x16xf32>
      %c0_55 = arith.constant 0 : index
      %c0_56 = arith.constant 0 : index
      %c0_57 = arith.constant 0 : index
      %79 = vector.load %arg14[%c0_55, %c0_56, %c0_57] : memref<2x8x16xf32, #tpu.memory_space<vmem>>, vector<2x8x16xf32>
      tpu.vector_store %arg14[%c0_55, %c0_56, %c0_57], %78 {strides = array<i32>} : memref<2x8x16xf32, #tpu.memory_space<vmem>>, vector<2x8x16xf32>,
      %c0_58 = arith.constant 0 : index
      %c0_59 = arith.constant 0 : index
      %c0_60 = arith.constant 0 : index
      %80 = vector.load %arg3[%c0_58, %c0_59, %c0_60] : memref<1x8x32xf32, #tpu.memory_space<vmem>>, vector<1x8x32xf32>
      %81 = vector.shape_cast %80 : vector<1x8x32xf32> to vector<8x32xf32>
      %82 = arith.truncf %81 : vector<8x32xf32> to vector<8x32xbf16>
      %cst_61 = arith.constant dense<0.000000e+00> : vector<8x32xf32>
      %83 = tpu.matmul %82, %1, %cst_61 {dimension_numbers = #tpu.dot_dimension_numbers<[1], [0], [0], [1], [0, 0, 1, 1], [], []>} : vector<8x32xbf16>, vector<32x32xbf16>, vector<8x32xf32> -> vector<8x32xf32>
      %84 = vector.broadcast %3 : vector<1x32xf32> to vector<8x32xf32>
      %85 = arith.addf %83, %84 : vector<8x32xf32>
      %cst_62 = arith.constant dense<0xFF800000> : vector<8xf32>
      %86 = vector.multi_reduction <maximumf>, %85, %cst_62 [1] : vector<8x32xf32> to vector<8xf32>
      %87 = vector.shape_cast %86 : vector<8xf32> to vector<8x1xf32>
      %88 = vector.broadcast %87 : vector<8x1xf32> to vector<8x32xf32>
      %89 = arith.subf %85, %88 : vector<8x32xf32>
      %90 = math.exp %89 : vector<8x32xf32>
      %91 = arith.mulf %90, %90 : vector<8x32xf32>
      %cst_63 = arith.constant dense<0.000000e+00> : vector<8x32xf32>
      %92 = tpu.matmul %91, %4, %cst_63 {dimension_numbers = #tpu.dot_dimension_numbers<[1], [0], [0], [1], [0, 0, 1, 1], [], []>} : vector<8x32xf32>, vector<32x32xf32>, vector<8x32xf32> -> vector<8x32xf32>
      %cst_64 = arith.constant 1.000000e-30 : f32
      %93 = vector.broadcast %cst_64 : f32 to vector<8x32xf32>
      %94 = arith.maximumf %92, %93 : vector<8x32xf32>
      %95 = math.rsqrt %94 : vector<8x32xf32>
      %96 = arith.mulf %90, %95 : vector<8x32xf32>
      %97 = arith.truncf %96 : vector<8x32xf32> to vector<8x32xbf16>
      %c0_65 = arith.constant 0 : index
      %c0_66 = arith.constant 0 : index
      %98 = vector.load %arg12[%c0_65, %c0_66] : memref<8x32xbf16, #tpu.memory_space<vmem>>, vector<8x32xbf16>
      tpu.vector_store %arg12[%c0_65, %c0_66], %97 {strides = array<i32>} : memref<8x32xbf16, #tpu.memory_space<vmem>>, vector<8x32xbf16>,
    } else {
    }
    %c0_8 = arith.constant 0 : index
    %c0_9 = arith.constant 0 : index
    %c0_10 = arith.constant 0 : index
    %8 = vector.load %arg4[%c0_8, %c0_9, %c0_10] : memref<1x8x32xf32, #tpu.memory_space<vmem>>, vector<1x8x32xf32>
    %9 = vector.shape_cast %8 : vector<1x8x32xf32> to vector<8x32xf32>
    %10 = arith.truncf %9 : vector<8x32xf32> to vector<8x32xbf16>
    %cst = arith.constant dense<0.000000e+00> : vector<8x32xf32>
    %11 = tpu.matmul %10, %1, %cst {dimension_numbers = #tpu.dot_dimension_numbers<[1], [0], [0], [1], [0, 0, 1, 1], [], []>} : vector<8x32xbf16>, vector<32x32xbf16>, vector<8x32xf32> -> vector<8x32xf32>
    %12 = vector.broadcast %3 : vector<1x32xf32> to vector<8x32xf32>
    %13 = arith.addf %11, %12 : vector<8x32xf32>
    %cst_11 = arith.constant dense<0xFF800000> : vector<8xf32>
    %14 = vector.multi_reduction <maximumf>, %13, %cst_11 [1] : vector<8x32xf32> to vector<8xf32>
    %15 = vector.shape_cast %14 : vector<8xf32> to vector<8x1xf32>
    %16 = vector.broadcast %15 : vector<8x1xf32> to vector<8x32xf32>
    %17 = arith.subf %13, %16 : vector<8x32xf32>
    %18 = math.exp %17 : vector<8x32xf32>
    %19 = arith.mulf %18, %18 : vector<8x32xf32>
    %cst_12 = arith.constant dense<0.000000e+00> : vector<8x32xf32>
    %20 = tpu.matmul %19, %4, %cst_12 {dimension_numbers = #tpu.dot_dimension_numbers<[1], [0], [0], [1], [0, 0, 1, 1], [], []>} : vector<8x32xf32>, vector<32x32xf32>, vector<8x32xf32> -> vector<8x32xf32>
    %cst_13 = arith.constant 1.000000e-30 : f32
    %21 = vector.broadcast %cst_13 : f32 to vector<8x32xf32>
    %22 = arith.maximumf %20, %21 : vector<8x32xf32>
    %23 = math.rsqrt %22 : vector<8x32xf32>
    %24 = arith.mulf %18, %23 : vector<8x32xf32>
    %25 = arith.truncf %24 : vector<8x32xf32> to vector<8x32xbf16>
    %c0_14 = arith.constant 0 : index
    %c0_15 = arith.constant 0 : index
    %c0_16 = arith.constant 0 : index
    %26 = vector.load %arg5[%c0_14, %c0_15, %c0_16] : memref<1x8x32xf32, #tpu.memory_space<vmem>>, vector<1x8x32xf32>
    %27 = vector.shape_cast %26 : vector<1x8x32xf32> to vector<8x32xf32>
    %c0_17 = arith.constant 0 : index
    %c0_18 = arith.constant 0 : index
    %28 = vector.load %arg12[%c0_17, %c0_18] : memref<8x32xbf16, #tpu.memory_space<vmem>>, vector<8x32xbf16>
    %29 = vector.extract_strided_slice %28 {offsets = [0, 0], sizes = [8, 16], strides = [1, 1]} : vector<8x32xbf16> to vector<8x16xbf16>
    %30 = vector.extract_strided_slice %25 {offsets = [0, 0], sizes = [8, 16], strides = [1, 1]} : vector<8x32xbf16> to vector<8x16xbf16>
    %cst_19 = arith.constant dense<0.000000e+00> : vector<8x8xf32>
    %31 = tpu.matmul %29, %30, %cst_19 {dimension_numbers = #tpu.dot_dimension_numbers<[1], [1], [0], [0], [0, 0, 1, 0], [], []>} : vector<8x16xbf16>, vector<8x16xbf16>, vector<8x8xf32> -> vector<8x8xf32>
    %32 = math.exp %31 : vector<8x8xf32>
    %c0_20 = arith.constant 0 : index
    %c0_21 = arith.constant 0 : index
    %c0_22 = arith.constant 0 : index
    %33 = vector.load %arg13[%c0_20, %c0_21, %c0_22] : memref<2x8x1xf32, #tpu.memory_space<vmem>>, vector<1x8x1xf32>
    %34 = vector.shape_cast %33 : vector<1x8x1xf32> to vector<8x1xf32>
    %cst_23 = arith.constant dense<0.000000e+00> : vector<8xf32>
    %35 = vector.multi_reduction <add>, %32, %cst_23 [1] : vector<8x8xf32> to vector<8xf32>
    %36 = vector.shape_cast %35 : vector<8xf32> to vector<8x1xf32>
    %37 = arith.addf %34, %36 : vector<8x1xf32>
    %c0_24 = arith.constant 0 : index
    %c0_25 = arith.constant 0 : index
    %c0_26 = arith.constant 0 : index
    %38 = vector.load %arg13[%c0_24, %c0_25, %c0_26] : memref<2x8x1xf32, #tpu.memory_space<vmem>>, vector<1x8x1xf32>
    %39 = vector.shape_cast %38 : vector<1x8x1xf32> to vector<8x1xf32>
    %40 = vector.shape_cast %37 : vector<8x1xf32> to vector<1x8x1xf32>
    tpu.vector_store %arg13[%c0_24, %c0_25, %c0_26], %40 {strides = array<i32>} : memref<2x8x1xf32, #tpu.memory_space<vmem>>, vector<1x8x1xf32>,
    %c0_27 = arith.constant 0 : index
    %c0_28 = arith.constant 0 : index
    %c0_29 = arith.constant 0 : index
    %41 = vector.load %arg14[%c0_27, %c0_28, %c0_29] : memref<2x8x16xf32, #tpu.memory_space<vmem>>, vector<1x8x16xf32>
    %42 = vector.shape_cast %41 : vector<1x8x16xf32> to vector<8x16xf32>
    %43 = arith.truncf %32 : vector<8x8xf32> to vector<8x8xbf16>
    %44 = vector.extract_strided_slice %27 {offsets = [0, 0], sizes = [8, 16], strides = [1, 1]} : vector<8x32xf32> to vector<8x16xf32>
    %45 = arith.truncf %44 : vector<8x16xf32> to vector<8x16xbf16>
    %cst_30 = arith.constant dense<0.000000e+00> : vector<8x16xf32>
    %46 = tpu.matmul %43, %45, %cst_30 {dimension_numbers = #tpu.dot_dimension_numbers<[1], [0], [0], [1], [0, 0, 1, 1], [], []>} : vector<8x8xbf16>, vector<8x16xbf16>, vector<8x16xf32> -> vector<8x16xf32>
    %47 = arith.addf %42, %46 : vector<8x16xf32>
    %c0_31 = arith.constant 0 : index
    %c0_32 = arith.constant 0 : index
    %c0_33 = arith.constant 0 : index
    %48 = vector.load %arg14[%c0_31, %c0_32, %c0_33] : memref<2x8x16xf32, #tpu.memory_space<vmem>>, vector<1x8x16xf32>
    %49 = vector.shape_cast %48 : vector<1x8x16xf32> to vector<8x16xf32>
    %50 = vector.shape_cast %47 : vector<8x16xf32> to vector<1x8x16xf32>
    tpu.vector_store %arg14[%c0_31, %c0_32, %c0_33], %50 {strides = array<i32>} : memref<2x8x16xf32, #tpu.memory_space<vmem>>, vector<1x8x16xf32>,
    %51 = vector.extract_strided_slice %28 {offsets = [0, 16], sizes = [8, 16], strides = [1, 1]} : vector<8x32xbf16> to vector<8x16xbf16>
    %52 = vector.extract_strided_slice %25 {offsets = [0, 16], sizes = [8, 16], strides = [1, 1]} : vector<8x32xbf16> to vector<8x16xbf16>
    %cst_34 = arith.constant dense<0.000000e+00> : vector<8x8xf32>
    %53 = tpu.matmul %51, %52, %cst_34 {dimension_numbers = #tpu.dot_dimension_numbers<[1], [1], [0], [0], [0, 0, 1, 0], [], []>} : vector<8x16xbf16>, vector<8x16xbf16>, vector<8x8xf32> -> vector<8x8xf32>
    %54 = math.exp %53 : vector<8x8xf32>
    %c1 = arith.constant 1 : index
    %c0_35 = arith.constant 0 : index
    %c0_36 = arith.constant 0 : index
    %55 = vector.load %arg13[%c1, %c0_35, %c0_36] : memref<2x8x1xf32, #tpu.memory_space<vmem>>, vector<1x8x1xf32>
    %56 = vector.shape_cast %55 : vector<1x8x1xf32> to vector<8x1xf32>
    %cst_37 = arith.constant dense<0.000000e+00> : vector<8xf32>
    %57 = vector.multi_reduction <add>, %54, %cst_37 [1] : vector<8x8xf32> to vector<8xf32>
    %58 = vector.shape_cast %57 : vector<8xf32> to vector<8x1xf32>
    %59 = arith.addf %56, %58 : vector<8x1xf32>
    %c1_38 = arith.constant 1 : index
    %c0_39 = arith.constant 0 : index
    %c0_40 = arith.constant 0 : index
    %60 = vector.load %arg13[%c1_38, %c0_39, %c0_40] : memref<2x8x1xf32, #tpu.memory_space<vmem>>, vector<1x8x1xf32>
    %61 = vector.shape_cast %60 : vector<1x8x1xf32> to vector<8x1xf32>
    %62 = vector.shape_cast %59 : vector<8x1xf32> to vector<1x8x1xf32>
    tpu.vector_store %arg13[%c1_38, %c0_39, %c0_40], %62 {strides = array<i32>} : memref<2x8x1xf32, #tpu.memory_space<vmem>>, vector<1x8x1xf32>,
    %c1_41 = arith.constant 1 : index
    %c0_42 = arith.constant 0 : index
    %c0_43 = arith.constant 0 : index
    %63 = vector.load %arg14[%c1_41, %c0_42, %c0_43] : memref<2x8x16xf32, #tpu.memory_space<vmem>>, vector<1x8x16xf32>
    %64 = vector.shape_cast %63 : vector<1x8x16xf32> to vector<8x16xf32>
    %65 = arith.truncf %54 : vector<8x8xf32> to vector<8x8xbf16>
    %66 = vector.extract_strided_slice %27 {offsets = [0, 16], sizes = [8, 16], strides = [1, 1]} : vector<8x32xf32> to vector<8x16xf32>
    %67 = arith.truncf %66 : vector<8x16xf32> to vector<8x16xbf16>
    %cst_44 = arith.constant dense<0.000000e+00> : vector<8x16xf32>
    %68 = tpu.matmul %65, %67, %cst_44 {dimension_numbers = #tpu.dot_dimension_numbers<[1], [0], [0], [1], [0, 0, 1, 1], [], []>} : vector<8x8xbf16>, vector<8x16xbf16>, vector<8x16xf32> -> vector<8x16xf32>
    %69 = arith.addf %64, %68 : vector<8x16xf32>
    %c1_45 = arith.constant 1 : index
    %c0_46 = arith.constant 0 : index
    %c0_47 = arith.constant 0 : index
    %70 = vector.load %arg14[%c1_45, %c0_46, %c0_47] : memref<2x8x16xf32, #tpu.memory_space<vmem>>, vector<1x8x16xf32>
    %71 = vector.shape_cast %70 : vector<1x8x16xf32> to vector<8x16xf32>
    %72 = vector.shape_cast %69 : vector<8x16xf32> to vector<1x8x16xf32>
    tpu.vector_store %arg14[%c1_45, %c0_46, %c0_47], %72 {strides = array<i32>} : memref<2x8x16xf32, #tpu.memory_space<vmem>>, vector<1x8x16xf32>,
    %c0_i32_48 = arith.constant 0 : i32
    %73 = arith.cmpi eq, %arg2, %c0_i32_48 : i32
    %74 = arith.extui %73 : i1 to i32
    %c0_i32_49 = arith.constant 0 : i32
    %75 = arith.cmpi ne, %74, %c0_i32_49 : i32
    scf.if %75 {
      %c0_50 = arith.constant 0 : index
      %c0_51 = arith.constant 0 : index
      %c0_52 = arith.constant 0 : index
      %76 = vector.load %arg13[%c0_50, %c0_51, %c0_52] : memref<2x8x1xf32, #tpu.memory_space<vmem>>, vector<1x8x1xf32>
      %77 = vector.shape_cast %76 : vector<1x8x1xf32> to vector<8x1xf32>
      %78 = tpu.reciprocal %77 {approx = true} : vector<8x1xf32> -> vector<8x1xf32>
      %c0_53 = arith.constant 0 : index
      %c0_54 = arith.constant 0 : index
      %c0_55 = arith.constant 0 : index
      %79 = vector.load %arg14[%c0_53, %c0_54, %c0_55] : memref<2x8x16xf32, #tpu.memory_space<vmem>>, vector<1x8x16xf32>
      %80 = vector.shape_cast %79 : vector<1x8x16xf32> to vector<8x16xf32>
      %81 = vector.broadcast %78 : vector<8x1xf32> to vector<8x16xf32>
      %82 = arith.mulf %80, %81 : vector<8x16xf32>
      %c1_56 = arith.constant 1 : index
      %c0_57 = arith.constant 0 : index
      %c0_58 = arith.constant 0 : index
      %83 = vector.load %arg13[%c1_56, %c0_57, %c0_58] : memref<2x8x1xf32, #tpu.memory_space<vmem>>, vector<1x8x1xf32>
      %84 = vector.shape_cast %83 : vector<1x8x1xf32> to vector<8x1xf32>
      %85 = tpu.reciprocal %84 {approx = true} : vector<8x1xf32> -> vector<8x1xf32>
      %c1_59 = arith.constant 1 : index
      %c0_60 = arith.constant 0 : index
      %c0_61 = arith.constant 0 : index
      %86 = vector.load %arg14[%c1_59, %c0_60, %c0_61] : memref<2x8x16xf32, #tpu.memory_space<vmem>>, vector<1x8x16xf32>
      %87 = vector.shape_cast %86 : vector<1x8x16xf32> to vector<8x16xf32>
      %88 = vector.broadcast %85 : vector<8x1xf32> to vector<8x16xf32>
      %89 = arith.mulf %87, %88 : vector<8x16xf32>
      %90 = tpu.concatenate %82, %89 in 1 : vector<8x16xf32>, vector<8x16xf32> -> vector<8x32xf32>
      %91 = arith.truncf %90 : vector<8x32xf32> to vector<8x32xbf16>
      %c0_62 = arith.constant 0 : index
      %c0_63 = arith.constant 0 : index
      %92 = vector.load %arg9[%c0_62, %c0_63] : memref<32x32xbf16, #tpu.memory_space<vmem>>, vector<32x32xbf16>
      %cst_64 = arith.constant dense<0.000000e+00> : vector<8x32xf32>
      %93 = tpu.matmul %91, %92, %cst_64 {dimension_numbers = #tpu.dot_dimension_numbers<[1], [0], [0], [1], [0, 0, 1, 1], [], []>} : vector<8x32xbf16>, vector<32x32xbf16>, vector<8x32xf32> -> vector<8x32xf32>
      %c0_65 = arith.constant 0 : index
      %c0_66 = arith.constant 0 : index
      %94 = vector.load %arg10[%c0_65, %c0_66] : memref<1x32xf32, #tpu.memory_space<vmem>>, vector<1x32xf32>
      %95 = vector.broadcast %94 : vector<1x32xf32> to vector<8x32xf32>
      %96 = arith.addf %93, %95 : vector<8x32xf32>
      %c0_67 = arith.constant 0 : index
      %c0_68 = arith.constant 0 : index
      %c0_69 = arith.constant 0 : index
      %97 = vector.load %arg11[%c0_67, %c0_68, %c0_69] : memref<1x8x32xf32, #tpu.memory_space<vmem>>, vector<1x8x32xf32>
      %98 = vector.shape_cast %97 : vector<1x8x32xf32> to vector<8x32xf32>
      %99 = vector.shape_cast %96 : vector<8x32xf32> to vector<1x8x32xf32>
      tpu.vector_store %arg11[%c0_67, %c0_68, %c0_69], %99 {strides = array<i32>} : memref<1x8x32xf32, #tpu.memory_space<vmem>>, vector<1x8x32xf32>,
    } else {
    }
    return
  }
  func.func @transform_0(%arg0: i32, %arg1: i32, %arg2: i32) -> (i32, i32, i32) {
    %c0_i32 = arith.constant 0 : i32
    %c0_i32_0 = arith.constant 0 : i32
    return %arg0, %arg1, %c0_i32 : i32, i32, i32
  }
  func.func @transform_1(%arg0: i32, %arg1: i32, %arg2: i32) -> (i32, i32, i32) {
    %c0_i32 = arith.constant 0 : i32
    %c0_i32_0 = arith.constant 0 : i32
    return %arg0, %arg2, %c0_i32 : i32, i32, i32
  }
  func.func @transform_2(%arg0: i32, %arg1: i32, %arg2: i32) -> (i32, i32, i32) {
    %c0_i32 = arith.constant 0 : i32
    %c0_i32_0 = arith.constant 0 : i32
    return %arg0, %arg2, %c0_i32 : i32, i32, i32
  }
  func.func @transform_3(%arg0: i32, %arg1: i32, %arg2: i32) -> (i32, i32, i32) {
    %c0_i32 = arith.constant 0 : i32
    %c0_i32_0 = arith.constant 0 : i32
    %c0_i32_1 = arith.constant 0 : i32
    return %arg0, %c0_i32, %c0_i32_0 : i32, i32, i32
  }
  func.func @transform_4(%arg0: i32, %arg1: i32, %arg2: i32) -> (i32, i32, i32) {
    %c0_i32 = arith.constant 0 : i32
    %c0_i32_0 = arith.constant 0 : i32
    %c0_i32_1 = arith.constant 0 : i32
    return %arg0, %c0_i32, %c0_i32_0 : i32, i32, i32
  }
  func.func @transform_5(%arg0: i32, %arg1: i32, %arg2: i32) -> (i32, i32) {
    %c0_i32 = arith.constant 0 : i32
    %c0_i32_0 = arith.constant 0 : i32
    %c0_i32_1 = arith.constant 0 : i32
    return %c0_i32, %c0_i32_0 : i32, i32
  }
  func.func @transform_6(%arg0: i32, %arg1: i32, %arg2: i32) -> (i32, i32) {
    %c0_i32 = arith.constant 0 : i32
    %c0_i32_0 = arith.constant 0 : i32
    %c0_i32_1 = arith.constant 0 : i32
    return %c0_i32, %c0_i32_0 : i32, i32
  }
  func.func @transform_7(%arg0: i32, %arg1: i32, %arg2: i32) -> (i32, i32) {
    %c0_i32 = arith.constant 0 : i32
    %c0_i32_0 = arith.constant 0 : i32
    %c0_i32_1 = arith.constant 0 : i32
    return %c0_i32, %c0_i32_0 : i32, i32
  }
  func.func @transform_8(%arg0: i32, %arg1: i32, %arg2: i32) -> (i32, i32, i32) {
    %c0_i32 = arith.constant 0 : i32
    %c0_i32_0 = arith.constant 0 : i32
    return %arg0, %arg1, %c0_i32 : i32, i32, i32
  }
}

</mosaic_0001>

<bundles_post_ra>
// kernel: custom-call.57
= control target key start
LH: loop header
LB: loop body
LE: loop exit
PB: predicated region body
PF: predicated region fallthrough
CT: control target
= control target key end

     0   :  { %s947_s9 = smov 0   ;;  %s949_s10 = smov 0   ;;  %s1229_s0 = inlined_call_operand.vmem [shape: f32[2,2,32,16], index: 0, kind: input, shape index: {}]   ;;  %s1230_s1 = inlined_call_operand.vmem [shape: f32[2,2,32,16], index: 1, kind: output, shape index: {0}]   ;;  %s1231_s2 = inlined_call_operand.vmem [shape: f32[2,2,16], index: 2, kind: output, shape index: {1}]  }
   0x1   :  { %s951_s11 = smov 0   ;;  %s953_s12 = smov 0  }
   0x2   :  { %s955_s13 = smov 0   ;;  %s957_s14 = smov 0  }
   0x3   :  { %s959_s15 = smov 0  }
   0x4 LB: > { %s31_s16 = sadd.s32 1, %s916_s13  ;;  %s35_s17 = sadd.s32 1, %s920_s14  ;;  %s924_s15 = sphi %s959_s15, %s9_s15   ;;  %s920_s14 = sphi %s957_s14, %s1248_s14   ;;  %s916_s13 = sphi %s955_s13, %s1247_s13   ;;  %s912_s12 = sphi %s953_s12, %s1246_s12   ;;  %s908_s11 = sphi %s951_s11, %s1245_s11   ;;  %s904_s10 = sphi %s949_s10, %s1244_s10   ;;  %s900_s9 = sphi %s947_s9, %s1243_s9  }
   0x5   : > { %p33_p0 = scmp.ge.s32.totalorder %s31_s16, 2  ;;  %s40_s18 = ssub.s32 0, %s916_s13 }
   0x6   : > { %s741_s19 = smin.u32 %s916_s13, %s40_s18  ;;  %s739_s22 = sadd.s32 4294967295, %s924_s15  }
   0x7   : > { %s1250_s16 = smov (%p33_p0, %s31_s16), 0  ;;  %s1252_s17 = smov (!%p33_p0, %s35_s17), %s920_s14 }
   0x8   : > { %p37_p1 = scmp.ge.s32.totalorder %s1252_s17, 2  ;;  %s42_s20 = sshrl.u32 %s741_s19, 3 }
   0x9   : > { %s46_s21 = ssub.s32 0, %s1250_s16  ;;  %p66_p2 = scmp.ne.s32.totalorder %s904_s10, %s900_s9 }
   0xa   : > { %s1254_s17 = smov (%p37_p1, %s1252_s17), 0  ;;  %s742_s23 = smin.u32 %s46_s21, %s1250_s16 }
   0xb   : > { %s48_s24 = sshrl.u32 %s742_s23, 3  ;;  %s51_s25 = ssub.s32 %s920_s14, %s1254_s17 }
   0xc   : > { %p67_p3 = scmp.eq.s32.totalorder %s739_s22, 3  ;;  %s52_s26 = ssub.s32 %s42_s20, %s48_s24 }
   0xd   : > { %s56_s27 = sadd.s32 1, %s904_s10  ;;  %s53_s28 = sor.u32 %s52_s26, %s51_s25 }
   0xe   : > { %p1001_p4 = por %p67_p3, %p66_p2  ;;  %p54_p5 = scmp.eq.s32.totalorder %s53_s28, 0 }
   0xf   : > { %p744_p6 = scmp.ge.s32.totalorder %s924_s15, 4 }
  0x10   : > { %s1006_s30 = scalar_select %p54_p5, %s904_s10, %s56_s27  }
  0x11   : > { %89 = sbr.rel (%p744_p6) target bundleno = 26 (0x1a), region = 16  ;;  %s91_s3 = sand.u32 (!%p744_p6), 1, %s924_s15  }
  0x12   : > { %s746_s4 = sshll.u32 (!%p744_p6), %s916_s13, 2  ;;  %s745_s5 = sshll.u32 (!%p744_p6), %s91_s3, 5 }
  0x13   : > { %s747_s6 = sshll.u32 (!%p744_p6), %s920_s14, 3  ;;  %s93_s21 = scalar_lea.vmem (!%p744_p6), [#allocation0], %s745_s5 }
  0x14   : > { %s99_s7 = sadd.s32 (!%p744_p6), %s747_s6, %s746_s4 }
  0x15   : > { %s748_s8 = sshll.u32 (!%p744_p6), %s99_s7, 3 }
  0x16   : > { %s101_s20 = scalar_lea.vmem (!%p744_p6), %s1229_s0, %s748_s8 }
  0x17   : > { %v135_v0 = vld [vmem:[%s101_s20] sm:$0xff] (!%p744_p6)  ;;  %v137_v1 = vld [vmem:[%s101_s20 + $0x8] sm:$0xff] (!%p744_p6)  ;;  %v139_v2 = vld [vmem:[%s101_s20 + $0x10] sm:$0xff] (!%p744_p6) }
  0x18   : > { %136 = vst [vmem:[%s93_s21] sm:$0xff] %v135_v0  ;;  %138 = vst [vmem:[%s93_s21 + $0x8] sm:$0xff] %v137_v1  ;;  %v141_v3 = vld [vmem:[%s101_s20 + $0x18] sm:$0xff] }
  0x19   : > { %140 = vst [vmem:[%s93_s21 + $0x10] sm:$0xff] %v139_v2  ;;  %142 = vst [vmem:[%s93_s21 + $0x18] sm:$0xff] %v141_v3 }
  0x1a PF: > { %p749_p7 = scmp.ge.s32.totalorder %s924_s15, 1  ;;  %p147_p8 = scmp.lt.s32.totalorder %s924_s15, 5 }
  0x1c   : > { %p148_p9 = pnand %p749_p7, %p147_p8 }
  0x1e   : > { %151 = sbr.rel (%p148_p9) target bundleno = 357 (0x165), region = 54 }
  0x25   : > { %s154_s23 = sand.u32 1, %s739_s22   ;;  %s168_s24 = sand.u32 1, %s900_s9   ;;  %v930_v8 = vmov 0.0  }
  0x26   : > { %s750_s25 = sshll.u32 %s154_s23, 5  ;;  %s1020_s26 = sshll.u32 %s168_s24, 1 }
  0x27   : > { %s179_s27 = sand.u32 7, %s908_s11   ;;  %s156_s28 = scalar_lea.vmem [#allocation0], %s750_s25 }
  0x28   : > { %v181_v4 = vld [vmem:[%s156_s28] sm:$0xff]  ;;  %v753_v5 = vld [vmem:[%s156_s28 + $0x8] sm:$0xff]  ;;  %v755_v6 = vld [vmem:[%s156_s28 + $0x10] sm:$0xff]  ;;  %s1023_s3 = scalar_lea.vmem [#allocation1], %s750_s25  ;;  %s1029_s9 = scalar_lea.vmem [#allocation2], %s179_s27 }
  0x29   : > { %182 = vst [vmem:[%s1023_s3] sm:$0xff] %v181_v4  ;;  %754 = vst [vmem:[%s1023_s3 + $0x8] sm:$0xff] %v753_v5  ;;  %v757_v7 = vld [vmem:[%s156_s28 + $0x18] sm:$0xff]  ;;  %s170_s22 = scalar_lea.vmem [#allocation3], %s1020_s26  ;;  %s1033_s4 = smov 0  }
  0x2a   : > { %756 = vst [vmem:[%s1023_s3 + $0x10] sm:$0xff] %v755_v6  ;;  %758 = vst [vmem:[%s1023_s3 + $0x18] sm:$0xff] %v757_v7 }
  0x2b   : > { %195 = vst [vmem:[%s1029_s9] sm:$0x1] %v930_v8 }
  0x2c LB: >> { %v203_v9 = vlaneseq  ;;  %v1043_v12 = vstv %s928_s4  ;;  %s260_s5 = scalar_lea.vmem %s1023_s3, %s928_s4 [#allocation1]  ;;  %s372_s6 = scalar_lea.vmem [#allocation4], %s928_s4  ;;  %s928_s4 = sphi %s1033_s4, %s201_s4  }
  0x2d   : >> { %s389_s7 = smov [#allocation4] }
  0x2e   : >> { %v1040_v11 = vshrl.u32 %v203_v9, 7 }
  0x30   : >> { %v202_v10 = vld [vmem:[%s1023_s3] sm:$0xff]  ;;  %vm207_vm0 = vcmp.gt.s32.totalorder %v1040_v11, %v1043_v12  ;;  %v759_v13 = vld [vmem:[%s1023_s3 + $0x8] sm:$0xff]  ;;  %v214_v14 = vadd.s32 8, %v1040_v11  ;;  %v224_v16 = vadd.s32 16, %v1040_v11  ;;  %v234_v18 = vadd.s32 24, %v1040_v11 }
  0x31   : >> { %v760_v15 = vld [vmem:[%s1023_s3 + $0x10] sm:$0xff]  ;;  %v761_v17 = vld [vmem:[%s1023_s3 + $0x18] sm:$0xff]  ;;  %v208_v19 = vsel %vm207_vm0, %v202_v10, 0.0  ;;  %v1061_v36 = vld [vmem:[%s260_s5] ss:$0 sm:$0xff]  ;;  %v299_v11 = vmov %v1040_v11  ;;  %s296_s3 = smov %s1023_s3  ;;  %v1086_v10 = vand.u32 127, %v203_v9 }
  0x32   : >> { %v209_v20 = vmul.f32 %v208_v19, %v208_v19  ;;  %vm216_vm1 = vcmp.gt.s32.totalorder %v214_v14, %v1043_v12  ;;  %vm226_vm2 = vcmp.gt.s32.totalorder %v224_v16, %v1043_v12  ;;  %vm236_vm3 = vcmp.gt.s32.totalorder %v234_v18, %v1043_v12  ;;  %v764_v5 = vld [vmem:[%s296_s3 + $0x10] sm:$0xff]  ;;  %v300_v6 = vld [vmem:[%s296_s3] sm:$0xff]  ;;  %v765_v7 = vld [vmem:[%s296_s3 + $0x18] sm:$0xff] }
  0x33   : >> { %v217_v21 = vsel %vm216_vm1, %v759_v13, 0.0  ;;  %v227_v22 = vsel %vm226_vm2, %v760_v15, 0.0  ;;  %v239_v23 = vsel %vm236_vm3, %v761_v17, 0.0  ;;  %v262_v37 = vand.u32 2147483647, %v1061_v36  ;;  %v763_v8 = vld [vmem:[%s296_s3 + $0x8] sm:$0xff]  ;;  %s1118_s3 = smov %s1023_s3 }
  0x34   : >> { %v218_v24 = vmul.f32 %v217_v21, %v217_v21  ;;  %v228_v25 = vmul.f32 %v227_v22, %v227_v22  ;;  %v240_v27 = vmul.f32 %v239_v23, %v239_v23  ;;  %vm287_vm9 = vcmp.lt.f32.partialorder %v1061_v36, 0.0 }
  0x35   : >> { %v263_v42 = vmax.f32 %v262_v37, 0.0  ;;  %v354_v2 = vadd.s32 24, %v299_v11  ;;  %v336_v3 = vadd.s32 16, %v299_v11  ;;  %v318_v4 = vadd.s32 8, %v299_v11 }
  0x36   : >> { %v219_v26 = vadd.f32 %v218_v24, %v209_v20  ;;  %vm303_vm12 = vcmp.gt.s32.totalorder %v299_v11, %v1043_v12  ;;  %vm1091_vm0 = vcmp.eq.s32.totalorder %v1086_v10, %v1043_v12  ;;  %v392_v11 = vmov %v1040_v11 }
  0x37   : >> { %vm356_vm10 = vcmp.gt.s32.totalorder %v354_v2, %v1043_v12  ;;  %vm357_vm11 = vcmp.lt.s32.totalorder %v354_v2, 32  ;;  %vm338_vm13 = vcmp.gt.s32.totalorder %v336_v3, %v1043_v12  ;;  %vm320_vm15 = vcmp.gt.s32.totalorder %v318_v4, %v1043_v12 }
  0x38   : >> { %v229_v28 = vadd.f32 %v228_v25, %v219_v26  ;;  %vm358_vm14 = vmand %vm356_vm10, %vm357_vm11  ;;  %v304_v13 = vsel %vm303_vm12, %v300_v6, 0.0  ;;  %v339_v14 = vsel %vm338_vm13, %v764_v5, 0.0  ;;  %v321_v16 = vsel %vm320_vm15, %v763_v8, 0.0 }
  0x39   : >> { %v359_v15 = vsel %vm358_vm14, %v765_v7, 0.0 }
  0x3a   : >> { %v241_v29 = vadd.f32 %v240_v27, %v229_v28 }
  0x3c   : >> { %v242_v30 = vrot.slane %v241_v29, 4 }
  0x3e   : >> { %v243_v31 = vadd.f32 %v242_v30, %v241_v29 }
  0x40   : >> { %v244_v32 = vrot.slane %v243_v31, 2 }
  0x42   : >> { %v245_v33 = vadd.f32 %v244_v32, %v243_v31 }
  0x44   : >> { %v246_v34 = vrot.slane %v245_v33, 1 }
  0x46   : >> { %v1056_v35 = vadd.f32 %v246_v34, %v245_v33 }
  0x48   : >> { %856 = vrsqrt.f32 %v1056_v35  ;;  %vm250_vm4 = vcmp.eq.f32.partialorder %v1056_v35, inf  ;;  %v253_v39 = vand.u32 2147483648, %v1056_v35  ;;  %vm252_vm5 = vcmp.eq.f32.partialorder %v1056_v35, 0.0 }
  0x52   : >> { %v857_v38 = vpop.eup %856 }
  0x53   : >> { %v249_v40 = vmul.f32 %v857_v38, %v1056_v35 }
  0x55   : >> { %v251_v41 = vsel %vm250_vm4, %v1056_v35, %v249_v40  ;;  %v931_v35 = vmov 1.0   ;;  %v385_v40 = vld [vmem:[%s1029_s9] ss:$0 sm:$0xff] }
  0x56   : >> { %v254_v43 = vsel %vm252_vm5, %v253_v39, %v251_v41 }
  0x57   : >> { %v264_v44 = vand.u32 2147483647, %v254_v43  ;;  %v395_v43 = vld [vmem:[%s1118_s3] sm:$0xff] }
  0x59   : >> { %v265_v45 = vmax.f32 %v263_v42, %v264_v44 }
  0x5b   : >> { %858 = vrcp.f32 %v265_v45  ;;  %vm277_vm8 = vcmp.eq.f32.partialorder %v265_v45, 0.0 }
  0x65   : >> { %v859_v46 = vpop.eup %858 }
  0x66   : >> { %v267_v47 = vmul.f32 %v859_v46, %v262_v37  ;;  %v270_v48 = vmul.f32 0.0, %v859_v46  ;;  %v274_v49 = vmul.f32 %v859_v46, %v264_v44  ;;  %v767_v44 = vld [vmem:[%s1118_s3 + $0x8] sm:$0xff]  ;;  %v411_v46 = vadd.s32 24, %v392_v11 }
  0x67   : >> { %v430_v11 = vmov %v1040_v11 }
  0x68   : >> { %v268_v50 = vmul.f32 %v267_v47, %v267_v47  ;;  %v271_v51 = vmul.f32 %v270_v48, %v270_v48  ;;  %v275_v52 = vmul.f32 %v274_v49, %v274_v49  ;;  %v771_v47 = vld [vmem:[%s1118_s3 + $0x18] sm:$0xff]  ;;  %vm417_vm1 = vcmp.lt.s32.totalorder %v411_v46, 32 }
  0x69   : >> { %v472_v3 = vadd.s32 16, %v430_v11  ;;  %vm447_vm2 = vcmp.ge.s32.totalorder %v430_v11, %v1043_v12  ;;  %v493_v4 = vadd.s32 24, %v430_v11 }
  0x6a   : >> { %v272_v53 = vadd.f32 %v271_v51, %v268_v50  ;;  %vm1139_vm4 = vmand %vm1091_vm0, %vm447_vm2 }
  0x6c   : >> { %v276_v54 = vadd.f32 %v275_v52, %v272_v53 }
  0x6e   : >> { %860 = vrsqrt.f32 %v276_v54  ;;  %vm280_vm6 = vcmp.eq.f32.partialorder %v276_v54, inf  ;;  %v283_v56 = vand.u32 2147483648, %v276_v54  ;;  %vm282_vm7 = vcmp.eq.f32.partialorder %v276_v54, 0.0 }
  0x78   : >> { %v861_v55 = vpop.eup %860 }
  0x79   : >> { %v279_v57 = vmul.f32 %v861_v55, %v276_v54 }
  0x7b   : >> { %v281_v58 = vsel %vm280_vm6, %v276_v54, %v279_v57  ;;  %vm510_vm6 = vcmp.ge.s32.totalorder %v493_v4, %v1043_v12 }
  0x7c   : >> { %v284_v59 = vsel %vm282_vm7, %v283_v56, %v281_v58  ;;  %vm1162_vm10 = vmand %vm1091_vm0, %vm510_vm6 }
  0x7d   : >> { %v285_v60 = vmul.f32 %v284_v59, %v265_v45  ;;  %v769_v45 = vld [vmem:[%s1118_s3 + $0x10] sm:$0xff]  ;;  %s1130_s3 = smov %s1118_s3 }
  0x7e   : >> { %v437_v6 = vld [vmem:[%s1130_s3] sm:$0xff]  ;;  %v773_v7 = vld [vmem:[%s1130_s3 + $0x8] sm:$0xff]  ;;  %v776_v8 = vld [vmem:[%s1130_s3 + $0x10] sm:$0xff]  ;;  %s514_s8 = scalar_lea.vmem %s1130_s3, %s928_s4  ;;  %s201_s4 = sadd.s32 1, %s928_s4  }
  0x7f   : >> { %v286_v61 = vsel %vm277_vm8, 0.0, %v285_v60  ;;  %vm439_vm8 = vcmp.gt.s32.totalorder %v1086_v10, %v1043_v12  ;;  %p198_p10 = scmp.ge.s32.totalorder %s201_s4, 16  }
  0x80   : >> { %v288_v62 = vxor.u32 2147483648, %v286_v61  ;;  %s783_s18 = sshll.u32 (%p198_p10), %s908_s11, 2  ;;  %s784_s19 = sshll.u32 (%p198_p10), %s912_s12, 3 }
  0x81   : > { %s541_s20 = sadd.s32 (%p198_p10), %s784_s19, %s783_s18 }
  0x82   : >> { %v289_v63 = vsel %vm287_vm9, %v286_v61, %v288_v62  ;;  %s785_s21 = sshll.u32 (%p198_p10), %s541_s20, 3 }
  0x83   : >> { %v1075_v0 = vsel %vm252_vm5, %v1061_v36, %v289_v63  ;;  %862 = vrcp.f32 %v289_v63  ;;  %v290_v17 = vsub.f32 %v289_v63, %v1061_v36  ;;  %s543_s25 = scalar_lea.vmem (%p198_p10), %s1230_s1, %s785_s21 }
  0x84   : >> { %v295_v1 = vsub.f32 %v1061_v36, %v1075_v0 }
  0x86   : >> { %864 = vrcp.f32 %v295_v1  ;;  %v451_v1 = vadd.s32 8, %v430_v11 }
  0x88   : >> { %vm468_vm3 = vcmp.ge.s32.totalorder %v451_v1, %v1043_v12 }
  0x89   : >> { %vm1148_vm7 = vmand %vm1091_vm0, %vm468_vm3 }
  0x8d   : >> { %v863_v18 = vpop.eup %862 }
  0x8e   : >> { %v292_v9 = vmul.f32 %v863_v18, %v290_v17 }
  0x90   : >> { %v865_v19 = vpop.eup %864  ;;  %v294_v33 = vsel %vm252_vm5, 0.0, %v292_v9 }
  0x91   : >> { %v341_v21 = vmul.f32 %v865_v19, %v339_v14  ;;  %v306_v22 = vmul.f32 %v865_v19, %v304_v13  ;;  %v361_v23 = vmul.f32 %v865_v19, %v359_v15  ;;  %v323_v24 = vmul.f32 %v865_v19, %v321_v16  ;;  %v779_v15 = vld [vmem:[%s1130_s3 + $0x18] sm:$0xff] }
  0x92   : >> { %v378_v34 = vsel %vm1091_vm0, %v294_v33, 0.0 }
  0x93   : >> { %v342_v25 = vsel %vm252_vm5, 0.0, %v341_v21  ;;  %v307_v26 = vsel %vm252_vm5, 0.0, %v306_v22  ;;  %v362_v27 = vsel %vm252_vm5, 0.0, %v361_v23  ;;  %v324_v28 = vsel %vm252_vm5, 0.0, %v323_v24 }
  0x94   : >> { %v347_v29 = vsel %vm1091_vm0, %v342_v25, 0.0  ;;  %v312_v30 = vsel %vm1091_vm0, %v307_v26, 0.0  ;;  %v367_v31 = vsel %vm1091_vm0, %v362_v27, 0.0  ;;  %v329_v32 = vsel %vm1091_vm0, %v324_v28, 0.0 }
  0x95   : >> { %348 = vadd.xlane.f32.xlu1 %v347_v29  ;;  %313 = vadd.xlane.f32.xlu0 %v312_v30  ;;  %vm489_vm5 = vcmp.ge.s32.totalorder %v472_v3, %v1043_v12 }
  0x96   : >> { %vm1156_vm9 = vmand %vm1091_vm0, %vm489_vm5 }
  0x99   : >> { %368 = vadd.xlane.f32.xlu1 %v367_v31  ;;  %330 = vadd.xlane.f32.xlu0 %v329_v32 }
  0x9d   : >> { %379 = vadd.xlane.f32.xlu0 %v378_v34 }
 0x122   : >> { %v349_v36 = vpop.xlane.xlu1 %348  ;;  %v314_v37 = vpop.xlane.xlu0 %313 }
 0x123   : >> { %351 = vst [vmem:[#allocation4 + $0x10] sm:$0xff] %v349_v36  ;;  %315 = vst [vmem:[#allocation4] sm:$0xff] %v314_v37 }
 0x126   : >> { %v369_v38 = vpop.xlane.xlu1 %368  ;;  %v331_v39 = vpop.xlane.xlu0 %330 }
 0x127   : >> { %371 = vst [vmem:[#allocation4 + $0x18] sm:$0xff] %v369_v38  ;;  %333 = vst [vmem:[#allocation4 + $0x8] sm:$0xff] %v331_v39 }
 0x128   : >> { %373 = vst [vmem:[%s372_s6] sm:$0x1] %v931_v35 }
 0x12a   : >> { %v380_v41 = vpop.xlane.xlu0 %379 }
 0x12b   : >> { %v386_v42 = vsel %vm1091_vm0, %v380_v41, %v385_v40 }
 0x12c   : >> { %387 = vst [vmem:[%s1029_s9] sm:$0x1] %v386_v42 }
 0x12f   : >> { %v394_v48 = vld [vmem:[%s389_s7] sm:$0xff]  ;;  %v766_v49 = vld [vmem:[%s389_s7 + $0x8] sm:$0xff]  ;;  %v768_v50 = vld [vmem:[%s389_s7 + $0x10] sm:$0xff] }
 0x130   : >> { %v396_v51 = vmul.f32 %v395_v43, %v394_v48  ;;  %v402_v52 = vmul.f32 %v767_v44, %v766_v49  ;;  %v770_v53 = vld [vmem:[%s389_s7 + $0x18] sm:$0xff]  ;;  %v409_v56 = vmul.f32 %v769_v45, %v768_v50  ;;  %s427_s7 = smov %s389_s7 }
 0x131   : >> { %v416_v54 = vmul.f32 %v771_v47, %v770_v53  ;;  %v435_v13 = vld [vmem:[%s427_s7] sm:$0xff]  ;;  %v772_v17 = vld [vmem:[%s427_s7 + $0x8] sm:$0xff]  ;;  %v775_v18 = vld [vmem:[%s427_s7 + $0x10] sm:$0xff] }
 0x132   : >> { %v403_v55 = vadd.f32 %v402_v52, %v396_v51  ;;  %v778_v11 = vld [vmem:[%s427_s7 + $0x18] sm:$0xff] }
 0x133   : >> { %v418_v58 = vsel %vm417_vm1, %v416_v54, 0.0  ;;  %v525_v39 = vld [vmem:[#allocation2] sm:$0x3] (%p198_p10) }
 0x134   : >> { %v410_v57 = vadd.f32 %v409_v56, %v403_v55  ;;  %527 = vst [vmem:[%s170_s22] sm:$0x3] (%p198_p10), %v525_v39 }
 0x136   : >> { %v419_v59 = vadd.f32 %v418_v58, %v410_v57 }
 0x138   : >> { %v420_v60 = vrot.slane %v419_v59, 4 }
 0x13a   : >> { %v421_v61 = vadd.f32 %v420_v60, %v419_v59 }
 0x13c   : >> { %v422_v62 = vrot.slane %v421_v61, 2 }
 0x13e   : >> { %v423_v63 = vadd.f32 %v422_v62, %v421_v61 }
 0x140   : >> { %v424_v2 = vrot.slane %v423_v63, 1 }
 0x142   : >> { %v425_v5 = vadd.f32 %v424_v2, %v423_v63 }
 0x144   : >> { %v431_v16 = vmul.f32 %v425_v5, %v380_v41 }
 0x146   : >> { %v436_v21 = vmul.f32 %v435_v13, %v431_v16  ;;  %v456_v22 = vmul.f32 %v772_v17, %v431_v16  ;;  %v477_v23 = vmul.f32 %v775_v18, %v431_v16  ;;  %v498_v24 = vmul.f32 %v778_v11, %v431_v16 }
 0x148   : >> { %v440_v26 = vsub.f32 %v437_v6, %v436_v21  ;;  %v461_v27 = vsub.f32 %v773_v7, %v456_v22  ;;  %v482_v12 = vsub.f32 %v776_v8, %v477_v23  ;;  %v503_v10 = vsub.f32 %v779_v15, %v498_v24 }
 0x14a   : >> { %v441_v28 = vsel %vm439_vm8, %v440_v26, %v437_v6  ;;  %v462_v29 = vsel %vm439_vm8, %v461_v27, %v773_v7  ;;  %v483_v30 = vsel %vm439_vm8, %v482_v12, %v776_v8  ;;  %v504_v31 = vsel %vm439_vm8, %v503_v10, %v779_v15 }
 0x14b   : >> { %v449_v32 = vsel %vm1139_vm4, %v435_v13, %v441_v28  ;;  %v470_v33 = vsel %vm1148_vm7, %v772_v17, %v462_v29  ;;  %v491_v34 = vsel %vm1156_vm9, %v775_v18, %v483_v30  ;;  %v512_v36 = vsel %vm1162_vm10, %v778_v11, %v504_v31 }
 0x14c   : >> { %450 = vst [vmem:[%s1130_s3] sm:$0xff] %v449_v32  ;;  %774 = vst [vmem:[%s1130_s3 + $0x8] sm:$0xff] %v470_v33 }
 0x14d   : >> { %777 = vst [vmem:[%s1130_s3 + $0x10] sm:$0xff] %v491_v34  ;;  %780 = vst [vmem:[%s1130_s3 + $0x18] sm:$0xff] %v512_v36 }
 0x150   : > { %200 = sbr.rel (!%p198_p10) target bundleno = 44 (0x2c), region = 202 }
 0x154   : >> { %v515_v37 = vld [vmem:[%s514_s8] ss:$0 sm:$0xff] }
 0x155   : >> { %v520_v38 = vsel %vm1091_vm0, %v1075_v0, %v515_v37 }
 0x156   : >> { %521 = vst [vmem:[%s514_s8] sm:$0x1] %v520_v38 }
 0x157   : > { %p591_p11 = scmp.lt.s32.totalorder (%p1001_p4), %s908_s11, 0  ;;  %s592_s27 = ssub.s32 (%p1001_p4), 0, %s908_s11  ;;  %v615_v41 = vld [vmem:[%s170_s22] sm:$0x3] (%p1001_p4) }
 0x158   : > { %s786_s28 = smin.u32 (%p1001_p4), %s908_s11, %s592_s27 }
 0x159   : > { %590 = sbr.rel (!%p1001_p4) target bundleno = 357 (0x165), region = 99 }
 0x15d   : > { %v577_v35 = vld [vmem:[%s1023_s3] sm:$0xff]  ;;  %v579_v0 = vld [vmem:[%s1023_s3 + $0x8] sm:$0xff]  ;;  %v581_v20 = vld [vmem:[%s1023_s3 + $0x10] sm:$0xff] }
 0x15e   : > { %v583_v40 = vld [vmem:[%s1023_s3 + $0x18] sm:$0xff]  ;;  %578 = vst [vmem:[%s543_s25] sm:$0xff] %v577_v35  ;;  %580 = vst [vmem:[%s543_s25 + $0x8] sm:$0xff] %v579_v0  ;;  %s594_s3 = sshrl.u32 (%p1001_p4), %s786_s28, 3 }
 0x15f   : > { %582 = vst [vmem:[%s543_s25 + $0x10] sm:$0xff] %v581_v20  ;;  %584 = vst [vmem:[%s543_s25 + $0x18] sm:$0xff] %v583_v40  ;;  %s595_s9 = ssub.s32 (%p1001_p4), 0, %s594_s3 }
 0x160   : > { %s1256_s9 = smov (!%p591_p11, %s595_s9), %s594_s3 }
 0x161   : > { %s597_s4 = sadd.s32 %s912_s12, %s1256_s9 }
 0x162   : > { %s787_s5 = sshll.u32 %s597_s4, 1 }
 0x163   : > { %s599_s29 = scalar_lea.vmem %s1231_s2, %s787_s5 }
 0x164   : > { %616 = vst [vmem:[%s599_s29] sm:$0x3] %v615_v41 }
 0x165 PF: > { %s9_s15 = sadd.s32 1, %s924_s15   ;;  %s1243_s9 = smov %s904_s10 }
 0x166   : > { %p6_p12 = scmp.ge.s32.totalorder %s9_s15, 6   ;;  %s1244_s10 = smov %s1006_s30 }
 0x167   : > { %s1245_s11 = smov %s916_s13  ;;  %s1246_s12 = smov %s920_s14 }
 0x168   : > { %s1247_s13 = smov %s1250_s16  ;;  %s1248_s14 = smov %s1254_s17 }
 0x169   :  { %8 = sbr.rel (!%p6_p12) target bundleno = 4 (0x4), region = 213 }

// kernel: derf_attention_forward.2
= control target key start
LH: loop header
LB: loop body
LE: loop exit
PB: predicated region body
PF: predicated region fallthrough
CT: control target
= control target key end

     0   :  { %8 = vsyncpa [#allocation3], 0  ;;  %s154_s12 = smov [#allocation2]   ;;  %s206_s0 = inlined_call_operand.vmem [shape: f32[16,32], index: 0, kind: input, shape index: {}]   ;;  %s207_s1 = inlined_call_operand.hbm [shape: bf16[32,96], index: 1, kind: input, shape index: {}]   ;;  %s208_s2 = inlined_call_operand.vmem [shape: f32[1,96], index: 2, kind: input, shape index: {}]   ;;  %s209_s3 = inlined_call_operand.vmem [shape: f32[16,96], index: 3, kind: output, shape index: {}]  }
   0x1   :  { %s16_s13 = sshll.u32 %s154_s12, 4  ;;  %s130_s16 = scalar_lea.hbm %s207_s1, 256  ;;  %s17_s13 = int_to_ptr.vmem [resolvable:$true] %s16_s13 }
   0x2   :  { %p131_p0 = scmp.ne.s32.totalorder %s207_s1, %s130_s16  ;;  %p134_p1 = scmp.lt.u32.totalorder %s130_s16, %s207_s1 }
   0x4   :  { %p136_p2 = pnand %p134_p1, %p131_p0 }
   0x6   :  { %139 = shalt.err (!%p136_p2)
}
   0x7   :  { %s140_s21 = scalar_lea.vmem %s17_s13, 256  ;;  %p145_p4 = scmp.lt.s32.totalorder %s17_s13, %s17_s13 }
   0x8   :  { %p141_p3 = scmp.ne.s32.totalorder %s17_s13, %s140_s21  ;;  %p146_p5 = scmp.lt.s32.totalorder %s140_s21, %s140_s21 }
   0xa   :  { %p147_p6 = por %p146_p5, %p145_p4 }
   0xc   :  { %p148_p7 = pnand %p147_p6, %p141_p3 }
   0xe   :  { %151 = shalt.err (!%p148_p7)
}
   0xf   :  { %s155_s22 = smov 64   ;;  %s156_s23 = smov 4  }
  0x10   :  { %22 = dma.hbm_to_vmem [thread:$0]  %s207_s1, 256, %s17_s13, [#allocation3], %s155_s22, %s155_s22, %s156_s23  }
  0x11   :  { %152 = dma.done.wait [#allocation3], 256  }
  0x12   :  { %153 = vsyncadd [#allocation3], 4294967040  ;;  %v157_v0 = vmov 0.0   ;;  %vm158_vm0 = vmmov 0   ;;  %v128_v1 = vld [vmem:[#allocation2] sm:$0xff]   ;;  %v129_v2 = vld [vmem:[#allocation2 + $0x8] sm:$0xff]  }
  0x13   :  { %115 = vmatprep.subr.bf16.mxu0 %v157_v0  ;;  %119 = vmatprep.mubr.msk.bf16.mxu0 %vm158_vm0, %v157_v0  ;;  %v29_v3 = vld [vmem:[%s206_s0] sm:$0xff]  ;;  %v30_v4 = vld [vmem:[%s206_s0 + $0x8] sm:$0xff]  ;;  %vm55_vm1 = vcmask 261120   ;;  %vm100_vm2 = vcmask 785408  }
  0x14   :  { %116 = vmatpush3.bf16.msra.mxu0 %v128_v1  ;;  %v31_v5 = vpack.c.bf16 %v30_v4, %v29_v3  ;;  %v108_v6 = vld [vmem:[%s208_s2] ss:$0 sm:$0xff] }
  0x15   :  { %117 = vmatprep.subr.bf16.mxu0 %v157_v0 }
  0x18   :  { %118 = vmatpush3.bf16.msra.mxu0 %v129_v2 }
  0x1b   :  { %120 = vmatmul.mubr.msk.bf16.vlgmr.msra.gmra.mrb[0].mxu0 %vm55_vm1, %v31_v5 }
  0xee   :  { %v93_v7 = vpop.f32.mrb[0].mxu0 }
  0xef   :  { %v94_v8 = vadd.f32 %v108_v6, %v93_v7  ;;  %v121_v9 = vpop.f32.mrb[1].mxu0 }
  0xf0   :  { %v96_v10 = vpop.f32.mrb[2].mxu0 }
  0xf1   :  { %101 = vst.msk [vmem:[%s209_s3] sm:$0xff] %vm100_vm2, %v94_v8  ;;  %v97_v11 = vadd.f32 %v108_v6, %v96_v10  ;;  %v122_v12 = vpop.f32.mrb[3].mxu0 }
  0xf3   :  { %102 = vst.msk [vmem:[%s209_s3 + $0x8] sm:$0xff] %vm100_vm2, %v97_v11 }
  0xf4   :  { %107 = vsyncpa [#allocation3], 1 }

// kernel: custom-call.58
= control target key start
LH: loop header
LB: loop body
LE: loop exit
PB: predicated region body
PF: predicated region fallthrough
CT: control target
= control target key end

     0   :  { %s502_s6 = smov 0   ;;  %s504_s7 = smov 0   ;;  %s617_s0 = inlined_call_operand.vmem [shape: f32[2,2,16,16], index: 0, kind: input, shape index: {}]   ;;  %s618_s1 = inlined_call_operand.vmem [shape: f32[2,2,16,16], index: 1, kind: output, shape index: {}]  }
   0x1   :  { %s506_s8 = smov 0   ;;  %s508_s9 = smov 0  }
   0x2   :  { %s510_s10 = smov 0  }
   0x3 LB: > { %s380_s11 = sadd.s32 4294967295, %s489_s10   ;;  %s16_s12 = sadd.s32 1, %s481_s8  ;;  %s489_s10 = sphi %s510_s10, %s7_s10   ;;  %s485_s9 = sphi %s508_s9, %s622_s9   ;;  %s481_s8 = sphi %s506_s8, %s621_s8   ;;  %s477_s7 = sphi %s504_s7, %s620_s7   ;;  %s473_s6 = sphi %s502_s6, %s619_s6  }
   0x4   : > { %p17_p0 = scmp.ge.s32.totalorder %s16_s12, 2  ;;  %s19_s13 = sadd.s32 1, %s485_s9 }
   0x5   : > { %p382_p2 = scmp.ge.s32.totalorder %s489_s10, 4 }
   0x6   : > { %s624_s12 = smov (%p17_p0, %s16_s12), 0  ;;  %s626_s13 = smov (!%p17_p0, %s19_s13), %s485_s9 }
   0x7   : > { %p21_p1 = scmp.ge.s32.totalorder %s626_s13, 2  ;;  %33 = sbr.rel (%p382_p2) target bundleno = 15 (0xf), region = 16 }
   0x8   : > { %s35_s14 = sand.u32 (!%p382_p2), 1, %s489_s10   ;;  %s384_s15 = sshll.u32 (!%p382_p2), %s485_s9, 1 }
   0x9   : > { %s628_s13 = smov (%p21_p1, %s626_s13), 0  ;;  %s383_s16 = sshll.u32 (!%p382_p2), %s35_s14, 4 }
   0xa   : > { %s39_s17 = sadd.s32 (!%p382_p2), %s481_s8, %s384_s15  ;;  %s37_s22 = scalar_lea.vmem (!%p382_p2), [#allocation0], %s383_s16 }
   0xb   : > { %s385_s18 = sshll.u32 (!%p382_p2), %s39_s17, 4 }
   0xc   : > { %s41_s21 = scalar_lea.vmem (!%p382_p2), %s617_s0, %s385_s18 }
   0xd   : > { %v54_v0 = vld [vmem:[%s41_s21] sm:$0xff] (!%p382_p2)  ;;  %v56_v1 = vld [vmem:[%s41_s21 + $0x8] sm:$0xff] (!%p382_p2) }
   0xe   : > { %55 = vst [vmem:[%s37_s22] sm:$0xff] %v54_v0  ;;  %57 = vst [vmem:[%s37_s22 + $0x8] sm:$0xff] %v56_v1 }
   0xf PF: > { %p386_p3 = scmp.ge.s32.totalorder %s489_s10, 1  ;;  %p62_p4 = scmp.lt.s32.totalorder %s489_s10, 5 }
  0x11   : > { %p63_p5 = pnand %p386_p3, %p62_p4 }
  0x12   : > { %s69_s23 = sand.u32 (!%p63_p5), 1, %s380_s11   ;;  %v80_v2 = vlaneseq (!%p63_p5)  ;;  %vm101_vm0 = vcmask (!%p63_p5), 130048   ;;  %v491_v42 = vmov (!%p63_p5), 0.0   ;;  %s406_s26 = sshll.u32 (!%p63_p5), %s477_s7, 1 }
  0x13   : > { %66 = sbr.rel (%p63_p5) target bundleno = 2201 (0x899), region = 39  ;;  %s387_s24 = sshll.u32 (!%p63_p5), %s69_s23, 4 }
  0x14   : > { %v544_v3 = vand.u32 (!%p63_p5), 127, %v80_v2  ;;  %v83_v4 = vshrl.u32 (!%p63_p5), %v80_v2, 7  ;;  %s546_s25 = scalar_lea.vmem (!%p63_p5), [#allocation0], %s387_s24  ;;  %s304_s27 = sadd.s32 (!%p63_p5), %s473_s6, %s406_s26 }
  0x15   : > { %v86_v5 = vld [vmem:[%s546_s25] sm:$0xff] (!%p63_p5)  ;;  %v396_v38 = vld [vmem:[%s546_s25 + $0x8] ss:$0 sm:$0xff] (!%p63_p5)  ;;  %v397_v48 = vld [vmem:[%s546_s25 + $0x9] ss:$0 sm:$0xff] (!%p63_p5)  ;;  %s407_s28 = sshll.u32 (!%p63_p5), %s304_s27, 4 }
  0x16   : > { %v389_v6 = vld [vmem:[%s546_s25 + $0x1] ss:$0 sm:$0xff] (!%p63_p5)  ;;  %vm85_vm1 = vcmp.eq.s32.totalorder (!%p63_p5), %v544_v3, %v83_v4  ;;  %vm89_vm2 = vcmp.eq.s32.totalorder (!%p63_p5), %v544_v3, 0  ;;  %v390_v11 = vld [vmem:[%s546_s25 + $0x2] ss:$0 sm:$0xff] (!%p63_p5)  ;;  %vm105_vm3 = vcmp.eq.s32.totalorder (!%p63_p5), %v544_v3, 1  ;;  %s306_s2 = scalar_lea.vmem (!%p63_p5), %s618_s1, %s407_s28 }
  0x17   : > { %v102_v7 = vsel (!%p63_p5), %vm101_vm0, %v389_v6, 0.0  ;;  %v90_v8 = vsel (!%p63_p5), %vm89_vm2, %v86_v5, 1.0  ;;  %v113_v12 = vsel (!%p63_p5), %vm101_vm0, %v390_v11, 0.0  ;;  %v391_v16 = vld [vmem:[%s546_s25 + $0x3] ss:$0 sm:$0xff] (!%p63_p5)  ;;  %vm116_vm4 = vcmp.eq.s32.totalorder (!%p63_p5), %v544_v3, 2 }
  0x18   : > { %v91_v9 = vsel (!%p63_p5), %vm85_vm1, %v90_v8, 0.0  ;;  %v124_v17 = vsel (!%p63_p5), %vm101_vm0, %v391_v16, 0.0  ;;  %v392_v21 = vld [vmem:[%s546_s25 + $0x4] ss:$0 sm:$0xff] (!%p63_p5)  ;;  %vm127_vm5 = vcmp.eq.s32.totalorder (!%p63_p5), %v544_v3, 3  ;;  %vm138_vm6 = vcmp.eq.s32.totalorder (!%p63_p5), %v544_v3, 4 }
  0x19   : > { %v106_v10 = vmul.f32 (!%p63_p5), %v102_v7, %v91_v9  ;;  %v135_v22 = vsel (!%p63_p5), %vm101_vm0, %v392_v21, 0.0  ;;  %v393_v26 = vld [vmem:[%s546_s25 + $0x5] ss:$0 sm:$0xff] (!%p63_p5)  ;;  %v394_v31 = vld [vmem:[%s546_s25 + $0x6] ss:$0 sm:$0xff] (!%p63_p5)  ;;  %vm149_vm7 = vcmp.eq.s32.totalorder (!%p63_p5), %v544_v3, 5 }
  0x1a   : > { %v146_v27 = vsel %vm101_vm0, %v393_v26, 0.0  ;;  %v157_v32 = vsel %vm101_vm0, %v394_v31, 0.0  ;;  %v96_v36 = vadd.s32 8, %v83_v4  ;;  %v395_v37 = vld [vmem:[%s546_s25 + $0x7] ss:$0 sm:$0xff]  ;;  %vm160_vm8 = vcmp.eq.s32.totalorder %v544_v3, 6 }
  0x1b   : > { %107 = vadd.xlane.f32.xlu0 %v106_v10  ;;  %v168_v39 = vsel %vm101_vm0, %v395_v37, 0.0  ;;  %v179_v44 = vsel %vm101_vm0, %v396_v38, 0.0  ;;  %vm171_vm10 = vcmp.eq.s32.totalorder %v544_v3, 7  ;;  %vm182_vm11 = vcmp.eq.s32.totalorder %v544_v3, 8  ;;  %v398_v56 = vld [vmem:[%s546_s25 + $0xa] ss:$0 sm:$0xff] }
  0x1c   : > { %vm97_vm9 = vcmp.eq.s32.totalorder %v544_v3, %v96_v36  ;;  %v194_v51 = vsel %vm101_vm0, %v397_v48, 0.0  ;;  %vm197_vm12 = vcmp.eq.s32.totalorder %v544_v3, 9  ;;  %v209_v59 = vsel %vm101_vm0, %v398_v56, 0.0  ;;  %v399_v0 = vld [vmem:[%s546_s25 + $0xb] ss:$0 sm:$0xff] }
  0x1d   : > { %v98_v43 = vsel %vm97_vm9, 1.0, %v491_v42  ;;  %vm212_vm13 = vcmp.eq.s32.totalorder %v544_v3, 10  ;;  %v224_v4 = vsel %vm101_vm0, %v399_v0, 0.0  ;;  %vm227_vm14 = vcmp.eq.s32.totalorder %v544_v3, 11 }
  0x1e   : > { %v187_v46 = vmul.f32 %v179_v44, %v98_v43  ;;  %vm242_vm15 = vcmp.eq.s32.totalorder %v544_v3, 12  ;;  %vm257_vm1 = vcmp.eq.s32.totalorder %v544_v3, 13  ;;  %vm272_vm2 = vcmp.eq.s32.totalorder %v544_v3, 14 }
  0xa8   : > { %v108_v13 = vpop.xlane.xlu0 %107 }
  0xa9   : > { %v109_v14 = vsel %vm105_vm3, %v108_v13, %v91_v9  ;;  %v400_v9 = vld [vmem:[%s546_s25 + $0xc] ss:$0 sm:$0xff]  ;;  %vm287_vm3 = vcmp.eq.s32.totalorder %v544_v3, 15 }
  0xaa   : > { %v117_v15 = vmul.f32 %v113_v12, %v109_v14  ;;  %v239_v12 = vsel %vm101_vm0, %v400_v9, 0.0 }
  0xac   : > { %118 = vadd.xlane.f32.xlu0 %v117_v15 }
 0x139   : > { %v119_v18 = vpop.xlane.xlu0 %118 }
 0x13a   : > { %v120_v19 = vsel %vm116_vm4, %v119_v18, %v109_v14 }
 0x13b   : > { %v128_v20 = vmul.f32 %v124_v17, %v120_v19  ;;  %v401_v17 = vld [vmem:[%s546_s25 + $0xd] ss:$0 sm:$0xff] }
 0x13d   : > { %129 = vadd.xlane.f32.xlu1 %v128_v20  ;;  %v254_v20 = vsel %vm101_vm0, %v401_v17, 0.0 }
 0x1ca   : > { %v130_v23 = vpop.xlane.xlu1 %129 }
 0x1cb   : > { %v131_v24 = vsel %vm127_vm5, %v130_v23, %v120_v19 }
 0x1cc   : > { %v139_v25 = vmul.f32 %v135_v22, %v131_v24 }
 0x1ce   : > { %140 = vadd.xlane.f32.xlu1 %v139_v25  ;;  %v402_v25 = vld [vmem:[%s546_s25 + $0xe] ss:$0 sm:$0xff] }
 0x25b   : > { %v141_v28 = vpop.xlane.xlu1 %140 }
 0x25c   : > { %v142_v29 = vsel %vm138_vm6, %v141_v28, %v131_v24  ;;  %v269_v28 = vsel %vm101_vm0, %v402_v25, 0.0 }
 0x25d   : > { %v150_v30 = vmul.f32 %v146_v27, %v142_v29 }
 0x25f   : > { %151 = vadd.xlane.f32.xlu0 %v150_v30 }
 0x2ec   : > { %v152_v33 = vpop.xlane.xlu0 %151 }
 0x2ed   : > { %v153_v34 = vsel %vm149_vm7, %v152_v33, %v142_v29  ;;  %v403_v33 = vld [vmem:[%s546_s25 + $0xf] ss:$0 sm:$0xff] }
 0x2ee   : > { %v161_v35 = vmul.f32 %v157_v32, %v153_v34  ;;  %v284_v36 = vsel %vm101_vm0, %v403_v33, 0.0 }
 0x2f0   : > { %162 = vadd.xlane.f32.xlu1 %v161_v35 }
 0x37d   : > { %v163_v40 = vpop.xlane.xlu1 %162 }
 0x37e   : > { %v164_v41 = vsel %vm160_vm8, %v163_v40, %v153_v34 }
 0x37f   : > { %v172_v45 = vmul.f32 %v168_v39, %v164_v41 }
 0x381   : > { %173 = vadd.xlane.f32.xlu0 %v172_v45 }
 0x385   : > { %188 = vadd.xlane.f32.xlu0 %v187_v46 }
 0x40e   : > { %v174_v47 = vpop.xlane.xlu0 %173 }
 0x40f   : > { %v175_v49 = vsel %vm171_vm10, %v174_v47, %v164_v41 }
 0x410   : > { %v183_v50 = vmul.f32 %v179_v44, %v175_v49 }
 0x412   : > { %184 = vadd.xlane.f32.xlu1 %v183_v50  ;;  %v189_v52 = vpop.xlane.xlu0 %188 }
 0x413   : > { %v190_v53 = vsel %vm182_vm11, %v189_v52, %v98_v43 }
 0x414   : > { %v202_v54 = vmul.f32 %v194_v51, %v190_v53 }
 0x416   : > { %203 = vadd.xlane.f32.xlu0 %v202_v54 }
 0x49f   : > { %v185_v55 = vpop.xlane.xlu1 %184 }
 0x4a0   : > { %v186_v57 = vsel %vm182_vm11, %v185_v55, %v175_v49 }
 0x4a1   : > { %v198_v58 = vmul.f32 %v194_v51, %v186_v57 }
 0x4a3   : > { %199 = vadd.xlane.f32.xlu1 %v198_v58  ;;  %v204_v60 = vpop.xlane.xlu0 %203 }
 0x4a4   : > { %v205_v61 = vsel %vm197_vm12, %v204_v60, %v190_v53 }
 0x4a5   : > { %v217_v62 = vmul.f32 %v209_v59, %v205_v61 }
 0x4a7   : > { %218 = vadd.xlane.f32.xlu0 %v217_v62 }
 0x530   : > { %v200_v63 = vpop.xlane.xlu1 %199 }
 0x531   : > { %v201_v1 = vsel %vm197_vm12, %v200_v63, %v186_v57 }
 0x532   : > { %v213_v2 = vmul.f32 %v209_v59, %v201_v1 }
 0x534   : > { %214 = vadd.xlane.f32.xlu1 %v213_v2  ;;  %v219_v5 = vpop.xlane.xlu0 %218 }
 0x535   : > { %v220_v6 = vsel %vm212_vm13, %v219_v5, %v205_v61 }
 0x536   : > { %v232_v7 = vmul.f32 %v224_v4, %v220_v6 }
 0x538   : > { %233 = vadd.xlane.f32.xlu0 %v232_v7 }
 0x5c1   : > { %v215_v8 = vpop.xlane.xlu1 %214 }
 0x5c2   : > { %v216_v10 = vsel %vm212_vm13, %v215_v8, %v201_v1 }
 0x5c3   : > { %v228_v11 = vmul.f32 %v224_v4, %v216_v10 }
 0x5c5   : > { %229 = vadd.xlane.f32.xlu1 %v228_v11  ;;  %v234_v13 = vpop.xlane.xlu0 %233 }
 0x5c6   : > { %v235_v14 = vsel %vm227_vm14, %v234_v13, %v220_v6 }
 0x5c7   : > { %v247_v15 = vmul.f32 %v239_v12, %v235_v14 }
 0x5c9   : > { %248 = vadd.xlane.f32.xlu0 %v247_v15 }
 0x652   : > { %v230_v16 = vpop.xlane.xlu1 %229 }
 0x653   : > { %v231_v18 = vsel %vm227_vm14, %v230_v16, %v216_v10 }
 0x654   : > { %v243_v19 = vmul.f32 %v239_v12, %v231_v18 }
 0x656   : > { %244 = vadd.xlane.f32.xlu1 %v243_v19  ;;  %v249_v21 = vpop.xlane.xlu0 %248 }
 0x657   : > { %v250_v22 = vsel %vm242_vm15, %v249_v21, %v235_v14 }
 0x658   : > { %v262_v23 = vmul.f32 %v254_v20, %v250_v22 }
 0x65a   : > { %263 = vadd.xlane.f32.xlu0 %v262_v23 }
 0x6e3   : > { %v245_v24 = vpop.xlane.xlu1 %244 }
 0x6e4   : > { %v246_v26 = vsel %vm242_vm15, %v245_v24, %v231_v18 }
 0x6e5   : > { %v258_v27 = vmul.f32 %v254_v20, %v246_v26 }
 0x6e7   : > { %259 = vadd.xlane.f32.xlu1 %v258_v27  ;;  %v264_v29 = vpop.xlane.xlu0 %263 }
 0x6e8   : > { %v265_v30 = vsel %vm257_vm1, %v264_v29, %v250_v22 }
 0x6e9   : > { %v277_v31 = vmul.f32 %v269_v28, %v265_v30 }
 0x6eb   : > { %278 = vadd.xlane.f32.xlu0 %v277_v31 }
 0x774   : > { %v260_v32 = vpop.xlane.xlu1 %259 }
 0x775   : > { %v261_v34 = vsel %vm257_vm1, %v260_v32, %v246_v26 }
 0x776   : > { %v273_v35 = vmul.f32 %v269_v28, %v261_v34 }
 0x778   : > { %274 = vadd.xlane.f32.xlu1 %v273_v35  ;;  %v279_v37 = vpop.xlane.xlu0 %278 }
 0x779   : > { %v280_v38 = vsel %vm272_vm2, %v279_v37, %v265_v30 }
 0x77a   : > { %v292_v39 = vmul.f32 %v284_v36, %v280_v38 }
 0x77c   : > { %293 = vadd.xlane.f32.xlu0 %v292_v39 }
 0x805   : > { %v275_v40 = vpop.xlane.xlu1 %274 }
 0x806   : > { %v276_v41 = vsel %vm272_vm2, %v275_v40, %v261_v34 }
 0x807   : > { %v288_v42 = vmul.f32 %v284_v36, %v276_v41 }
 0x809   : > { %289 = vadd.xlane.f32.xlu1 %v288_v42  ;;  %v294_v43 = vpop.xlane.xlu0 %293 }
 0x80a   : > { %v295_v44 = vsel %vm287_vm3, %v294_v43, %v280_v38 }
 0x80b   : > { %322 = vst [vmem:[%s306_s2 + $0x8] sm:$0xff] %v295_v44 }
 0x896   : > { %v290_v45 = vpop.xlane.xlu1 %289 }
 0x897   : > { %v291_v46 = vsel %vm287_vm3, %v290_v45, %v276_v41 }
 0x898   : > { %320 = vst [vmem:[%s306_s2] sm:$0xff] %v291_v46 }
 0x899 PF: > { %s7_s10 = sadd.s32 1, %s489_s10   ;;  %s619_s6 = smov %s481_s8 }
 0x89a   : > { %p4_p6 = scmp.ge.s32.totalorder %s7_s10, 6   ;;  %s620_s7 = smov %s485_s9 }
 0x89b   : > { %s621_s8 = smov %s624_s12  ;;  %s622_s9 = smov %s628_s13 }
 0x89c   :  { %6 = sbr.rel (!%p4_p6) target bundleno = 3 (0x3), region = 104 }

// kernel: custom-call.50
= control target key start
LH: loop header
LB: loop body
LE: loop exit
PB: predicated region body
PF: predicated region fallthrough
CT: control target
= control target key end

     0   :  { %s6_s0 = inlined_call_operand.hbm [shape: pred[2,2], index: 0, kind: output, shape index: {}]  }

// kernel: custom-call.55
= control target key start
LH: loop header
LB: loop body
LE: loop exit
PB: predicated region body
PF: predicated region fallthrough
CT: control target
= control target key end

     0   :  { %s923_s6 = smov 0   ;;  %s925_s7 = smov 0   ;;  %s1104_s0 = inlined_call_operand.vmem [shape: f32[2,2,16,16], index: 0, kind: input, shape index: {}]   ;;  %s1105_s1 = inlined_call_operand.vmem [shape: f32[2,2,16,16], index: 1, kind: output, shape index: {}]  }
   0x1   :  { %s927_s8 = smov 0   ;;  %s929_s9 = smov 0  }
   0x2   :  { %s931_s10 = smov 0  }
   0x3 LB: > { %s704_s11 = sadd.s32 4294967295, %s910_s10   ;;  %s29_s12 = sadd.s32 1, %s902_s8  ;;  %s910_s10 = sphi %s931_s10, %s7_s10   ;;  %s906_s9 = sphi %s929_s9, %s1109_s9   ;;  %s902_s8 = sphi %s927_s8, %s1108_s8   ;;  %s898_s7 = sphi %s925_s7, %s1107_s7   ;;  %s894_s6 = sphi %s923_s6, %s1106_s6  }
   0x4   : > { %p31_p0 = scmp.ge.s32.totalorder %s29_s12, 2  ;;  %s33_s13 = sadd.s32 1, %s906_s9 }
   0x5   : > { %p706_p2 = scmp.ge.s32.totalorder %s910_s10, 4 }
   0x6   : > { %s1111_s12 = smov (%p31_p0, %s29_s12), 0  ;;  %s1113_s13 = smov (!%p31_p0, %s33_s13), %s906_s9 }
   0x7   : > { %p35_p1 = scmp.ge.s32.totalorder %s1113_s13, 2  ;;  %47 = sbr.rel (%p706_p2) target bundleno = 16 (0x10), region = 16 }
   0x8   : > { %s49_s14 = sand.u32 (!%p706_p2), 1, %s910_s10   ;;  %s708_s15 = sshll.u32 (!%p706_p2), %s902_s8, 1 }
   0x9   : > { %s1115_s13 = smov (%p35_p1, %s1113_s13), 0  ;;  %s707_s16 = sshll.u32 (!%p706_p2), %s49_s14, 4 }
   0xa   : > { %s709_s17 = sshll.u32 (!%p706_p2), %s906_s9, 2  ;;  %s51_s23 = scalar_lea.vmem (!%p706_p2), [#allocation0], %s707_s16 }
   0xb   : > { %s56_s18 = sadd.s32 (!%p706_p2), %s709_s17, %s708_s15 }
   0xc   : > { %s710_s19 = sshll.u32 (!%p706_p2), %s56_s18, 3 }
   0xd   : > { %s58_s22 = scalar_lea.vmem (!%p706_p2), %s1104_s0, %s710_s19 }
   0xe   : > { %v88_v0 = vld [vmem:[%s58_s22] sm:$0xff]  ;;  %v90_v1 = vld [vmem:[%s58_s22 + $0x8] sm:$0xff] }
   0xf   : > { %89 = vst [vmem:[%s51_s23] sm:$0xff] %v88_v0  ;;  %91 = vst [vmem:[%s51_s23 + $0x8] sm:$0xff] %v90_v1 }
  0x10 PF: > { %p711_p3 = scmp.ge.s32.totalorder %s910_s10, 1  ;;  %p96_p4 = scmp.lt.s32.totalorder %s910_s10, 5 }
  0x12   : > { %p97_p5 = pnand %p711_p3, %p96_p4 }
  0x13   : > { %s103_s24 = sand.u32 (!%p97_p5), 1, %s704_s11   ;;  %v912_v2 = vmov (!%p97_p5), 0.0   ;;  %vm117_vm0 = vcmask (!%p97_p5), 7168   ;;  %vm148_vm1 = vcmask (!%p97_p5), 15368   ;;  %vm165_vm2 = vcmask (!%p97_p5), 1047553   ;;  %s794_s28 = sshll.u32 (!%p97_p5), %s894_s6, 1 }
  0x14   : > { %100 = sbr.rel (%p97_p5) target bundleno = 2741 (0xab5), region = 54  ;;  %s712_s25 = sshll.u32 (!%p97_p5), %s103_s24, 4  ;;  %vm166_vm3 = vmand (!%p97_p5), %vm148_vm1, %vm165_vm2  ;;  %vm183_vm4 = vcmask (!%p97_p5), 23568   ;;  %vm200_vm5 = vcmask (!%p97_p5), 1047554   ;;  %vm218_vm7 = vcmask (!%p97_p5), 31768   ;;  %vm235_vm8 = vcmask (!%p97_p5), 1047555  }
  0x15   : > { %s965_s26 = scalar_lea.vmem (!%p97_p5), [#allocation1], %s712_s25  ;;  %s969_s27 = scalar_lea.vmem (!%p97_p5), [#allocation0], %s712_s25  ;;  %vm201_vm6 = vmand (!%p97_p5), %vm183_vm4, %vm200_vm5  ;;  %vm253_vm10 = vcmask (!%p97_p5), 39968   ;;  %vm270_vm11 = vcmask (!%p97_p5), 1047556   ;;  %vm288_vm13 = vcmask (!%p97_p5), 48168   ;;  %vm305_vm14 = vcmask (!%p97_p5), 1047557  }
  0x16   : > { %114 = vst [vmem:[%s965_s26] sm:$0xff] (!%p97_p5), %v912_v2  ;;  %v119_v6 = vld [vmem:[%s969_s27] ss:$0 sm:$0xff] (!%p97_p5)  ;;  %v977_v15 = vld [vmem:[%s969_s27 + $0x8] sm:$0xff] (!%p97_p5)  ;;  %v719_v24 = vld [vmem:[%s969_s27 + $0x1] ss:$0 sm:$0xff] (!%p97_p5)  ;;  %s795_s29 = sshll.u32 (!%p97_p5), %s898_s7, 2 }
  0x17   : > { %v973_v10 = vld [vmem:[%s969_s27] sm:$0xff] (!%p97_p5)  ;;  %vm236_vm9 = vmand (!%p97_p5), %vm218_vm7, %vm235_vm8  ;;  %s599_s30 = sadd.s32 (!%p97_p5), %s795_s29, %s794_s28 }
  0x18   : > { %v724_v42 = vld [vmem:[%s969_s27 + $0x2] ss:$0 sm:$0xff] (!%p97_p5)  ;;  %v729_v60 = vld [vmem:[%s969_s27 + $0x3] ss:$0 sm:$0xff] (!%p97_p5)  ;;  %vm271_vm12 = vmand (!%p97_p5), %vm253_vm10, %vm270_vm11  ;;  %s796_s2 = sshll.u32 (!%p97_p5), %s599_s30, 3 }
  0x19   : > { %vm306_vm15 = vmand (!%p97_p5), %vm288_vm13, %vm305_vm14  ;;  %s1075_s5 = scalar_lea.vmem (!%p97_p5), %s1105_s1, %s796_s2 }
  0x1d   : > { %v118_v3 = vld [vmem:[%s965_s26] ss:$0 sm:$0xff] }
  0x1e   : > { %v120_v4 = vmul.f32 %v118_v3, %v118_v3  ;;  %v139_v5 = vmul.f32 0.0, %v118_v3 }
  0x20   : > { %121 = vadd.xlane.f32.xlu0 %v120_v4  ;;  %140 = vadd.xlane.f32.xlu1 %v139_v5 }
  0x24   : > { %128 = vadd.xlane.f32.xlu0 %v139_v5 }
  0xad   : > { %v122_v7 = vpop.xlane.xlu0 %121  ;;  %v141_v14 = vpop.xlane.xlu1 %140 }
  0xae   : > { %v123_v8 = vsub.f32 %v119_v6, %v122_v7  ;;  %v142_v17 = vsub.f32 %v977_v15, %v141_v14 }
  0xb0   : > { %840 = vrsqrt.f32 %v123_v8 }
  0xb1   : > { %v129_v9 = vpop.xlane.xlu0 %128 }
  0xb2   : > { %v130_v11 = vsub.f32 %v973_v10, %v129_v9 }
  0xba   : > { %v841_v12 = vpop.eup %840 }
  0xbb   : > { %v131_v13 = vmul.f32 %v841_v12, %v130_v11  ;;  %v143_v18 = vmul.f32 %v841_v12, %v142_v17 }
  0xbd   : > { %v132_v16 = vsel %vm117_vm0, %v131_v13, 0.0  ;;  %v144_v19 = vsel %vm117_vm0, %v143_v18, 0.0  ;;  %vm323_vm0 = vcmask 56368  }
  0xbe   : > { %134 = vst [vmem:[%s965_s26] sm:$0xff] %v132_v16 }
  0xc5   : > { %v718_v20 = vld [vmem:[%s965_s26 + $0x1] ss:$0 sm:$0xff] }
  0xc6   : > { %v160_v21 = vmul.f32 %v718_v20, %v132_v16  ;;  %v153_v22 = vmul.f32 %v718_v20, %v718_v20  ;;  %v174_v23 = vmul.f32 %v718_v20, %v144_v19 }
  0xc8   : > { %161 = vadd.xlane.f32.xlu0 %v160_v21  ;;  %154 = vadd.xlane.f32.xlu1 %v153_v22 }
  0xcc   : > { %175 = vadd.xlane.f32.xlu1 %v174_v23 }
 0x155   : > { %v155_v25 = vpop.xlane.xlu1 %154  ;;  %v162_v27 = vpop.xlane.xlu0 %161 }
 0x156   : > { %v156_v26 = vsub.f32 %v719_v24, %v155_v25  ;;  %v163_v28 = vsub.f32 %v973_v10, %v162_v27 }
 0x158   : > { %842 = vrsqrt.f32 %v156_v26 }
 0x159   : > { %v176_v33 = vpop.xlane.xlu1 %175 }
 0x15a   : > { %v177_v34 = vsub.f32 %v977_v15, %v176_v33 }
 0x162   : > { %v843_v29 = vpop.eup %842 }
 0x163   : > { %v164_v30 = vmul.f32 %v843_v29, %v163_v28  ;;  %v178_v35 = vmul.f32 %v843_v29, %v177_v34  ;;  %v739_v34 = vld [vmem:[%s969_s27 + $0x5] ss:$0 sm:$0xff] }
 0x165   : > { %v167_v31 = vsel %vm166_vm3, %v164_v30, 0.0  ;;  %v179_v36 = vsel %vm148_vm1, %v178_v35, 0.0  ;;  %vm340_vm1 = vcmask 1047558  }
 0x166   : > { %v168_v32 = vadd.f32 %v167_v31, %v132_v16  ;;  %v180_v40 = vadd.f32 %v179_v36, %v144_v19  ;;  %v734_v16 = vld [vmem:[%s969_s27 + $0x4] ss:$0 sm:$0xff]  ;;  %vm341_vm3 = vmand %vm323_vm0, %vm340_vm1 }
 0x168   : > { %169 = vst [vmem:[%s965_s26] sm:$0xff] %v168_v32 }
 0x16f   : > { %v723_v37 = vld [vmem:[%s965_s26 + $0x2] ss:$0 sm:$0xff] }
 0x170   : > { %v195_v38 = vmul.f32 %v723_v37, %v168_v32  ;;  %v188_v39 = vmul.f32 %v723_v37, %v723_v37  ;;  %v209_v41 = vmul.f32 %v723_v37, %v180_v40 }
 0x172   : > { %196 = vadd.xlane.f32.xlu1 %v195_v38  ;;  %189 = vadd.xlane.f32.xlu0 %v188_v39 }
 0x176   : > { %210 = vadd.xlane.f32.xlu0 %v209_v41 }
 0x1ff   : > { %v190_v43 = vpop.xlane.xlu0 %189  ;;  %v197_v45 = vpop.xlane.xlu1 %196 }
 0x200   : > { %v191_v44 = vsub.f32 %v724_v42, %v190_v43  ;;  %v198_v46 = vsub.f32 %v973_v10, %v197_v45 }
 0x202   : > { %844 = vrsqrt.f32 %v191_v44 }
 0x203   : > { %v211_v51 = vpop.xlane.xlu0 %210 }
 0x204   : > { %v212_v52 = vsub.f32 %v977_v15, %v211_v51 }
 0x20c   : > { %v845_v47 = vpop.eup %844 }
 0x20d   : > { %v199_v48 = vmul.f32 %v845_v47, %v198_v46  ;;  %v213_v53 = vmul.f32 %v845_v47, %v212_v52  ;;  %v744_v52 = vld [vmem:[%s969_s27 + $0x6] ss:$0 sm:$0xff] }
 0x20f   : > { %v202_v49 = vsel %vm201_vm6, %v199_v48, 0.0  ;;  %v214_v54 = vsel %vm183_vm4, %v213_v53, 0.0  ;;  %vm358_vm4 = vcmask 64568   ;;  %vm393_vm6 = vcmask 72768  }
 0x210   : > { %v203_v50 = vadd.f32 %v202_v49, %v168_v32  ;;  %v215_v58 = vadd.f32 %v214_v54, %v180_v40 }
 0x212   : > { %204 = vst [vmem:[%s965_s26] sm:$0xff] %v203_v50 }
 0x219   : > { %v728_v55 = vld [vmem:[%s965_s26 + $0x3] ss:$0 sm:$0xff] }
 0x21a   : > { %v230_v56 = vmul.f32 %v728_v55, %v203_v50  ;;  %v223_v57 = vmul.f32 %v728_v55, %v728_v55  ;;  %v244_v59 = vmul.f32 %v728_v55, %v215_v58 }
 0x21c   : > { %231 = vadd.xlane.f32.xlu0 %v230_v56  ;;  %224 = vadd.xlane.f32.xlu1 %v223_v57 }
 0x220   : > { %245 = vadd.xlane.f32.xlu1 %v244_v59 }
 0x2a9   : > { %v225_v61 = vpop.xlane.xlu1 %224  ;;  %v232_v63 = vpop.xlane.xlu0 %231 }
 0x2aa   : > { %v226_v62 = vsub.f32 %v729_v60, %v225_v61  ;;  %v233_v0 = vsub.f32 %v973_v10, %v232_v63 }
 0x2ac   : > { %846 = vrsqrt.f32 %v226_v62 }
 0x2ad   : > { %v246_v5 = vpop.xlane.xlu1 %245 }
 0x2ae   : > { %v247_v6 = vsub.f32 %v977_v15, %v246_v5  ;;  %v749_v5 = vld [vmem:[%s969_s27 + $0x7] ss:$0 sm:$0xff] }
 0x2b6   : > { %v847_v1 = vpop.eup %846 }
 0x2b7   : > { %v234_v2 = vmul.f32 %v847_v1, %v233_v0  ;;  %v248_v7 = vmul.f32 %v847_v1, %v247_v6 }
 0x2b9   : > { %v237_v3 = vsel %vm236_vm9, %v234_v2, 0.0  ;;  %v249_v8 = vsel %vm218_vm7, %v248_v7, 0.0  ;;  %vm416_vm7 = vcmask 80968  }
 0x2ba   : > { %v238_v4 = vadd.f32 %v237_v3, %v203_v50  ;;  %v250_v13 = vadd.f32 %v249_v8, %v215_v58  ;;  %vm436_vm9 = vmand %vm416_vm7, %vm165_vm2 }
 0x2bc   : > { %239 = vst [vmem:[%s965_s26] sm:$0xff] %v238_v4 }
 0x2c3   : > { %v733_v9 = vld [vmem:[%s965_s26 + $0x4] ss:$0 sm:$0xff] }
 0x2c4   : > { %v265_v11 = vmul.f32 %v733_v9, %v238_v4  ;;  %v258_v12 = vmul.f32 %v733_v9, %v733_v9  ;;  %v279_v14 = vmul.f32 %v733_v9, %v250_v13 }
 0x2c6   : > { %266 = vadd.xlane.f32.xlu1 %v265_v11  ;;  %259 = vadd.xlane.f32.xlu0 %v258_v12 }
 0x2ca   : > { %280 = vadd.xlane.f32.xlu0 %v279_v14 }
 0x353   : > { %v260_v17 = vpop.xlane.xlu0 %259  ;;  %v267_v19 = vpop.xlane.xlu1 %266 }
 0x354   : > { %v261_v18 = vsub.f32 %v734_v16, %v260_v17  ;;  %v268_v20 = vsub.f32 %v973_v10, %v267_v19  ;;  %v754_v19 = vld [vmem:[%s969_s27 + $0x8] ss:$0 sm:$0xff] }
 0x356   : > { %848 = vrsqrt.f32 %v261_v18 }
 0x357   : > { %v281_v25 = vpop.xlane.xlu0 %280 }
 0x358   : > { %v282_v26 = vsub.f32 %v977_v15, %v281_v25 }
 0x360   : > { %v849_v21 = vpop.eup %848 }
 0x361   : > { %v269_v22 = vmul.f32 %v849_v21, %v268_v20  ;;  %v283_v27 = vmul.f32 %v849_v21, %v282_v26 }
 0x363   : > { %v272_v23 = vsel %vm271_vm12, %v269_v22, 0.0  ;;  %v284_v28 = vsel %vm253_vm10, %v283_v27, 0.0  ;;  %vm441_vm10 = vcmask 89168   ;;  %vm466_vm12 = vcmask 97368  }
 0x364   : > { %v273_v24 = vadd.f32 %v272_v23, %v238_v4  ;;  %v285_v32 = vadd.f32 %v284_v28, %v250_v13  ;;  %vm461_vm2 = vmand %vm441_vm10, %vm200_vm5 }
 0x365   : > { %vm486_vm5 = vmand %vm466_vm12, %vm235_vm8 }
 0x366   : > { %274 = vst [vmem:[%s965_s26] sm:$0xff] %v273_v24 }
 0x36d   : > { %v738_v29 = vld [vmem:[%s965_s26 + $0x5] ss:$0 sm:$0xff] }
 0x36e   : > { %v300_v30 = vmul.f32 %v738_v29, %v273_v24  ;;  %v293_v31 = vmul.f32 %v738_v29, %v738_v29  ;;  %v314_v33 = vmul.f32 %v738_v29, %v285_v32 }
 0x370   : > { %301 = vadd.xlane.f32.xlu0 %v300_v30  ;;  %294 = vadd.xlane.f32.xlu1 %v293_v31  ;;  %v759_v31 = vld [vmem:[%s969_s27 + $0x9] ss:$0 sm:$0xff] }
 0x374   : > { %315 = vadd.xlane.f32.xlu1 %v314_v33 }
 0x3fd   : > { %v295_v35 = vpop.xlane.xlu1 %294  ;;  %v302_v37 = vpop.xlane.xlu0 %301 }
 0x3fe   : > { %v296_v36 = vsub.f32 %v739_v34, %v295_v35  ;;  %v303_v38 = vsub.f32 %v973_v10, %v302_v37 }
 0x400   : > { %850 = vrsqrt.f32 %v296_v36 }
 0x401   : > { %v316_v43 = vpop.xlane.xlu1 %315 }
 0x402   : > { %v317_v44 = vsub.f32 %v977_v15, %v316_v43  ;;  %v764_v43 = vld [vmem:[%s969_s27 + $0xa] ss:$0 sm:$0xff] }
 0x40a   : > { %v851_v39 = vpop.eup %850 }
 0x40b   : > { %v304_v40 = vmul.f32 %v851_v39, %v303_v38  ;;  %v318_v45 = vmul.f32 %v851_v39, %v317_v44 }
 0x40d   : > { %v307_v41 = vsel %vm306_vm15, %v304_v40, 0.0  ;;  %v319_v46 = vsel %vm288_vm13, %v318_v45, 0.0  ;;  %vm491_vm13 = vcmask 105568   ;;  %vm516_vm15 = vcmask 113768  }
 0x40e   : > { %v308_v42 = vadd.f32 %v307_v41, %v273_v24  ;;  %v320_v50 = vadd.f32 %v319_v46, %v285_v32  ;;  %vm511_vm8 = vmand %vm491_vm13, %vm270_vm11 }
 0x40f   : > { %vm536_vm11 = vmand %vm516_vm15, %vm305_vm14  ;;  %vm375_vm14 = vcmask 1047559  }
 0x410   : > { %309 = vst [vmem:[%s965_s26] sm:$0xff] %v308_v42 }
 0x417   : > { %v743_v47 = vld [vmem:[%s965_s26 + $0x6] ss:$0 sm:$0xff] }
 0x418   : > { %v335_v48 = vmul.f32 %v743_v47, %v308_v42  ;;  %v328_v49 = vmul.f32 %v743_v47, %v743_v47  ;;  %v349_v51 = vmul.f32 %v743_v47, %v320_v50 }
 0x41a   : > { %336 = vadd.xlane.f32.xlu1 %v335_v48  ;;  %329 = vadd.xlane.f32.xlu0 %v328_v49 }
 0x41e   : > { %350 = vadd.xlane.f32.xlu0 %v349_v51 }
 0x4a7   : > { %v330_v53 = vpop.xlane.xlu0 %329  ;;  %v337_v55 = vpop.xlane.xlu1 %336 }
 0x4a8   : > { %v331_v54 = vsub.f32 %v744_v52, %v330_v53  ;;  %v338_v56 = vsub.f32 %v973_v10, %v337_v55  ;;  %v769_v55 = vld [vmem:[%s969_s27 + $0xb] ss:$0 sm:$0xff] }
 0x4aa   : > { %852 = vrsqrt.f32 %v331_v54 }
 0x4ab   : > { %v351_v58 = vpop.xlane.xlu0 %350 }
 0x4ac   : > { %v352_v61 = vsub.f32 %v977_v15, %v351_v58 }
 0x4b4   : > { %v853_v57 = vpop.eup %852 }
 0x4b5   : > { %v339_v59 = vmul.f32 %v853_v57, %v338_v56  ;;  %v353_v63 = vmul.f32 %v853_v57, %v352_v61 }
 0x4b7   : > { %v342_v60 = vsel %vm341_vm3, %v339_v59, 0.0  ;;  %v354_v0 = vsel %vm323_vm0, %v353_v63, 0.0  ;;  %vm376_vm0 = vmand %vm358_vm4, %vm375_vm14  ;;  %vm541_vm3 = vcmask 121968  }
 0x4b8   : > { %v1016_v62 = vadd.f32 %v342_v60, %v308_v42  ;;  %v355_v1 = vadd.f32 %v354_v0, %v320_v50 }
 0x4ba   : > { %344 = vst [vmem:[%s965_s26] sm:$0xff] %v1016_v62 }
 0x4c1   : > { %v1021_v2 = vld [vmem:[%s965_s26 + $0x7] ss:$0 sm:$0xff] }
 0x4c2   : > { %v384_v3 = vmul.f32 %v1021_v2, %v355_v1  ;;  %v363_v4 = vmul.f32 %v1021_v2, %v1021_v2 }
 0x4c4   : > { %385 = vadd.xlane.f32.xlu0 %v384_v3  ;;  %364 = vadd.xlane.f32.xlu1 %v363_v4 }
 0x551   : > { %v365_v6 = vpop.xlane.xlu1 %364  ;;  %v386_v8 = vpop.xlane.xlu0 %385 }
 0x552   : > { %v366_v7 = vsub.f32 %v749_v5, %v365_v6  ;;  %v387_v9 = vsub.f32 %v977_v15, %v386_v8  ;;  %v774_v5 = vld [vmem:[%s969_s27 + $0xc] ss:$0 sm:$0xff] }
 0x554   : > { %854 = vrsqrt.f32 %v366_v7 }
 0x55e   : > { %v1028_v11 = vpop.eup %854 }
 0x55f   : > { %v388_v12 = vmul.f32 %v1028_v11, %v387_v9 }
 0x561   : > { %v389_v13 = vsel %vm358_vm4, %v388_v12, 0.0  ;;  %vm561_vm4 = vmand %vm541_vm3, %vm340_vm1 }
 0x562   : > { %v390_v14 = vadd.f32 %v389_v13, %v355_v1 }
 0x564   : > { %752 = vst [vmem:[%s965_s26 + $0x8] sm:$0xff] %v390_v14 }
 0x56b   : > { %v753_v16 = vld [vmem:[%s965_s26 + $0x8] ss:$0 sm:$0xff] }
 0x56c   : > { %v407_v17 = vmul.f32 %v753_v16, %v390_v14  ;;  %v398_v18 = vmul.f32 %v753_v16, %v753_v16 }
 0x56e   : > { %408 = vadd.xlane.f32.xlu0 %v407_v17  ;;  %399 = vadd.xlane.f32.xlu1 %v398_v18 }
 0x5fb   : > { %v400_v20 = vpop.xlane.xlu1 %399  ;;  %v409_v22 = vpop.xlane.xlu0 %408 }
 0x5fc   : > { %v401_v21 = vsub.f32 %v754_v19, %v400_v20  ;;  %v410_v23 = vsub.f32 %v977_v15, %v409_v22  ;;  %v779_v20 = vld [vmem:[%s969_s27 + $0xd] ss:$0 sm:$0xff] }
 0x5fe   : > { %856 = vrsqrt.f32 %v401_v21 }
 0x608   : > { %v857_v24 = vpop.eup %856 }
 0x609   : > { %v411_v25 = vmul.f32 %v857_v24, %v410_v23 }
 0x60b   : > { %v412_v26 = vsel %vm393_vm6, %v411_v25, 0.0  ;;  %vm566_vm6 = vcmask 130168  }
 0x60c   : > { %v413_v27 = vadd.f32 %v412_v26, %v390_v14  ;;  %vm586_vm1 = vmand %vm566_vm6, %vm375_vm14 }
 0x60e   : > { %757 = vst [vmem:[%s965_s26 + $0x8] sm:$0xff] %v413_v27 }
 0x615   : > { %v758_v28 = vld [vmem:[%s965_s26 + $0x9] ss:$0 sm:$0xff] }
 0x616   : > { %v430_v29 = vmul.f32 %v758_v28, %v413_v27  ;;  %v421_v30 = vmul.f32 %v758_v28, %v758_v28 }
 0x618   : > { %431 = vadd.xlane.f32.xlu0 %v430_v29  ;;  %422 = vadd.xlane.f32.xlu1 %v421_v30 }
 0x6a5   : > { %v423_v32 = vpop.xlane.xlu1 %422  ;;  %v432_v34 = vpop.xlane.xlu0 %431 }
 0x6a6   : > { %v424_v33 = vsub.f32 %v759_v31, %v423_v32  ;;  %v433_v35 = vsub.f32 %v977_v15, %v432_v34  ;;  %v370_v32 = vmul.f32 %v1021_v2, %v1016_v62 }
 0x6a8   : > { %858 = vrsqrt.f32 %v424_v33  ;;  %v784_v33 = vld [vmem:[%s969_s27 + $0xe] ss:$0 sm:$0xff] }
 0x6b2   : > { %v859_v36 = vpop.eup %858 }
 0x6b3   : > { %v434_v37 = vmul.f32 %v859_v36, %v433_v35 }
 0x6b5   : > { %v437_v38 = vsel %vm436_vm9, %v434_v37, 0.0 }
 0x6b6   : > { %v438_v39 = vadd.f32 %v437_v38, %v413_v27 }
 0x6b8   : > { %762 = vst [vmem:[%s965_s26 + $0x8] sm:$0xff] %v438_v39 }
 0x6bf   : > { %v763_v40 = vld [vmem:[%s965_s26 + $0xa] ss:$0 sm:$0xff] }
 0x6c0   : > { %v455_v41 = vmul.f32 %v763_v40, %v438_v39  ;;  %v446_v42 = vmul.f32 %v763_v40, %v763_v40 }
 0x6c2   : > { %456 = vadd.xlane.f32.xlu0 %v455_v41  ;;  %447 = vadd.xlane.f32.xlu1 %v446_v42 }
 0x74f   : > { %v448_v44 = vpop.xlane.xlu1 %447  ;;  %v457_v46 = vpop.xlane.xlu0 %456 }
 0x750   : > { %v449_v45 = vsub.f32 %v764_v43, %v448_v44  ;;  %v458_v47 = vsub.f32 %v977_v15, %v457_v46 }
 0x752   : > { %860 = vrsqrt.f32 %v449_v45 }
 0x75c   : > { %v861_v48 = vpop.eup %860 }
 0x75d   : > { %v459_v49 = vmul.f32 %v861_v48, %v458_v47  ;;  %v789_v47 = vld [vmem:[%s969_s27 + $0xf] ss:$0 sm:$0xff] }
 0x75f   : > { %v462_v50 = vsel %vm461_vm2, %v459_v49, 0.0 }
 0x760   : > { %v463_v51 = vadd.f32 %v462_v50, %v438_v39 }
 0x762   : > { %767 = vst [vmem:[%s965_s26 + $0x8] sm:$0xff] %v463_v51 }
 0x769   : > { %v768_v52 = vld [vmem:[%s965_s26 + $0xb] ss:$0 sm:$0xff] }
 0x76a   : > { %v480_v53 = vmul.f32 %v768_v52, %v463_v51  ;;  %v471_v54 = vmul.f32 %v768_v52, %v768_v52 }
 0x76c   : > { %481 = vadd.xlane.f32.xlu0 %v480_v53  ;;  %472 = vadd.xlane.f32.xlu1 %v471_v54 }
 0x7f9   : > { %v473_v56 = vpop.xlane.xlu1 %472  ;;  %v482_v58 = vpop.xlane.xlu0 %481 }
 0x7fa   : > { %v474_v57 = vsub.f32 %v769_v55, %v473_v56  ;;  %v483_v59 = vsub.f32 %v977_v15, %v482_v58 }
 0x7fc   : > { %862 = vrsqrt.f32 %v474_v57 }
 0x806   : > { %v863_v60 = vpop.eup %862 }
 0x807   : > { %v484_v61 = vmul.f32 %v863_v60, %v483_v59 }
 0x809   : > { %v487_v63 = vsel %vm486_vm5, %v484_v61, 0.0 }
 0x80a   : > { %v488_v0 = vadd.f32 %v487_v63, %v463_v51 }
 0x80c   : > { %772 = vst [vmem:[%s965_s26 + $0x8] sm:$0xff] %v488_v0 }
 0x813   : > { %v773_v1 = vld [vmem:[%s965_s26 + $0xc] ss:$0 sm:$0xff] }
 0x814   : > { %v505_v3 = vmul.f32 %v773_v1, %v488_v0  ;;  %v496_v4 = vmul.f32 %v773_v1, %v773_v1 }
 0x816   : > { %506 = vadd.xlane.f32.xlu0 %v505_v3  ;;  %497 = vadd.xlane.f32.xlu1 %v496_v4 }
 0x8a3   : > { %v498_v6 = vpop.xlane.xlu1 %497  ;;  %v507_v8 = vpop.xlane.xlu0 %506 }
 0x8a4   : > { %v499_v7 = vsub.f32 %v774_v5, %v498_v6  ;;  %v508_v9 = vsub.f32 %v977_v15, %v507_v8 }
 0x8a6   : > { %864 = vrsqrt.f32 %v499_v7 }
 0x8b0   : > { %v865_v12 = vpop.eup %864 }
 0x8b1   : > { %v509_v13 = vmul.f32 %v865_v12, %v508_v9 }
 0x8b3   : > { %v512_v14 = vsel %vm511_vm8, %v509_v13, 0.0 }
 0x8b4   : > { %v513_v16 = vadd.f32 %v512_v14, %v488_v0 }
 0x8b6   : > { %777 = vst [vmem:[%s965_s26 + $0x8] sm:$0xff] %v513_v16 }
 0x8bd   : > { %v778_v17 = vld [vmem:[%s965_s26 + $0xd] ss:$0 sm:$0xff] }
 0x8be   : > { %v530_v18 = vmul.f32 %v778_v17, %v513_v16  ;;  %v521_v19 = vmul.f32 %v778_v17, %v778_v17 }
 0x8c0   : > { %531 = vadd.xlane.f32.xlu0 %v530_v18  ;;  %522 = vadd.xlane.f32.xlu1 %v521_v19 }
 0x94d   : > { %v523_v21 = vpop.xlane.xlu1 %522  ;;  %v532_v23 = vpop.xlane.xlu0 %531 }
 0x94e   : > { %v524_v22 = vsub.f32 %v779_v20, %v523_v21  ;;  %v533_v24 = vsub.f32 %v977_v15, %v532_v23 }
 0x950   : > { %866 = vrsqrt.f32 %v524_v22 }
 0x95a   : > { %v867_v25 = vpop.eup %866 }
 0x95b   : > { %v534_v26 = vmul.f32 %v867_v25, %v533_v24 }
 0x95d   : > { %v537_v27 = vsel %vm536_vm11, %v534_v26, 0.0 }
 0x95e   : > { %v538_v28 = vadd.f32 %v537_v27, %v513_v16 }
 0x960   : > { %782 = vst [vmem:[%s965_s26 + $0x8] sm:$0xff] %v538_v28 }
 0x967   : > { %v783_v29 = vld [vmem:[%s965_s26 + $0xe] ss:$0 sm:$0xff] }
 0x968   : > { %v555_v30 = vmul.f32 %v783_v29, %v538_v28  ;;  %v546_v31 = vmul.f32 %v783_v29, %v783_v29 }
 0x96a   : > { %556 = vadd.xlane.f32.xlu0 %v555_v30  ;;  %547 = vadd.xlane.f32.xlu1 %v546_v31 }
 0x96e   : > { %371 = vadd.xlane.f32.xlu0 %v370_v32 }
 0x9f7   : > { %v557_v34 = vpop.xlane.xlu0 %556  ;;  %v548_v35 = vpop.xlane.xlu1 %547 }
 0x9f8   : > { %v549_v36 = vsub.f32 %v784_v33, %v548_v35 }
 0x9fa   : > { %868 = vrsqrt.f32 %v549_v36 }
 0x9fb   : > { %v372_v37 = vpop.xlane.xlu0 %371 }
 0x9fc   : > { %v373_v38 = vsub.f32 %v973_v10, %v372_v37  ;;  %v558_v10 = vsub.f32 %v977_v15, %v557_v34 }
 0x9fe   : > { %v374_v2 = vmul.f32 %v1028_v11, %v373_v38 }
 0xa00   : > { %v377_v39 = vsel %vm376_vm0, %v374_v2, 0.0 }
 0xa01   : > { %v378_v40 = vadd.f32 %v377_v39, %v1016_v62 }
 0xa03   : > { %379 = vst [vmem:[%s965_s26] sm:$0xff] %v378_v40  ;;  %632 = vst [vmem:[%s1075_s5] sm:$0xff] %v378_v40 }
 0xa04   : > { %v869_v41 = vpop.eup %868 }
 0xa05   : > { %v559_v42 = vmul.f32 %v869_v41, %v558_v10 }
 0xa07   : > { %v562_v11 = vsel %vm561_vm4, %v559_v42, 0.0 }
 0xa08   : > { %v563_v43 = vadd.f32 %v562_v11, %v538_v28 }
 0xa0a   : > { %787 = vst [vmem:[%s965_s26 + $0x8] sm:$0xff] %v563_v43 }
 0xa11   : > { %v788_v44 = vld [vmem:[%s965_s26 + $0xf] ss:$0 sm:$0xff] }
 0xa12   : > { %v571_v45 = vmul.f32 %v788_v44, %v788_v44  ;;  %v580_v46 = vmul.f32 %v788_v44, %v563_v43 }
 0xa14   : > { %572 = vadd.xlane.f32.xlu1 %v571_v45 }
 0xa18   : > { %581 = vadd.xlane.f32.xlu1 %v580_v46 }
 0xaa1   : > { %v573_v62 = vpop.xlane.xlu1 %572 }
 0xaa2   : > { %v574_v48 = vsub.f32 %v789_v47, %v573_v62 }
 0xaa4   : > { %870 = vrsqrt.f32 %v574_v48 }
 0xaa5   : > { %v582_v49 = vpop.xlane.xlu1 %581 }
 0xaa6   : > { %v583_v50 = vsub.f32 %v977_v15, %v582_v49 }
 0xaae   : > { %v871_v51 = vpop.eup %870 }
 0xaaf   : > { %v584_v52 = vmul.f32 %v871_v51, %v583_v50 }
 0xab1   : > { %v587_v53 = vsel %vm586_vm1, %v584_v52, 0.0 }
 0xab2   : > { %v588_v54 = vadd.f32 %v587_v53, %v563_v43 }
 0xab4   : > { %792 = vst [vmem:[%s965_s26 + $0x8] sm:$0xff] %v588_v54  ;;  %634 = vst [vmem:[%s1075_s5 + $0x8] sm:$0xff] %v588_v54 }
 0xab5 PF: > { %s7_s10 = sadd.s32 1, %s910_s10   ;;  %s1106_s6 = smov %s902_s8 }
 0xab6   : > { %p4_p6 = scmp.ge.s32.totalorder %s7_s10, 6   ;;  %s1107_s7 = smov %s906_s9 }
 0xab7   : > { %s1108_s8 = smov %s1111_s12  ;;  %s1109_s9 = smov %s1115_s13 }
 0xab8   :  { %6 = sbr.rel (!%p4_p6) target bundleno = 3 (0x3), region = 197 }

// kernel: custom-call.56
= control target key start
LH: loop header
LB: loop body
LE: loop exit
PB: predicated region body
PF: predicated region fallthrough
CT: control target
= control target key end

     0   :  { %s605_s6 = smov 0   ;;  %s607_s7 = smov 0   ;;  %s716_s0 = inlined_call_operand.vmem [shape: f32[2,2,1,16,16], index: 0, kind: input, shape index: {}]   ;;  %s717_s1 = inlined_call_operand.vmem [shape: f32[2,2,1,16,16], index: 1, kind: output, shape index: {}]  }
   0x1   :  { %s609_s8 = smov 0   ;;  %s611_s9 = smov 0  }
   0x2   :  { %s613_s10 = smov 0  }
   0x3 LB: > { %s489_s11 = sadd.s32 4294967295, %s591_s10   ;;  %s36_s12 = sadd.s32 1, %s583_s8  ;;  %s591_s10 = sphi %s613_s10, %s7_s10   ;;  %s587_s9 = sphi %s611_s9, %s721_s9   ;;  %s583_s8 = sphi %s609_s8, %s720_s8   ;;  %s579_s7 = sphi %s607_s7, %s719_s7   ;;  %s575_s6 = sphi %s605_s6, %s718_s6  }
   0x4   : > { %p38_p0 = scmp.ge.s32.totalorder %s36_s12, 2  ;;  %s40_s13 = sadd.s32 1, %s587_s9 }
   0x5   : > { %p491_p2 = scmp.ge.s32.totalorder %s591_s10, 4 }
   0x6   : > { %s723_s12 = smov (%p38_p0, %s36_s12), 0  ;;  %s725_s13 = smov (!%p38_p0, %s40_s13), %s587_s9 }
   0x7   : > { %p42_p1 = scmp.ge.s32.totalorder %s725_s13, 2  ;;  %54 = sbr.rel (%p491_p2) target bundleno = 16 (0x10), region = 16 }
   0x8   : > { %s56_s14 = sand.u32 (!%p491_p2), 1, %s591_s10   ;;  %s493_s15 = sshll.u32 (!%p491_p2), %s583_s8, 1 }
   0x9   : > { %s727_s13 = smov (%p42_p1, %s725_s13), 0  ;;  %s492_s16 = sshll.u32 (!%p491_p2), %s56_s14, 4 }
   0xa   : > { %s494_s17 = sshll.u32 (!%p491_p2), %s587_s9, 2  ;;  %s58_s23 = scalar_lea.vmem (!%p491_p2), [#allocation0], %s492_s16 }
   0xb   : > { %s65_s18 = sadd.s32 (!%p491_p2), %s494_s17, %s493_s15 }
   0xc   : > { %s495_s19 = sshll.u32 (!%p491_p2), %s65_s18, 3 }
   0xd   : > { %s67_s22 = scalar_lea.vmem (!%p491_p2), %s716_s0, %s495_s19 }
   0xe   : > { %v97_v0 = vld [vmem:[%s67_s22] sm:$0xff]  ;;  %v99_v1 = vld [vmem:[%s67_s22 + $0x8] sm:$0xff] }
   0xf   : > { %98 = vst [vmem:[%s58_s23] sm:$0xff] %v97_v0  ;;  %100 = vst [vmem:[%s58_s23 + $0x8] sm:$0xff] %v99_v1 }
  0x10 PF: > { %p496_p3 = scmp.ge.s32.totalorder %s591_s10, 1  ;;  %p105_p4 = scmp.lt.s32.totalorder %s591_s10, 5 }
  0x12   : > { %p106_p5 = pnand %p496_p3, %p105_p4 }
  0x14   : > { %109 = sbr.rel (%p106_p5) target bundleno = 2377 (0x949), region = 54 }
  0x1b   : > { %s112_s24 = sand.u32 1, %s489_s11   ;;  %v123_v2 = vlaneseq  ;;  %v593_v11 = vmov -1.0   ;;  %v594_v55 = vmov 0.0   ;;  %s502_s27 = sshll.u32 %s575_s6, 1 }
  0x1c   : > { %s497_s25 = sshll.u32 %s112_s24, 4  ;;  %s503_s28 = sshll.u32 %s579_s7, 2 }
  0x1d   : > { %v647_v3 = vand.u32 127, %v123_v2  ;;  %v127_v4 = vshrl.u32 %v123_v2, 7  ;;  %s649_s26 = scalar_lea.vmem [#allocation0], %s497_s25  ;;  %s377_s29 = sadd.s32 %s503_s28, %s502_s27 }
  0x1e   : > { %v130_v5 = vld [vmem:[%s649_s26] sm:$0xff]  ;;  %v499_v38 = vld [vmem:[%s649_s26 + $0x8] sm:$0xff]  ;;  %s504_s30 = sshll.u32 %s377_s29, 3 }
  0x1f   : > { %vm129_vm0 = vcmp.eq.s32.totalorder %v127_v4, %v647_v3  ;;  %vm125_vm1 = vcmp.lt.s32.totalorder %v647_v3, 16  ;;  %vm134_vm2 = vcmp.ge.s32.totalorder %v127_v4, %v647_v3  ;;  %vm164_vm4 = vcmp.eq.s32.totalorder %v647_v3, 0  ;;  %s379_s4 = scalar_lea.vmem %s717_s1, %s504_s30 }
  0x20   : > { %v131_v6 = vsel %vm129_vm0, %v130_v5, 0.0  ;;  %vm135_vm3 = vmand %vm134_vm2, %vm125_vm1  ;;  %vm161_vm5 = vcmp.eq.s32.totalorder %v647_v3, %v127_v4  ;;  %v165_v12 = vsel %vm164_vm4, 1.0, %v593_v11  ;;  %vm179_vm6 = vcmp.eq.s32.totalorder %v647_v3, 1 }
  0x21   : > { %132 = vadd.xlane.f32.xlu0 %v131_v6  ;;  %v136_v8 = vsel %vm135_vm3, %v130_v5, 0.0  ;;  %v166_v13 = vsel %vm161_vm5, %v165_v12, 0.0  ;;  %vm189_vm7 = vcmp.eq.s32.totalorder %v647_v3, 2  ;;  %vm199_vm8 = vcmp.eq.s32.totalorder %v647_v3, 3 }
  0x22   : > { %vm209_vm9 = vcmp.eq.s32.totalorder %v647_v3, 4  ;;  %v144_v33 = vadd.s32 8, %v127_v4  ;;  %vm219_vm11 = vcmp.eq.s32.totalorder %v647_v3, 5  ;;  %vm229_vm14 = vcmp.eq.s32.totalorder %v647_v3, 6 }
  0x23   : > { %vm239_vm0 = vcmp.eq.s32.totalorder %v647_v3, 7  ;;  %vm263_vm2 = vcmp.eq.s32.totalorder %v647_v3, 9  ;;  %vm277_vm3 = vcmp.eq.s32.totalorder %v647_v3, 10  ;;  %vm291_vm4 = vcmp.eq.s32.totalorder %v647_v3, 11 }
  0x24   : > { %vm145_vm10 = vcmp.eq.s32.totalorder %v144_v33, %v647_v3  ;;  %vm150_vm12 = vcmp.ge.s32.totalorder %v144_v33, %v647_v3  ;;  %vm172_vm15 = vcmp.eq.s32.totalorder %v647_v3, %v144_v33  ;;  %vm305_vm5 = vcmp.eq.s32.totalorder %v647_v3, 12 }
  0x25   : > { %v147_v39 = vsel %vm145_vm10, %v499_v38, 0.0  ;;  %vm151_vm13 = vmand %vm150_vm12, %vm125_vm1  ;;  %v173_v56 = vsel %vm172_vm15, -1.0, %v594_v55  ;;  %vm249_vm1 = vcmp.eq.s32.totalorder %v647_v3, 8 }
  0x26   : > { %v152_v46 = vsel %vm151_vm13, %v499_v38, 0.0 }
  0xae   : > { %v653_v7 = vpop.xlane.xlu0 %132 }
  0xaf   : > { %549 = vrcp.f32 %v653_v7  ;;  %vm358_vm10 = vweird.f32 %v653_v7 }
  0xb9   : > { %v660_v9 = vpop.eup %549 }
  0xba   : > { %v138_v10 = vmul.f32 %v660_v9, %v136_v8 }
  0xbc   : > { %139 = vst [vmem:[#allocation2] sm:$0xff] %v138_v10 }
  0xc3   : > { %v175_v14 = vld [vmem:[#allocation2 + $0x1] ss:$0 sm:$0xff]  ;;  %v185_v17 = vld [vmem:[#allocation2 + $0x2] ss:$0 sm:$0xff]  ;;  %v195_v22 = vld [vmem:[#allocation2 + $0x3] ss:$0 sm:$0xff] }
  0xc4   : > { %v176_v15 = vxor.u32 2147483648, %v175_v14  ;;  %v186_v19 = vxor.u32 2147483648, %v185_v17  ;;  %v196_v24 = vxor.u32 2147483648, %v195_v22  ;;  %v205_v27 = vld [vmem:[#allocation2 + $0x4] ss:$0 sm:$0xff] }
  0xc5   : > { %v206_v29 = vxor.u32 2147483648, %v205_v27  ;;  %v215_v32 = vld [vmem:[#allocation2 + $0x5] ss:$0 sm:$0xff]  ;;  %v225_v40 = vld [vmem:[#allocation2 + $0x6] ss:$0 sm:$0xff] }
  0xc6   : > { %v180_v16 = vmul.f32 %v176_v15, %v166_v13  ;;  %v216_v35 = vxor.u32 2147483648, %v215_v32  ;;  %v226_v42 = vxor.u32 2147483648, %v225_v40  ;;  %v235_v49 = vld [vmem:[#allocation2 + $0x7] ss:$0 sm:$0xff] }
  0xc7   : > { %v236_v52 = vxor.u32 2147483648, %v235_v49 }
  0xc8   : > { %181 = vadd.xlane.f32.xlu0 %v180_v16 }
 0x155   : > { %v182_v18 = vpop.xlane.xlu0 %181 }
 0x156   : > { %v183_v20 = vsel %vm179_vm6, %v182_v18, %v166_v13  ;;  %vm319_vm6 = vcmp.eq.s32.totalorder %v647_v3, 13 }
 0x157   : > { %v190_v21 = vmul.f32 %v186_v19, %v183_v20 }
 0x159   : > { %191 = vadd.xlane.f32.xlu1 %v190_v21 }
 0x1e6   : > { %v192_v23 = vpop.xlane.xlu1 %191 }
 0x1e7   : > { %v193_v25 = vsel %vm189_vm7, %v192_v23, %v183_v20  ;;  %vm333_vm7 = vcmp.eq.s32.totalorder %v647_v3, 14 }
 0x1e8   : > { %v200_v26 = vmul.f32 %v196_v24, %v193_v25 }
 0x1ea   : > { %201 = vadd.xlane.f32.xlu1 %v200_v26 }
 0x277   : > { %v202_v28 = vpop.xlane.xlu1 %201 }
 0x278   : > { %v203_v30 = vsel %vm199_vm8, %v202_v28, %v193_v25  ;;  %vm347_vm8 = vcmp.eq.s32.totalorder %v647_v3, 15 }
 0x279   : > { %v210_v31 = vmul.f32 %v206_v29, %v203_v30 }
 0x27b   : > { %211 = vadd.xlane.f32.xlu0 %v210_v31 }
 0x308   : > { %v212_v34 = vpop.xlane.xlu0 %211 }
 0x309   : > { %v213_v36 = vsel %vm209_vm9, %v212_v34, %v203_v30 }
 0x30a   : > { %v220_v37 = vmul.f32 %v216_v35, %v213_v36 }
 0x30c   : > { %221 = vadd.xlane.f32.xlu1 %v220_v37 }
 0x310   : > { %148 = vadd.xlane.f32.xlu1 %v147_v39 }
 0x399   : > { %v222_v41 = vpop.xlane.xlu1 %221 }
 0x39a   : > { %v223_v43 = vsel %vm219_vm11, %v222_v41, %v213_v36 }
 0x39b   : > { %v230_v44 = vmul.f32 %v226_v42, %v223_v43 }
 0x39d   : > { %231 = vadd.xlane.f32.xlu0 %v230_v44  ;;  %v672_v45 = vpop.xlane.xlu1 %148 }
 0x39e   : > { %551 = vrcp.f32 %v672_v45  ;;  %vm363_vm9 = vweird.f32 %v672_v45 }
 0x3a8   : > { %v678_v47 = vpop.eup %551 }
 0x3a9   : > { %v154_v48 = vmul.f32 %v678_v47, %v152_v46 }
 0x3ab   : > { %155 = vst [vmem:[#allocation2 + $0x8] sm:$0xff] %v154_v48 }
 0x3b2   : > { %v245_v50 = vld [vmem:[#allocation2 + $0x8] ss:$0 sm:$0xff]  ;;  %v259_v61 = vld [vmem:[#allocation2 + $0x9] ss:$0 sm:$0xff]  ;;  %v273_v6 = vld [vmem:[#allocation2 + $0xa] ss:$0 sm:$0xff] }
 0x3b3   : > { %v246_v53 = vxor.u32 2147483648, %v245_v50  ;;  %v260_v0 = vxor.u32 2147483648, %v259_v61  ;;  %v274_v11 = vxor.u32 2147483648, %v273_v6  ;;  %v287_v16 = vld [vmem:[#allocation2 + $0xb] ss:$0 sm:$0xff] }
 0x3b4   : > { %v288_v19 = vxor.u32 2147483648, %v287_v16  ;;  %v301_v24 = vld [vmem:[#allocation2 + $0xc] ss:$0 sm:$0xff]  ;;  %v315_v32 = vld [vmem:[#allocation2 + $0xd] ss:$0 sm:$0xff] }
 0x3b5   : > { %v254_v58 = vmul.f32 %v246_v53, %v173_v56  ;;  %v302_v27 = vxor.u32 2147483648, %v301_v24  ;;  %v316_v35 = vxor.u32 2147483648, %v315_v32  ;;  %v329_v40 = vld [vmem:[#allocation2 + $0xe] ss:$0 sm:$0xff]  ;;  %v343_v50 = vld [vmem:[#allocation2 + $0xf] ss:$0 sm:$0xff] }
 0x42a   : > { %v232_v51 = vpop.xlane.xlu0 %231 }
 0x42b   : > { %v233_v54 = vsel %vm229_vm14, %v232_v51, %v223_v43  ;;  %v330_v43 = vxor.u32 2147483648, %v329_v40 }
 0x42c   : > { %v240_v57 = vmul.f32 %v236_v52, %v233_v54 }
 0x42e   : > { %241 = vadd.xlane.f32.xlu0 %v240_v57 }
 0x432   : > { %255 = vadd.xlane.f32.xlu0 %v254_v58 }
 0x4bb   : > { %v242_v59 = vpop.xlane.xlu0 %241 }
 0x4bc   : > { %v243_v60 = vsel %vm239_vm0, %v242_v59, %v233_v54 }
 0x4bd   : > { %v250_v62 = vmul.f32 %v246_v53, %v243_v60  ;;  %v344_v53 = vxor.u32 2147483648, %v343_v50 }
 0x4bf   : > { %v256_v63 = vpop.xlane.xlu0 %255  ;;  %251 = vadd.xlane.f32.xlu1 %v250_v62 }
 0x4c0   : > { %v257_v1 = vsel %vm249_vm1, %v256_v63, %v173_v56 }
 0x4c1   : > { %v268_v2 = vmul.f32 %v260_v0, %v257_v1 }
 0x4c3   : > { %269 = vadd.xlane.f32.xlu0 %v268_v2 }
 0x54c   : > { %v252_v4 = vpop.xlane.xlu1 %251 }
 0x54d   : > { %v253_v5 = vsel %vm249_vm1, %v252_v4, %v243_v60 }
 0x54e   : > { %v264_v8 = vmul.f32 %v260_v0, %v253_v5 }
 0x550   : > { %v270_v10 = vpop.xlane.xlu0 %269  ;;  %265 = vadd.xlane.f32.xlu1 %v264_v8 }
 0x551   : > { %v271_v12 = vsel %vm263_vm2, %v270_v10, %v257_v1 }
 0x552   : > { %v282_v13 = vmul.f32 %v274_v11, %v271_v12 }
 0x554   : > { %283 = vadd.xlane.f32.xlu0 %v282_v13 }
 0x5dd   : > { %v266_v14 = vpop.xlane.xlu1 %265 }
 0x5de   : > { %v267_v15 = vsel %vm263_vm2, %v266_v14, %v253_v5 }
 0x5df   : > { %v278_v17 = vmul.f32 %v274_v11, %v267_v15 }
 0x5e1   : > { %v284_v18 = vpop.xlane.xlu0 %283  ;;  %279 = vadd.xlane.f32.xlu1 %v278_v17 }
 0x5e2   : > { %v285_v20 = vsel %vm277_vm3, %v284_v18, %v271_v12 }
 0x5e3   : > { %v296_v21 = vmul.f32 %v288_v19, %v285_v20 }
 0x5e5   : > { %297 = vadd.xlane.f32.xlu0 %v296_v21 }
 0x66e   : > { %v280_v22 = vpop.xlane.xlu1 %279 }
 0x66f   : > { %v281_v23 = vsel %vm277_vm3, %v280_v22, %v267_v15 }
 0x670   : > { %v292_v25 = vmul.f32 %v288_v19, %v281_v23 }
 0x672   : > { %v298_v26 = vpop.xlane.xlu0 %297  ;;  %293 = vadd.xlane.f32.xlu1 %v292_v25 }
 0x673   : > { %v299_v28 = vsel %vm291_vm4, %v298_v26, %v285_v20 }
 0x674   : > { %v310_v29 = vmul.f32 %v302_v27, %v299_v28 }
 0x676   : > { %311 = vadd.xlane.f32.xlu0 %v310_v29 }
 0x6ff   : > { %v294_v30 = vpop.xlane.xlu1 %293 }
 0x700   : > { %v295_v31 = vsel %vm291_vm4, %v294_v30, %v281_v23 }
 0x701   : > { %v306_v33 = vmul.f32 %v302_v27, %v295_v31 }
 0x703   : > { %v312_v34 = vpop.xlane.xlu0 %311  ;;  %307 = vadd.xlane.f32.xlu1 %v306_v33 }
 0x704   : > { %v313_v36 = vsel %vm305_vm5, %v312_v34, %v299_v28 }
 0x705   : > { %v324_v37 = vmul.f32 %v316_v35, %v313_v36 }
 0x707   : > { %325 = vadd.xlane.f32.xlu0 %v324_v37 }
 0x790   : > { %v308_v38 = vpop.xlane.xlu1 %307 }
 0x791   : > { %v309_v39 = vsel %vm305_vm5, %v308_v38, %v295_v31 }
 0x792   : > { %v320_v41 = vmul.f32 %v316_v35, %v309_v39 }
 0x794   : > { %v326_v42 = vpop.xlane.xlu0 %325  ;;  %321 = vadd.xlane.f32.xlu1 %v320_v41 }
 0x795   : > { %v327_v44 = vsel %vm319_vm6, %v326_v42, %v313_v36 }
 0x796   : > { %v338_v46 = vmul.f32 %v330_v43, %v327_v44 }
 0x798   : > { %339 = vadd.xlane.f32.xlu0 %v338_v46 }
 0x821   : > { %v322_v48 = vpop.xlane.xlu1 %321 }
 0x822   : > { %v323_v49 = vsel %vm319_vm6, %v322_v48, %v309_v39 }
 0x823   : > { %v334_v51 = vmul.f32 %v330_v43, %v323_v49 }
 0x825   : > { %v340_v52 = vpop.xlane.xlu0 %339  ;;  %335 = vadd.xlane.f32.xlu1 %v334_v51 }
 0x826   : > { %v341_v54 = vsel %vm333_vm7, %v340_v52, %v327_v44 }
 0x827   : > { %v352_v55 = vmul.f32 %v344_v53, %v341_v54 }
 0x829   : > { %353 = vadd.xlane.f32.xlu0 %v352_v55 }
 0x8b2   : > { %v336_v56 = vpop.xlane.xlu1 %335 }
 0x8b3   : > { %v337_v57 = vsel %vm333_vm7, %v336_v56, %v323_v49 }
 0x8b4   : > { %v348_v58 = vmul.f32 %v344_v53, %v337_v57 }
 0x8b6   : > { %v354_v59 = vpop.xlane.xlu0 %353  ;;  %349 = vadd.xlane.f32.xlu1 %v348_v58 }
 0x8b7   : > { %v355_v60 = vsel %vm347_vm8, %v354_v59, %v341_v54 }
 0x8b8   : > { %v362_v61 = vmul.f32 %v678_v47, %v355_v60 }
 0x8ba   : > { %v364_v62 = vsel %vm363_vm9, %v355_v60, %v362_v61 }
 0x8bb   : > { %412 = vst [vmem:[%s379_s4 + $0x8] sm:$0xff] %v364_v62 }
 0x943   : > { %v350_v63 = vpop.xlane.xlu1 %349 }
 0x944   : > { %v351_v0 = vsel %vm347_vm8, %v350_v63, %v337_v57 }
 0x945   : > { %v357_v1 = vmul.f32 %v660_v9, %v351_v0 }
 0x947   : > { %v359_v3 = vsel %vm358_vm10, %v351_v0, %v357_v1 }
 0x948   : > { %410 = vst [vmem:[%s379_s4] sm:$0xff] %v359_v3 }
 0x949 PF: > { %s7_s10 = sadd.s32 1, %s591_s10   ;;  %s718_s6 = smov %s583_s8 }
 0x94a   : > { %p4_p6 = scmp.ge.s32.totalorder %s7_s10, 6   ;;  %s719_s7 = smov %s587_s9 }
 0x94b   : > { %s720_s8 = smov %s723_s12  ;;  %s721_s9 = smov %s727_s13 }
 0x94c   :  { %6 = sbr.rel (!%p4_p6) target bundleno = 3 (0x3), region = 136 }

// kernel: custom-call.22
= control target key start
LH: loop header
LB: loop body
LE: loop exit
PB: predicated region body
PF: predicated region fallthrough
CT: control target
= control target key end

     0   :  { %s2158_s0 = inlined_call_operand.vmem [shape: f32[2,2,8,8], index: 0, kind: input, shape index: {}]   ;;  %s2159_s1 = inlined_call_operand.vmem [shape: f32[2,2,8,8], index: 1, kind: input, shape index: {}]   ;;  %s2160_s2 = inlined_call_operand.vmem [shape: f32[2,2,8,8], index: 2, kind: input, shape index: {}]   ;;  %s2161_s3 = inlined_call_operand.vmem [shape: f32[2,2,8,8], index: 3, kind: input, shape index: {}]   ;;  %s2162_s4 = inlined_call_operand.vmem [shape: f32[2,2,8], index: 4, kind: output, shape index: {0}]   ;;  %s2163_s5 = inlined_call_operand.vmem [shape: f32[2,2,8], index: 5, kind: output, shape index: {1}]   ;;  %s2164_s6 = inlined_call_operand.vmem [shape: f32[2,2,8,8], index: 6, kind: output, shape index: {2}]   ;;  %s2165_s7 = inlined_call_operand.vmem [shape: f32[2,2,8,8], index: 7, kind: output, shape index: {3}]   ;;  %s2166_s8 = inlined_call_operand.vmem [shape: f32[2,2,8,8], index: 8, kind: output, shape index: {4}]   ;;  %s2167_s9 = inlined_call_operand.vmem [shape: f32[2,2,8,8], index: 9, kind: output, shape index: {5}]  }
   0x1   :  { %2173 = sst [smem:[#allocation30_spill]] %s2167_s9 }
   0x2   :  { %s1808_s30 = smov 0   ;;  %s1810_s10 = smov 0  }
   0x3   :  { %s1812_s11 = smov 0   ;;  %s1814_s12 = smov 0  }
   0x4   :  { %s1816_s13 = smov 0   ;;  %s1818_s14 = smov 0  }
   0x5   :  { %s1820_s15 = smov 0  }
   0x6 LB: > { %2174 = sst [smem:[#allocation25_spill]] %s1725_s10  ;;  %s25_s16 = sadd.s32 1, %s1737_s13  ;;  %s1745_s15 = sphi %s1820_s15, %s16_s15   ;;  %s1741_s14 = sphi %s1818_s14, %s2189_s14   ;;  %s1737_s13 = sphi %s1816_s13, %s2191_s13   ;;  %s1733_s12 = sphi %s1814_s12, %s2187_s12   ;;  %s1729_s11 = sphi %s1812_s11, %s2190_s11   ;;  %s1725_s10 = sphi %s1810_s10, %s2186_s10   ;;  %s1721_s30 = sphi %s1808_s30, %s2185_s30  }
   0x7   : > { %2175 = sst [smem:[#allocation26_spill]] %s1741_s14  ;;  %p26_p0 = scmp.ge.s32.totalorder %s25_s16, 2 }
   0x8   : > { %s28_s17 = sadd.s32 1, %s1741_s14  ;;  %s2168_s18 = sadd.s32 4294967295, %s1745_s15  }
   0x9   : > { %s32_s19 = sshrl.u32 %s1737_s13, 3  ;;  %s2193_s16 = smov (%p26_p0, %s25_s16), 0 }
   0xa   : > { %2176 = sst [smem:[#allocation27_spill]] %s2193_s16  ;;  %s2195_s17 = smov (!%p26_p0, %s28_s17), %s1741_s14 }
   0xb   : > { %s33_s20 = sshrl.u32 %s2193_s16, 3  ;;  %p49_p1 = scmp.ne.s32.totalorder %s1725_s10, %s1721_s30 }
   0xc   : > { %p30_p2 = scmp.ge.s32.totalorder %s2195_s17, 2  ;;  %s35_s21 = ssub.s32 %s32_s19, %s33_s20 }
   0xd   : > { %p50_p3 = scmp.eq.s32.totalorder %s2168_s18, 3  ;;  %s39_s25 = sadd.s32 1, %s1725_s10 }
   0xe   : > { %s2197_s17 = smov (%p30_p2, %s2195_s17), 0  ;;  %p1534_p6 = scmp.ge.s32.totalorder %s1745_s15, 4 }
   0xf   : > { %2177 = sst [smem:[#allocation28_spill]] %s2197_s17  ;;  %p1857_p4 = por %p50_p3, %p49_p1 }
  0x10   : > { %s34_s23 = ssub.s32 %s1741_s14, %s2197_s17  ;;  %102 = sbr.rel (%p1534_p6) target bundleno = 28 (0x1c), region = 16 }
  0x11   : > { %s36_s24 = sor.u32 %s35_s21, %s34_s23  ;;  %s104_s27 = sand.u32 (!%p1534_p6), 1, %s1745_s15  }
  0x12   : > { %p37_p5 = scmp.eq.s32.totalorder %s36_s24, 0  ;;  %s1536_s28 = sshll.u32 (!%p1534_p6), %s1741_s14, 1 }
  0x13   : > { %s1535_s29 = sshll.u32 (!%p1534_p6), %s104_s27, 3  ;;  %s108_s19 = sadd.s32 (!%p1534_p6), %s1737_s13, %s1536_s28 }
  0x14   : > { %s1865_s26 = scalar_select %p37_p5, %s1725_s10, %s39_s25  }
  0x15   : > { %s1537_s20 = sshll.u32 (!%p1534_p6), %s108_s19, 3  ;;  %s106_s25 = scalar_lea.vmem (!%p1534_p6), [#allocation0], %s1535_s29 }
  0x16   : > { %2179 = sst [smem:[#allocation29_spill]] %s1865_s26  ;;  %s110_s17 = scalar_lea.vmem (!%p1534_p6), %s2158_s0, %s1537_s20 }
  0x17   : > { %v138_v0 = vld [vmem:[%s110_s17] sm:$0xff]  ;;  %s150_s24 = scalar_lea.vmem %s2159_s1, %s1537_s20  ;;  %s190_s9 = scalar_lea.vmem %s2160_s2, %s1537_s20 }
  0x18   : > { %139 = vst [vmem:[%s106_s25] sm:$0xff] %v138_v0  ;;  %v178_v1 = vld [vmem:[%s150_s24] sm:$0xff]  ;;  %s146_s14 = scalar_lea.vmem [#allocation1], %s1535_s29  ;;  %s230_s16 = scalar_lea.vmem %s2161_s3, %s1537_s20 }
  0x19   : > { %179 = vst [vmem:[%s146_s14] sm:$0xff] %v178_v1  ;;  %v218_v2 = vld [vmem:[%s190_s9] sm:$0xff]  ;;  %s186_s18 = scalar_lea.vmem [#allocation2], %s1535_s29  ;;  %s226_s17 = scalar_lea.vmem [#allocation3], %s1535_s29 }
  0x1a   : > { %219 = vst [vmem:[%s186_s18] sm:$0xff] %v218_v2  ;;  %v258_v3 = vld [vmem:[%s230_s16] sm:$0xff] }
  0x1b   : > { %259 = vst [vmem:[%s226_s17] sm:$0xff] %v258_v3 }
  0x1c PF: > { %p1547_p7 = scmp.ge.s32.totalorder %s1745_s15, 1  ;;  %p264_p8 = scmp.lt.s32.totalorder %s1745_s15, 5 }
  0x1e   : > { %p265_p9 = pnand %p1547_p7, %p264_p8 }
  0x20   : > { %268 = sbr.rel (%p265_p9) target bundleno = 1006 (0x3ee), region = 156 }
  0x27   : > { %s2180_s10 = sadd.s32 4294967295, %s1745_s15   ;;  %s305_s14 = sand.u32 1, %s1721_s30   ;;  %v349_v4 = vlaneseq  ;;  %v1755_v11 = vmov 0.0  }
  0x28   : > { %s271_s9 = sand.u32 1, %s2180_s10   ;;  %s1888_s19 = sshll.u32 %s305_s14, 1 }
  0x29   : > { %s1548_s26 = sshll.u32 %s271_s9, 3  ;;  %v1890_v5 = vand.u32 127, %v349_v4  ;;  %v1892_v6 = vshrl.u32 %v349_v4, 7  ;;  %s332_s25 = smov [#allocation12] }
  0x2a   : > { %s273_s29 = scalar_lea.vmem [#allocation0], %s1548_s26  ;;  %s277_s20 = scalar_lea.vmem [#allocation1], %s1548_s26 }
  0x2b   : > { %v333_v7 = vld [vmem:[%s273_s29] sm:$0xff]  ;;  %v336_v8 = vld [vmem:[%s277_s20] sm:$0xff]  ;;  %s281_s21 = scalar_lea.vmem [#allocation2], %s1548_s26  ;;  %s285_s23 = scalar_lea.vmem [#allocation3], %s1548_s26  ;;  %v351_v5 = vmov %v1890_v5  ;;  %v354_v6 = vmov %v1892_v6  ;;  %vm1411_vm2 = vcmp.lt.s32.totalorder %v1890_v5, 8 }
  0x2c   : > { %v339_v9 = vld [vmem:[%s281_s21] sm:$0xff]  ;;  %v342_v10 = vld [vmem:[%s285_s23] sm:$0xff]  ;;  %s1894_s24 = scalar_lea.vmem [#allocation8], %s1548_s26  ;;  %s1897_s30 = scalar_lea.vmem [#allocation9], %s1548_s26  ;;  %334 = vst [vmem:[%s332_s25] sm:$0xff] %v333_v7  ;;  %v364_v5 = vmov %v1890_v5  ;;  %v367_v6 = vmov %v1892_v6  ;;  %vm358_vm0 = vcmp.eq.s32.totalorder %v354_v6, %v351_v5 }
  0x2d   : > { %344 = vst [vmem:[%s1894_s24] sm:$0xff] %v1755_v11  ;;  %345 = vst [vmem:[%s1897_s30] sm:$0xff] %v1755_v11  ;;  %s335_s27 = smov [#allocation13]  ;;  %s1900_s28 = scalar_lea.vmem [#allocation10], %s1548_s26  ;;  %vm371_vm1 = vcmp.eq.s32.totalorder %v367_v6, %v364_v5  ;;  %v1403_v5 = vmov %v1890_v5  ;;  %v1406_v6 = vmov %v1892_v6 }
  0x2e   : > { %346 = vst [vmem:[%s1900_s28] sm:$0xff] %v1755_v11  ;;  %s1903_s16 = scalar_lea.vmem [#allocation11], %s1548_s26  ;;  %337 = vst [vmem:[%s335_s27] sm:$0xff] %v336_v8  ;;  %s338_s18 = smov [#allocation14]  ;;  %vm1416_vm3 = vcmp.eq.s32.totalorder %v1406_v6, %v1403_v5  ;;  %v1454_v5 = vmov %v1890_v5  ;;  %v1423_v6 = vmov %v1892_v6 }
  0x2f   : > { %347 = vst [vmem:[%s1903_s16] sm:$0xff] %v1755_v11  ;;  %s341_s17 = smov [#allocation15]  ;;  %340 = vst [vmem:[%s338_s18] sm:$0xff] %v339_v9  ;;  %s348_s24 = smov %s1894_s24  ;;  %v1420_v5 = vmov %v1890_v5  ;;  %v1457_v6 = vmov %v1892_v6 }
  0x30   : > { %343 = vst [vmem:[%s341_s17] sm:$0xff] %v342_v10  ;;  %s361_s16 = smov %s1903_s16  ;;  %s307_s10 = scalar_lea.vmem [#allocation5], %s1888_s19  ;;  %v1437_v5 = vmov %v1890_v5  ;;  %v1440_v6 = vmov %v1892_v6  ;;  %vm1467_vm4 = vcmp.eq.s32.totalorder %v1457_v6, %v1454_v5 }
  0x31   : > { %s1407_s14 = smov [#allocation12]  ;;  %s1424_s26 = smov [#allocation13] }
  0x32   : > { %s1441_s29 = smov [#allocation14]  ;;  %s1458_s20 = smov [#allocation15] }
  0x33   : > { %v1413_v16 = vld [vmem:[%s1407_s14] sm:$0xff] }
  0x34   : > { %v355_v12 = vld [vmem:[%s348_s24] sm:$0xff]  ;;  %v1414_v18 = vsel %vm1411_vm2, %v1413_v16, 0.0 }
  0x35   : > { %v359_v13 = vsel %vm358_vm0, 1.0, %v355_v12  ;;  %v1430_v17 = vld [vmem:[%s1424_s26] sm:$0xff]  ;;  %v1415_v22 = vmul.f32 %v1414_v18, %v1414_v18 }
  0x36   : > { %v368_v14 = vld [vmem:[%s361_s16] sm:$0xff]  ;;  %360 = vst [vmem:[%s348_s24] sm:$0xff] %v359_v13  ;;  %v1431_v19 = vsel %vm1411_vm2, %v1430_v17, 0.0 }
  0x37   : > { %v372_v15 = vsel %vm371_vm1, 1.0, %v368_v14  ;;  %v1447_v20 = vld [vmem:[%s1441_s29] sm:$0xff]  ;;  %v1432_v23 = vmul.f32 %v1431_v19, %v1431_v19  ;;  %v1417_v29 = vsel %vm1416_vm3, 0.0, %v1415_v22 }
  0x38   : > { %373 = vst [vmem:[%s361_s16] sm:$0xff] %v372_v15  ;;  %v1464_v21 = vld [vmem:[%s1458_s20] sm:$0xff]  ;;  %v1448_v24 = vsel %vm1411_vm2, %v1447_v20, 0.0 }
  0x39   : > { %v1465_v25 = vsel %vm1411_vm2, %v1464_v21, 0.0  ;;  %v1449_v26 = vmul.f32 %v1448_v24, %v1448_v24  ;;  %v1434_v27 = vadd.f32 %v1432_v23, %v1415_v22  ;;  %v1433_v30 = vadd.f32 %v1432_v23, %v1417_v29 }
  0x3a   : > { %v1466_v28 = vmul.f32 %v1465_v25, %v1465_v25 }
  0x3b   : > { %v1451_v31 = vadd.f32 %v1449_v26, %v1434_v27  ;;  %v1450_v32 = vadd.f32 %v1449_v26, %v1433_v30 }
  0x3c   : > { %v1468_v33 = vsel %vm1467_vm4, 0.0, %v1466_v28 }
  0x3d   : > { %v1470_v34 = vadd.f32 %v1466_v28, %v1451_v31  ;;  %v1469_v35 = vadd.f32 %v1468_v33, %v1450_v32 }
  0x3f   : > { %1471 = vadd.xlane.f32.xlu0 %v1470_v34 }
  0x43   : > { %1479 = vadd.xlane.f32.xlu0 %v1469_v35 }
  0xcc   : > { %v1472_v36 = vpop.xlane.xlu0 %1471 }
  0xcd   : > { %v1473_v37 = vrot.slane %v1472_v36, 4 }
  0xcf   : > { %v1474_v38 = vadd.f32 %v1473_v37, %v1472_v36 }
  0xd0   : > { %v1480_v39 = vpop.xlane.xlu0 %1479 }
  0xd1   : > { %v1475_v40 = vrot.slane %v1474_v38, 2  ;;  %v1481_v41 = vrot.slane %v1480_v39, 4 }
  0xd3   : > { %v1482_v42 = vadd.f32 %v1481_v41, %v1480_v39  ;;  %v1476_v43 = vadd.f32 %v1475_v40, %v1474_v38 }
  0xd5   : > { %v1483_v44 = vrot.slane %v1482_v42, 2  ;;  %v1477_v46 = vrot.slane %v1476_v43, 1 }
  0xd7   : > { %v1484_v45 = vadd.f32 %v1483_v44, %v1482_v42  ;;  %v1478_v49 = vadd.f32 %v1477_v46, %v1476_v43 }
  0xd9   : > { %v1485_v47 = vrot.slane %v1484_v45, 1 }
  0xdb   : > { %v1486_v48 = vadd.f32 %v1485_v47, %v1484_v45 }
  0xdd   : > { %1592 = vpush %v1486_v48 }
  0xde   : > { %1594 = vpush %v1478_v49 }
 0x10e   : > { %s1593_s21 = spop %1592 }
 0x10f   : > { %s1595_s23 = spop %1594 }
 0x110   : > { %s1489_s25 = smul.f32 1e-10, %s1595_s23 }
 0x112   : > { %p1490_p10 = scmp.le.f32.partialorder %s1593_s21, %s1489_s25 }
 0x113   : > { %s1932_s27 = smov (!%p1490_p10), 0  }
 0x114   : > { %1493 = sbr.rel (%p1490_p10) target bundleno = 958 (0x3be), region = 499 }
 0x11b LB: >> { %s1937_s18 = smov 0   ;;  %s1749_s27 = sphi %s1932_s27, %s2181_s27  }
 0x11c LB: >>> { %s478_s17 = smov [#allocation12]  ;;  %v482_v5 = vmov %v1890_v5  ;;  %v485_v6 = vmov %v1892_v6  ;;  %s498_s14 = smov [#allocation13]  ;;  %vm801_vm14 = vcmp.eq.s32.totalorder %v1892_v6, 0  ;;  %vm813_vm15 = vcmp.eq.s32.totalorder %v1892_v6, 7  ;;  %s1753_s18 = sphi %s1937_s18, %s477_s18  }
 0x11d   : >>> { %v502_v5 = vmov %v1890_v5  ;;  %v505_v6 = vmov %v1892_v6  ;;  %v486_v50 = vld [vmem:[%s478_s17] sm:$0xff]  ;;  %vm489_vm5 = vcmp.eq.s32.totalorder %v485_v6, %v482_v5  ;;  %s518_s26 = smov [#allocation15]  ;;  %s479_s29 = smov [#allocation16] }
 0x11e   : >>> { %vm509_vm6 = vcmp.eq.s32.totalorder %v505_v6, %v502_v5  ;;  %v522_v5 = vmov %v1890_v5  ;;  %v525_v6 = vmov %v1892_v6  ;;  %v490_v51 = vsel %vm489_vm5, %v486_v50, 0.0  ;;  %v506_v52 = vld [vmem:[%s498_s14] sm:$0xff]  ;;  %s499_s20 = smov [#allocation17]  ;;  %s519_s21 = smov [#allocation18] }
 0x11f   : >>> { %vm529_vm7 = vcmp.eq.s32.totalorder %v525_v6, %v522_v5  ;;  %v491_v53 = vrot.slane %v490_v51, 4  ;;  %v510_v54 = vsel %vm509_vm6, %v506_v52, 0.0  ;;  %v526_v55 = vld [vmem:[%s518_s26] sm:$0xff]  ;;  %s542_s23 = smov [#allocation17]  ;;  %s540_s25 = smov [#allocation16]  ;;  %v591_v5 = vmov %v1890_v5 }
 0x120   : >>> { %v511_v56 = vrot.slane %v510_v54, 4  ;;  %v530_v57 = vsel %vm529_vm7, %v526_v55, 0.0  ;;  %s544_s17 = smov [#allocation18]  ;;  %s579_s14 = smov [#allocation19]  ;;  %v594_v6 = vmov %v1892_v6  ;;  %v606_v5 = vmov %v1890_v5 }
 0x121   : >>> { %v492_v58 = vadd.f32 %v491_v53, %v490_v51  ;;  %v531_v59 = vrot.slane %v530_v57, 4  ;;  %s581_s26 = smov [#allocation20]  ;;  %v609_v6 = vmov %v1892_v6  ;;  %vm596_vm12 = vcmp.eq.s32.totalorder %v594_v6, %v591_v5  ;;  %s1959_s24 = smov %s1894_s24 }
 0x122   : >>> { %v512_v60 = vadd.f32 %v511_v56, %v510_v54  ;;  %vm611_vm13 = vcmp.eq.s32.totalorder %v609_v6, %v606_v5  ;;  %s1962_s30 = smov %s1897_s30  ;;  %s1965_s28 = smov %s1900_s28  ;;  %v849_v52 = vld [vmem:[%s1959_s24] sm:$0xff]  ;;  %v704_v5 = vmov %v1890_v5  ;;  %v707_v6 = vmov %v1892_v6 }
 0x123   : >>> { %v493_v61 = vrot.slane %v492_v58, 2  ;;  %v532_v62 = vadd.f32 %v531_v59, %v530_v57  ;;  %s1969_s16 = smov %s1903_s16  ;;  %v850_v53 = vld [vmem:[%s1962_s30] sm:$0xff]  ;;  %s843_s9 = smov [#allocation24]  ;;  %v677_v5 = vmov %v1890_v5  ;;  %v680_v6 = vmov %v1892_v6 }
 0x124   : >>> { %v513_v63 = vrot.slane %v512_v60, 2  ;;  %v851_v56 = vld [vmem:[%s1965_s28] sm:$0xff]  ;;  %v718_v5 = vmov %v1890_v5  ;;  %v721_v6 = vmov %v1892_v6  ;;  %vm711_vm0 = vcmp.eq.s32.totalorder %v707_v6, %v704_v5  ;;  %s477_s18 = sadd.s32 1, %s1753_s18  }
 0x125   : >>> { %v494_v0 = vadd.f32 %v493_v61, %v492_v58  ;;  %v533_v1 = vrot.slane %v532_v62, 2  ;;  %v852_v57 = vld [vmem:[%s1969_s16] sm:$0xff]  ;;  %v691_v5 = vmov %v1890_v5  ;;  %v694_v6 = vmov %v1892_v6  ;;  %p474_p11 = scmp.ge.s32.totalorder %s477_s18, 15  }
 0x126   : >>> { %v514_v2 = vadd.f32 %v513_v63, %v512_v60  ;;  %vm685_vm1 = vcmp.eq.s32.totalorder %v680_v6, %v677_v5  ;;  %vm726_vm3 = vcmp.eq.s32.totalorder %v721_v6, %v718_v5  ;;  %vm698_vm4 = vcmp.eq.s32.totalorder %v694_v6, %v691_v5 }
 0x127   : >>> { %v495_v3 = vrot.slane %v494_v0, 1  ;;  %v534_v4 = vadd.f32 %v533_v1, %v532_v62  ;;  %vm740_vm5 = vcmp.eq.s32.totalorder %v1890_v5, 0  ;;  %vm744_vm6 = vcmp.eq.s32.totalorder %v1890_v5, 1 }
 0x128   : >>> { %v515_v7 = vrot.slane %v514_v2, 1  ;;  %vm757_vm7 = vcmp.eq.s32.totalorder %v1890_v5, 7  ;;  %v378_v5 = vmov (%p474_p11), %v1890_v5  ;;  %v381_v6 = vmov (%p474_p11), %v1892_v6 }
 0x129   : >>> { %v496_v8 = vadd.f32 %v495_v3, %v494_v0  ;;  %v535_v9 = vrot.slane %v534_v4, 1  ;;  %v431_v5 = vmov (%p474_p11), %v1890_v5 }
 0x12a   : >>> { %v516_v10 = vadd.f32 %v515_v7, %v514_v2 }
 0x12b   : >>> { %497 = vst [vmem:[%s479_s29] sm:$0x1] %v496_v8  ;;  %v536_v11 = vadd.f32 %v535_v9, %v534_v4  ;;  %s538_s29 = smov [#allocation21] }
 0x12c   : >>> { %517 = vst [vmem:[%s499_s20] sm:$0x1] %v516_v10  ;;  %s539_s20 = smov [#allocation22]  ;;  %s583_s29 = smov %s538_s29 }
 0x12d   : >>> { %537 = vst [vmem:[%s519_s21] sm:$0x1] %v536_v11  ;;  %s585_s20 = smov %s539_s20  ;;  %s587_s21 = smov [#allocation21] }
 0x132   : >>> { %v541_v14 = vld [vmem:[%s540_s25] sm:$0xff]  ;;  %s600_s25 = smov [#allocation23] }
 0x133   : >>> { %v543_v12 = vld [vmem:[%s542_s23] sm:$0xff]  ;;  %v564_v27 = vand.u32 2147483647, %v541_v14  ;;  %s602_s23 = smov [#allocation22] }
 0x134   : >>> { %v547_v13 = vmul.f32 2.0, %v543_v12  ;;  %v545_v15 = vld [vmem:[%s544_s17] sm:$0xff]  ;;  %v565_v32 = vand.u32 2147483647, %v543_v12  ;;  %s617_s17 = smov [#allocation23] }
 0x135   : >>> { %v546_v16 = vsub.f32 %v545_v15, %v541_v14  ;;  %v566_v28 = vand.u32 2147483647, %v545_v15 }
 0x136   : >>> { %1675 = vrcp.f32 %v547_v13 }
 0x137   : >>> { %v567_v31 = vmin.f32 %v564_v27, %v566_v28 }
 0x139   : >>> { %v568_v33 = vmul.f32 1.1920929e-08, %v567_v31 }
 0x13b   : >>> { %vm569_vm11 = vcmp.le.f32.partialorder %v565_v32, %v568_v33 }
 0x140   : >>> { %v1676_v17 = vpop.eup %1675 }
 0x141   : >>> { %v549_v18 = vmul.f32 %v1676_v17, %v546_v16 }
 0x143   : >>> { %v551_v19 = vmul.f32 %v549_v18, %v549_v18  ;;  %vm550_vm10 = vcmp.ge.f32.partialorder %v549_v18, 0.0 }
 0x145   : >>> { %v552_v20 = vadd.f32 1.0, %v551_v19 }
 0x147   : >>> { %1677 = vrsqrt.f32 %v552_v20  ;;  %vm555_vm8 = vcmp.eq.f32.partialorder %v552_v20, inf  ;;  %v558_v22 = vand.u32 2147483648, %v552_v20  ;;  %vm557_vm9 = vcmp.eq.f32.partialorder %v552_v20, 0.0 }
 0x151   : >>> { %v1678_v21 = vpop.eup %1677 }
 0x152   : >>> { %v554_v23 = vmul.f32 %v1678_v21, %v552_v20 }
 0x154   : >>> { %v556_v24 = vsel %vm555_vm8, %v552_v20, %v554_v23  ;;  %vm393_vm8 = vcmp.eq.s32.totalorder (%p474_p11), %v381_v6, %v378_v5  ;;  %v434_v6 = vmov (%p474_p11), %v1892_v6  ;;  %v397_v5 = vmov (%p474_p11), %v1890_v5 }
 0x155   : >>> { %v559_v25 = vsel %vm557_vm9, %v558_v22, %v556_v24  ;;  %v400_v6 = vmov (%p474_p11), %v1892_v6  ;;  %v414_v5 = vmov (%p474_p11), %v1890_v5  ;;  %vm446_vm9 = vcmp.eq.s32.totalorder (%p474_p11), %v434_v6, %v431_v5 }
 0x156   : >>> { %v560_v26 = vxor.u32 2147483648, %v559_v25  ;;  %v417_v6 = vmov (%p474_p11), %v1892_v6 }
 0x158   : >>> { %v561_v29 = vsel %vm550_vm10, %v559_v25, %v560_v26 }
 0x159   : >>> { %v562_v30 = vadd.f32 %v561_v29, %v549_v18 }
 0x15b   : >>> { %1679 = vrcp.f32 %v562_v30 }
 0x165   : >>> { %v1680_v34 = vpop.eup %1679 }
 0x166   : >>> { %v570_v35 = vsel %vm569_vm11, 0.0, %v1680_v34 }
 0x167   : >>> { %v571_v36 = vmul.f32 %v570_v35, %v570_v35  ;;  %v575_v37 = vmul.f32 %v570_v35, %v543_v12 }
 0x169   : >>> { %v572_v38 = vadd.f32 1.0, %v571_v36  ;;  %v576_v39 = vsub.f32 %v541_v14, %v575_v37  ;;  %v578_v40 = vadd.f32 %v575_v37, %v545_v15 }
 0x16b   : >>> { %1681 = vrsqrt.f32 %v572_v38  ;;  %580 = vst [vmem:[%s579_s14] sm:$0xff] %v576_v39  ;;  %582 = vst [vmem:[%s581_s26] sm:$0xff] %v578_v40  ;;  %s1952_s14 = smov [#allocation12]  ;;  %s615_s26 = smov [#allocation24] }
 0x16c   : >>> { %v625_v49 = vld [vmem:[%s1952_s14] sm:$0xff] }
 0x175   : >>> { %v1682_v41 = vpop.eup %1681 }
 0x176   : >>> { %584 = vst [vmem:[%s583_s29] sm:$0xff] %v1682_v41  ;;  %v574_v42 = vmul.f32 %v1682_v41, %v570_v35  ;;  %s1954_s29 = smov [#allocation13] }
 0x177   : >>> { %v626_v50 = vld [vmem:[%s1954_s29] sm:$0xff] }
 0x178   : >>> { %586 = vst [vmem:[%s585_s20] sm:$0xff] %v574_v42  ;;  %s1956_s20 = smov [#allocation15] }
 0x179   : >>> { %v628_v51 = vld [vmem:[%s1956_s20] sm:$0xff] }
 0x17d   : >>> { %v588_v43 = vld [vmem:[%s587_s21] ss:$0 sm:$0xff]  ;;  %s841_s21 = smov [#allocation23] }
 0x17e   : >>> { %v597_v44 = vsel %vm596_vm12, %v588_v43, 0.0 }
 0x17f   : >>> { %598 = vadd.xlane.f32.xlu0 %v597_v44  ;;  %v603_v45 = vld [vmem:[%s602_s23] ss:$0 sm:$0xff]  ;;  %s1971_s23 = smov [#allocation14] }
 0x180   : >>> { %v612_v46 = vsel %vm611_vm13, %v603_v45, 0.0  ;;  %v627_v58 = vld [vmem:[%s1971_s23] sm:$0xff] }
 0x183   : >>> { %613 = vadd.xlane.f32.xlu0 %v612_v46 }
 0x20c   : >>> { %v599_v47 = vpop.xlane.xlu0 %598 }
 0x20d   : >>> { %601 = vst [vmem:[%s600_s25] sm:$0xff] %v599_v47  ;;  %s619_s25 = smov [#allocation24] }
 0x210   : >>> { %v614_v48 = vpop.xlane.xlu0 %613 }
 0x211   : >>> { %616 = vst [vmem:[%s615_s26] sm:$0xff] %v614_v48  ;;  %s1998_s26 = smov [#allocation14] }
 0x214   : >>> { %v618_v54 = vld [vmem:[%s617_s17] sm:$0xff]  ;;  %s647_s17 = smov [#allocation22] }
 0x215   : >>> { %v842_v55 = vld [vmem:[%s841_s21] sm:$0xff]  ;;  %v629_v59 = vmul.f32 %v625_v49, %v618_v54  ;;  %v632_v60 = vmul.f32 %v626_v50, %v618_v54  ;;  %v639_v61 = vmul.f32 %v628_v51, %v618_v54  ;;  %v636_v4 = vmul.f32 %v627_v58, %v618_v54  ;;  %s674_s21 = smov [#allocation19] }
 0x216   : >>> { %v853_v62 = vmul.f32 %v849_v52, %v842_v55  ;;  %v856_v63 = vmul.f32 %v850_v53, %v842_v55  ;;  %v860_v0 = vmul.f32 %v851_v56, %v842_v55  ;;  %v863_v1 = vmul.f32 %v852_v57, %v842_v55  ;;  %v648_v24 = vld [vmem:[%s647_s17] ss:$0 sm:$0xff]  ;;  %s714_s17 = smov [#allocation15] }
 0x217   : >>> { %v681_v55 = vld [vmem:[%s674_s21] ss:$0 sm:$0xff]  ;;  %s730_s21 = smov [#allocation13] }
 0x218   : >>> { %v620_v2 = vld [vmem:[%s619_s25] sm:$0xff]  ;;  %s701_s25 = smov [#allocation14] }
 0x219   : >>> { %v844_v3 = vld [vmem:[%s843_s9] sm:$0xff]  ;;  %v633_v7 = vmul.f32 %v628_v51, %v620_v2  ;;  %v635_v8 = vmul.f32 %v625_v49, %v620_v2  ;;  %v638_v9 = vmul.f32 %v626_v50, %v620_v2  ;;  %v630_v14 = vmul.f32 %v627_v58, %v620_v2  ;;  %s645_s9 = smov [#allocation21] }
 0x21a   : >>> { %v854_v10 = vmul.f32 %v851_v56, %v844_v3  ;;  %v857_v11 = vmul.f32 %v852_v57, %v844_v3  ;;  %v859_v12 = vmul.f32 %v849_v52, %v844_v3  ;;  %v862_v13 = vmul.f32 %v850_v53, %v844_v3  ;;  %v646_v23 = vld [vmem:[%s645_s9] ss:$0 sm:$0xff]  ;;  %s673_s9 = smov [#allocation12] }
 0x21b   : >>> { %v634_v15 = vsub.f32 %v632_v60, %v633_v7  ;;  %v640_v16 = vadd.f32 %v639_v61, %v638_v9  ;;  %v637_v18 = vadd.f32 %v636_v4, %v635_v8  ;;  %v631_v22 = vsub.f32 %v629_v59, %v630_v14 }
 0x21c   : >>> { %v855_v17 = vsub.f32 %v853_v62, %v854_v10  ;;  %v858_v19 = vsub.f32 %v856_v63, %v857_v11  ;;  %v861_v20 = vadd.f32 %v860_v0, %v859_v12  ;;  %v864_v21 = vadd.f32 %v863_v1, %v862_v13 }
 0x21d   : >>> { %642 = vst [vmem:[%s1954_s29] sm:$0xff] %v634_v15  ;;  %644 = vst [vmem:[%s1956_s20] sm:$0xff] %v640_v16  ;;  %s2000_s29 = smov [#allocation15]  ;;  %s2004_s20 = smov [#allocation13] }
 0x21e   : >>> { %865 = vst [vmem:[%s1959_s24] sm:$0xff] %v855_v17  ;;  %643 = vst [vmem:[%s1971_s23] sm:$0xff] %v637_v18  ;;  %s869_s24 = smov %s1894_s24  ;;  %s715_s23 = smov [#allocation20] }
 0x21f   : >>> { %866 = vst [vmem:[%s1962_s30] sm:$0xff] %v858_v19  ;;  %867 = vst [vmem:[%s1965_s28] sm:$0xff] %v861_v20  ;;  %s870_s28 = smov %s1900_s28  ;;  %s1991_s30 = smov %s1897_s30  ;;  %v722_v56 = vld [vmem:[%s715_s23] ss:$0 sm:$0xff] }
 0x220   : >>> { %868 = vst [vmem:[%s1969_s16] sm:$0xff] %v864_v21  ;;  %641 = vst [vmem:[%s1952_s14] sm:$0xff] %v631_v22  ;;  %s1994_s16 = smov %s1903_s16  ;;  %s2002_s14 = smov [#allocation12] }
 0x221   : >>> { %s1757_s23 = smov 127  }
 0x224   : >>> { %v656_v39 = vld [vmem:[%s2000_s29] sm:$0xff] }
 0x225   : >>> { %v871_v25 = vld [vmem:[%s869_s24] ss:$0 sm:$0xff]  ;;  %v1567_v27 = vld [vmem:[%s869_s24 + $0x7] ss:$0 sm:$0xff]  ;;  %v664_v42 = vmul.f32 %v656_v39, %v648_v24  ;;  %v667_v46 = vmul.f32 %v656_v39, %v646_v23 }
 0x226   : >>> { %v1566_v26 = vld [vmem:[%s869_s24 - $0x1] sm:$0xfe]  ;;  %v1571_v34 = vld [vmem:[%s1991_s30 + $0x7] ss:$0 sm:$0xff] }
 0x227   : >>> { %v878_v28 = vsel %vm801_vm14, %v871_v25, %v1566_v26  ;;  %v882_v29 = vld [vmem:[%s870_s28] ss:$0 sm:$0xff]  ;;  %v1569_v30 = vld [vmem:[%s870_s28 + $0x1] sm:$0x7f] }
 0x228   : >>> { %v895_v31 = vld [vmem:[%s1991_s30] ss:$0 sm:$0xff]  ;;  %881 = vst [vmem:[%s869_s24] sm:$0xff] %v878_v28  ;;  %v890_v32 = vsel %vm813_vm15, %v1567_v27, %v1569_v30  ;;  %v1573_v37 = vld [vmem:[%s1994_s16 + $0x1] sm:$0x7f] }
 0x229   : >>> { %v1570_v33 = vld [vmem:[%s1991_s30 - $0x1] sm:$0xfe]  ;;  %1568 = vst [vmem:[%s869_s24 + $0x1] sm:$0x1] %v882_v29  ;;  %892 = vst [vmem:[%s870_s28] sm:$0xff] %v890_v32  ;;  %v914_v40 = vsel %vm813_vm15, %v1571_v34, %v1573_v37 }
 0x22a   : >>> { %v906_v35 = vld [vmem:[%s1994_s16] ss:$0 sm:$0xff]  ;;  %v902_v36 = vsel %vm801_vm14, %v895_v31, %v1570_v33 }
 0x22b   : >>> { %v655_v38 = vld [vmem:[%s1998_s26] sm:$0xff]  ;;  %905 = vst [vmem:[%s1991_s30] sm:$0xff] %v902_v36  ;;  %916 = vst [vmem:[%s1994_s16] sm:$0xff] %v914_v40 }
 0x22c   : >>> { %v663_v41 = vmul.f32 %v655_v38, %v646_v23  ;;  %v666_v43 = vmul.f32 %v655_v38, %v648_v24  ;;  %v653_v44 = vld [vmem:[%s2002_s14] sm:$0xff]  ;;  %1572 = vst [vmem:[%s1991_s30 + $0x1] sm:$0x1] %v906_v35 }
 0x22d   : >>> { %v654_v45 = vld [vmem:[%s2004_s20] sm:$0xff]  ;;  %v657_v47 = vmul.f32 %v653_v44, %v646_v23  ;;  %v660_v49 = vmul.f32 %v653_v44, %v648_v24 }
 0x22e   : >>> { %v658_v48 = vmul.f32 %v654_v45, %v648_v24  ;;  %v665_v50 = vsub.f32 %v663_v41, %v664_v42  ;;  %v661_v51 = vmul.f32 %v654_v45, %v646_v23  ;;  %v668_v52 = vadd.f32 %v667_v46, %v666_v43 }
 0x230   : >>> { %v659_v53 = vsub.f32 %v657_v47, %v658_v48  ;;  %671 = vst [vmem:[%s1998_s26] sm:$0xff] %v665_v50  ;;  %v662_v54 = vadd.f32 %v661_v51, %v660_v49  ;;  %672 = vst [vmem:[%s2000_s29] sm:$0xff] %v668_v52  ;;  %s688_s26 = smov [#allocation13]  ;;  %s2038_s29 = smov [#allocation14] }
 0x232   : >>> { %669 = vst [vmem:[%s2002_s14] sm:$0xff] %v659_v53  ;;  %670 = vst [vmem:[%s2004_s20] sm:$0xff] %v662_v54  ;;  %s729_s14 = smov [#allocation12]  ;;  %s1756_s20 = smov 1  }
 0x237   : >>> { %v708_v57 = vld [vmem:[%s701_s25] sm:$0xff] }
 0x238   : >>> { %v712_v58 = vsel %vm711_vm0, 0.0, %v708_v57  ;;  %v723_v60 = vld [vmem:[%s714_s17] sm:$0xff] }
 0x239   : >>> { %v682_v59 = vld [vmem:[%s673_s9] sm:$0xff]  ;;  %713 = vst [vmem:[%s701_s25] sm:$0xff] %v712_v58  ;;  %v727_v63 = vsel %vm726_vm3, %v722_v56, %v723_v60  ;;  %s2041_s25 = smov [#allocation15] }
 0x23a   : >>> { %v686_v61 = vsel %vm685_vm1, %v681_v55, %v682_v59  ;;  %v695_v62 = vld [vmem:[%s688_s26] sm:$0xff]  ;;  %728 = vst [vmem:[%s714_s17] sm:$0xff] %v727_v63  ;;  %s817_s17 = smov [#allocation13] }
 0x23b   : >>> { %687 = vst [vmem:[%s673_s9] sm:$0xff] %v686_v61  ;;  %v699_v0 = vsel %vm698_vm4, 0.0, %v695_v62  ;;  %s793_s9 = smov [#allocation12] }
 0x23c   : >>> { %700 = vst [vmem:[%s688_s26] sm:$0xff] %v699_v0  ;;  %s794_s26 = smov [#allocation14] }
 0x240   : >>> { %v767_v1 = vld [vmem:[%s2038_s29] sm:$0xff] }
 0x241   : >>> { %768 = vrot.lane.b32.xlu0 %v767_v1, %s1756_s20  ;;  %v763_v4 = vld [vmem:[%s2041_s25] sm:$0xff] }
 0x242   : >>> { %v735_v2 = vld [vmem:[%s729_s14] sm:$0xff] }
 0x243   : >>> { %736 = vrot.lane.b32.xlu1 %v735_v2, %s1756_s20  ;;  %v731_v3 = vld [vmem:[%s730_s21] sm:$0xff] }
 0x247   : >>> { %732 = vrot.lane.b32.xlu1 %v731_v3, %s1756_s20 }
 0x24b   : >>> { %753 = vrot.lane.b32.xlu1 %v731_v3, %s1757_s23 }
 0x24f   : >>> { %764 = vrot.lane.b32.xlu1 %v763_v4, %s1756_s20  ;;  %s382_s20 = smov (%p474_p11), [#allocation12] }
 0x253   : >>> { %785 = vrot.lane.b32.xlu1 %v763_v4, %s1757_s23  ;;  %s418_s23 = smov (%p474_p11), [#allocation14] }
 0x2b3   : >>> { %v769_v13 = vpop.permute.xlu0 %768 }
 0x2b4   : >>> { %v773_v15 = vsel %vm740_vm5, %v767_v1, %v769_v13 }
 0x2b5   : >>> { %v737_v7 = vpop.permute.xlu1 %736 }
 0x2b6   : >>> { %v741_v8 = vsel %vm740_vm5, %v735_v2, %v737_v7 }
 0x2b9   : >>> { %v733_v9 = vpop.permute.xlu1 %732 }
 0x2ba   : >>> { %v745_v10 = vsel %vm744_vm6, %v733_v9, %v741_v8 }
 0x2bb   : >>> { %v751_v11 = vsel %vm1411_vm2, %v745_v10, 0.0 }
 0x2bc   : >>> { %759 = vst [vmem:[%s729_s14] sm:$0xff] %v751_v11  ;;  %s818_s14 = smov [#allocation15] }
 0x2bd   : >>> { %v754_v12 = vpop.permute.xlu1 %753 }
 0x2be   : >>> { %v758_v14 = vsel %vm757_vm7, %v735_v2, %v754_v12 }
 0x2bf   : >>> { %760 = vst [vmem:[%s730_s21] sm:$0xff] %v758_v14  ;;  %s401_s21 = smov (%p474_p11), [#allocation13] }
 0x2c1   : >>> { %v765_v16 = vpop.permute.xlu1 %764 }
 0x2c2   : >>> { %v777_v17 = vsel %vm744_vm6, %v765_v16, %v773_v15 }
 0x2c3   : >>> { %v795_v18 = vld [vmem:[%s793_s9] ss:$0 sm:$0xff]  ;;  %v1559_v20 = vld [vmem:[%s793_s9 + $0x7] ss:$0 sm:$0xff]  ;;  %v783_v22 = vsel %vm1411_vm2, %v777_v17, 0.0 }
 0x2c4   : >>> { %v1558_v19 = vld [vmem:[%s793_s9 - $0x1] sm:$0xfe]  ;;  %791 = vst [vmem:[%s2038_s29] sm:$0xff] %v783_v22  ;;  %s917_s29 = sadd.s32 (%p474_p11), 1, %s1749_s27  }
 0x2c5   : >>> { %v802_v21 = vsel %vm801_vm14, %v795_v18, %v1558_v19  ;;  %v786_v23 = vpop.permute.xlu1 %785  ;;  %p470_p12 = scmp.ge.s32.totalorder (%p474_p11), %s917_s29, 15  ;;  %s2181_s27 = smov (%p474_p11), %s917_s29 }
 0x2c6   : >>> { %805 = vst [vmem:[%s793_s9] sm:$0xff] %v802_v21  ;;  %v819_v24 = vld [vmem:[%s817_s17] ss:$0 sm:$0xff]  ;;  %v1563_v26 = vld [vmem:[%s817_s17 + $0x7] ss:$0 sm:$0xff]  ;;  %v790_v27 = vsel %vm757_vm7, %v767_v1, %v786_v23 }
 0x2c7   : >>> { %v1562_v25 = vld [vmem:[%s817_s17 - $0x1] sm:$0xfe]  ;;  %792 = vst [vmem:[%s2041_s25] sm:$0xff] %v790_v27  ;;  %s435_s25 = smov (%p474_p11), [#allocation15] }
 0x2c8   : >>> { %v826_v28 = vsel %vm801_vm14, %v819_v24, %v1562_v25 }
 0x2c9   : >>> { %829 = vst [vmem:[%s817_s17] sm:$0xff] %v826_v28 }
 0x2cb   : >>> { %v806_v29 = vld [vmem:[%s794_s26] ss:$0 sm:$0xff]  ;;  %v1561_v30 = vld [vmem:[%s794_s26 + $0x1] sm:$0x7f] }
 0x2cc   : >>> { %1560 = vst [vmem:[%s793_s9 + $0x1] sm:$0x1] %v806_v29  ;;  %v814_v31 = vsel %vm813_vm15, %v1559_v20, %v1561_v30  ;;  %476 = sbr.rel (!%p474_p11) target bundleno = 284 (0x11c), region = 494 }
 0x2cd   : >>> { %816 = vst [vmem:[%s794_s26] sm:$0xff] %v814_v31 }
 0x2ce   : >>> { %v830_v32 = vld [vmem:[%s818_s14] ss:$0 sm:$0xff]  ;;  %v1565_v33 = vld [vmem:[%s818_s14 + $0x1] sm:$0x7f] }
 0x2cf   : >>> { %1564 = vst [vmem:[%s817_s17 + $0x1] sm:$0x1] %v830_v32  ;;  %v838_v34 = vsel %vm813_vm15, %v1563_v26, %v1565_v33 }
 0x2d0   : >>> { %840 = vst [vmem:[%s818_s14] sm:$0xff] %v838_v34 }
 0x2d3   : >> { %v388_v35 = vld [vmem:[%s382_s20] sm:$0xff] }
 0x2d4   : >> { %v389_v37 = vsel %vm1411_vm2, %v388_v35, 0.0  ;;  %v424_v39 = vld [vmem:[%s418_s23] sm:$0xff] }
 0x2d5   : >> { %v390_v41 = vmul.f32 %v389_v37, %v389_v37  ;;  %v425_v43 = vsel %vm1411_vm2, %v424_v39, 0.0 }
 0x2d6   : >> { %v407_v36 = vld [vmem:[%s401_s21] sm:$0xff]  ;;  %v426_v45 = vmul.f32 %v425_v43, %v425_v43 }
 0x2d7   : >> { %v408_v38 = vsel %vm1411_vm2, %v407_v36, 0.0  ;;  %v441_v40 = vld [vmem:[%s435_s25] sm:$0xff]  ;;  %v394_v48 = vsel %vm393_vm8, 0.0, %v390_v41 }
 0x2d8   : >> { %v409_v42 = vmul.f32 %v408_v38, %v408_v38  ;;  %v442_v44 = vsel %vm1411_vm2, %v441_v40, 0.0 }
 0x2d9   : >> { %v443_v47 = vmul.f32 %v442_v44, %v442_v44 }
 0x2da   : >> { %v411_v46 = vadd.f32 %v409_v42, %v390_v41  ;;  %v410_v49 = vadd.f32 %v409_v42, %v394_v48 }
 0x2db   : >> { %v447_v52 = vsel %vm446_vm9, 0.0, %v443_v47 }
 0x2dc   : >> { %v428_v50 = vadd.f32 %v426_v45, %v411_v46  ;;  %v427_v51 = vadd.f32 %v426_v45, %v410_v49 }
 0x2de   : >> { %v449_v53 = vadd.f32 %v443_v47, %v428_v50  ;;  %v448_v54 = vadd.f32 %v447_v52, %v427_v51 }
 0x2e0   : >> { %450 = vadd.xlane.f32.xlu0 %v449_v53 }
 0x2e4   : >> { %458 = vadd.xlane.f32.xlu0 %v448_v54 }
 0x36d   : >> { %v451_v55 = vpop.xlane.xlu0 %450 }
 0x36e   : >> { %v452_v56 = vrot.slane %v451_v55, 4 }
 0x370   : >> { %v453_v57 = vadd.f32 %v452_v56, %v451_v55 }
 0x371   : >> { %v459_v58 = vpop.xlane.xlu0 %458 }
 0x372   : >> { %v454_v59 = vrot.slane %v453_v57, 2  ;;  %v460_v60 = vrot.slane %v459_v58, 4 }
 0x374   : >> { %v461_v61 = vadd.f32 %v460_v60, %v459_v58  ;;  %v455_v62 = vadd.f32 %v454_v59, %v453_v57 }
 0x376   : >> { %v462_v63 = vrot.slane %v461_v61, 2  ;;  %v456_v1 = vrot.slane %v455_v62, 1 }
 0x378   : >> { %v463_v0 = vadd.f32 %v462_v63, %v461_v61  ;;  %v457_v4 = vadd.f32 %v456_v1, %v455_v62 }
 0x37a   : >> { %v464_v2 = vrot.slane %v463_v0, 1 }
 0x37c   : >> { %v465_v3 = vadd.f32 %v464_v2, %v463_v0 }
 0x37e   : >> { %1596 = vpush %v465_v3 }
 0x37f   : >> { %1598 = vpush %v457_v4 }
 0x3af   : >> { %s1597_s18 = spop %1596 }
 0x3b0   : >> { %s1599_s9 = spop %1598 }
 0x3b1   : >> { %s468_s17 = smul.f32 1e-10, %s1599_s9 }
 0x3b3   : >> { %p469_p13 = scmp.le.f32.partialorder %s1597_s18, %s468_s17 }
 0x3b5   : >> { %p471_p0 = por %p470_p12, %p469_p13 }
 0x3b7   : > { %919 = sbr.rel (!%p471_p0) target bundleno = 283 (0x11b), region = 505 }
 0x3be PF: > { %s924_s26 = smov [#allocation12]  ;;  %v928_v5 = vmov %v1890_v5  ;;  %v931_v6 = vmov %v1892_v6  ;;  %s944_s14 = smov [#allocation15] }
 0x3bf   : > { %v948_v5 = vmov %v1890_v5  ;;  %v951_v6 = vmov %v1892_v6  ;;  %v932_v7 = vld [vmem:[%s924_s26] sm:$0xff]  ;;  %vm935_vm10 = vcmp.eq.s32.totalorder %v931_v6, %v928_v5  ;;  %s920_s27 = sand.u32 7, %s1729_s11   ;;  %s2182_s21 = scalar_lea.vmem [#allocation7], %s1888_s19 }
 0x3c0   : > { %vm955_vm11 = vcmp.eq.s32.totalorder %v951_v6, %v948_v5  ;;  %v936_v8 = vsel %vm935_vm10, %v932_v7, 0.0  ;;  %v952_v10 = vld [vmem:[%s944_s14] sm:$0xff]  ;;  %s921_s29 = scalar_lea.vmem [#allocation4], %s920_s27  ;;  %s923_s20 = scalar_lea.vmem [#allocation6], %s920_s27 }
 0x3c1   : > { %v937_v9 = vrot.slane %v936_v8, 4  ;;  %v956_v11 = vsel %vm955_vm11, %v952_v10, 0.0  ;;  %s925_s29 = smov %s921_s29  ;;  %s945_s20 = smov %s923_s20 }
 0x3c2   : > { %v957_v13 = vrot.slane %v956_v11, 4  ;;  %s1003_s23 = sshrl.u32 (%p1857_p4), %s1729_s11, 3 }
 0x3c3   : > { %v938_v12 = vadd.f32 %v937_v9, %v936_v8  ;;  %s1004_s25 = sadd.s32 (%p1857_p4), %s1733_s12, %s1003_s23 }
 0x3c4   : > { %v958_v15 = vadd.f32 %v957_v13, %v956_v11  ;;  %s1580_s18 = sshll.u32 (%p1857_p4), %s1004_s25, 1 }
 0x3c5   : > { %v939_v14 = vrot.slane %v938_v12, 2  ;;  %s1006_s26 = scalar_lea.vmem (%p1857_p4), %s2162_s4, %s1580_s18 }
 0x3c6   : > { %v959_v17 = vrot.slane %v958_v15, 2 }
 0x3c7   : > { %v940_v16 = vadd.f32 %v939_v14, %v938_v12 }
 0x3c8   : > { %v960_v19 = vadd.f32 %v959_v17, %v958_v15 }
 0x3c9   : > { %v941_v18 = vrot.slane %v940_v16, 1 }
 0x3ca   : > { %v961_v5 = vrot.slane %v960_v19, 1 }
 0x3cb   : > { %v942_v20 = vadd.f32 %v941_v18, %v940_v16 }
 0x3cc   : > { %v962_v6 = vadd.f32 %v961_v5, %v960_v19 }
 0x3cd   : > { %943 = vst [vmem:[%s925_s29] sm:$0x1] %v942_v20 }
 0x3ce   : > { %963 = vst [vmem:[%s945_s20] sm:$0x1] %v962_v6 }
 0x3d0   : > { %1002 = sbr.rel (!%p1857_p4) target bundleno = 990 (0x3de), region = 174 }
 0x3d4   : > { %v967_v21 = vld [vmem:[#allocation4] sm:$0x3] }
 0x3d5   : > { %969 = vst [vmem:[%s307_s10] sm:$0x3] %v967_v21  ;;  %v973_v22 = vld [vmem:[#allocation6] sm:$0x3] }
 0x3d6   : > { %975 = vst [vmem:[%s2182_s21] sm:$0x3] %v973_v22 }
 0x3dc   : > { %v1022_v23 = vld [vmem:[%s307_s10] sm:$0x3] }
 0x3dd   : > { %1023 = vst [vmem:[%s1006_s26] sm:$0x3] %v1022_v23 }
 0x3de PF: > { %1040 = sbr.rel (!%p1857_p4) target bundleno = 998 (0x3e6), region = 208  ;;  %s1041_s14 = sshrl.u32 (%p1857_p4), %s1729_s11, 3 }
 0x3df   : > { %s1042_s27 = sadd.s32 (%p1857_p4), %s1733_s12, %s1041_s14  ;;  %s2183_s29 = scalar_lea.vmem (%p1857_p4), [#allocation7], %s1888_s19 }
 0x3e0   : > { %s1581_s20 = sshll.u32 (%p1857_p4), %s1042_s27, 1 }
 0x3e1   : > { %s1044_s23 = scalar_lea.vmem (%p1857_p4), %s2163_s5, %s1581_s20 }
 0x3e4   : > { %v1060_v24 = vld [vmem:[%s2183_s29] sm:$0x3] (%p1857_p4) }
 0x3e5   : > { %1061 = vst [vmem:[%s1044_s23] sm:$0x3] %v1060_v24 }
 0x3e6 PF: > { %s1582_s22 = sshll.u32 %s1733_s12, 1  ;;  %v1107_v25 = vld [vmem:[%s1894_s24] sm:$0xff]  ;;  %v1143_v26 = vld [vmem:[%s1897_s30] sm:$0xff]  ;;  %s2184_s30 = sld [smem:[#allocation30_spill]] }
 0x3e7   : > { %s1077_s25 = sadd.s32 %s1729_s11, %s1582_s22  ;;  %v1179_v27 = vld [vmem:[%s1900_s28] sm:$0xff]  ;;  %v1215_v28 = vld [vmem:[%s1903_s16] sm:$0xff] }
 0x3e8   : > { %s1583_s18 = sshll.u32 %s1077_s25, 3 }
 0x3e9   : > { %s1079_s17 = scalar_lea.vmem %s2164_s6, %s1583_s18  ;;  %s1115_s27 = scalar_lea.vmem %s2165_s7, %s1583_s18 }
 0x3ea   : > { %1108 = vst [vmem:[%s1079_s17] sm:$0xff] %v1107_v25  ;;  %1144 = vst [vmem:[%s1115_s27] sm:$0xff] %v1143_v26  ;;  %s1151_s12 = scalar_lea.vmem %s2166_s8, %s1583_s18 }
 0x3eb   : > { %1180 = vst [vmem:[%s1151_s12] sm:$0xff] %v1179_v27 }
 0x3ec   : > { %s1187_s21 = scalar_lea.vmem %s2184_s30, %s1583_s18 }
 0x3ed   : > { %1216 = vst [vmem:[%s1187_s21] sm:$0xff] %v1215_v28 }
 0x3ee PF: > { %s16_s15 = sadd.s32 1, %s1745_s15   ;;  %s2185_s30 = sld [smem:[#allocation25_spill]] }
 0x3ef   : > { %p13_p1 = scmp.ge.s32.totalorder %s16_s15, 6   ;;  %s2186_s10 = sld [smem:[#allocation29_spill]] }
 0x3f0   : > { %s2187_s12 = sld [smem:[#allocation26_spill]]  ;;  %s2188_s28 = sld [smem:[#allocation27_spill]] }
 0x3f1   : > { %s2189_s14 = sld [smem:[#allocation28_spill]]  ;;  %s2190_s11 = smov %s1737_s13 }
 0x3f2   :  { %15 = sbr.rel (!%p13_p1) target bundleno = 6 (0x6), region = 516 }
 0x3f6   : > { %s2191_s13 = smov %s2188_s28 }

// kernel: reverse
= control target key start
LH: loop header
LB: loop body
LE: loop exit
PB: predicated region body
PF: predicated region fallthrough
CT: control target
= control target key end

     0   :  { %v2_v0 = vlaneseq  ;;  %s131_s0 = inlined_call_operand.vmem [shape: f32[2,2,16], index: 0, kind: input, shape index: {}]   ;;  %s132_s1 = inlined_call_operand.vmem [shape: f32[2,2,16], index: 1, kind: output, shape index: {}]  }
   0x2   :  { %v3_v1 = vsub.s32 15, %v2_v0 }
   0x4   :  { %4 = vset.pattern.permute.xlu0 %v3_v1 }
   0x5   :  { %v20_v2 = vld [vmem:[%s131_s0] sm:$0xf]  }
   0x6   :  { %21 = vst [vmem:[#allocation1] sm:$0xf] %v20_v2  }
   0xd   :  { %v46_v3 = vld [vmem:[#allocation1] sm:$0x3]  ;;  %v43_v4 = vld [vmem:[#allocation1 + $0x2] sm:$0x3] }
   0xe   :  { %47 = vst [vmem:[#allocation0] sm:$0x3] %v46_v3  ;;  %45 = vst [vmem:[#allocation0 + $0x8] sm:$0x3] %v43_v4 }
  0x15   :  { %v48_v5 = vld [vmem:[#allocation0] sm:$0xff]  ;;  %v54_v6 = vld [vmem:[#allocation0 + $0x8] sm:$0xff] }
  0x16   :  { %49 = vperm.xlu0 %4, %v48_v5  }
  0x1a   :  { %55 = vperm.xlu0 %4, %v54_v6  }
  0x95   :  { %v50_v7 = vpop.permute.xlu0 %49 }
  0x96   :  { %51 = vst [vmem:[#allocation2] sm:$0xff] %v50_v7 }
  0x99   :  { %v56_v8 = vpop.permute.xlu0 %55 }
  0x9a   :  { %57 = vst [vmem:[#allocation2 + $0x8] sm:$0xff] %v56_v8 }
  0x9d   :  { %v61_v9 = vld [vmem:[#allocation2] sm:$0x3] }
  0x9e   :  { %63 = vst [vmem:[#allocation3] sm:$0x3] %v61_v9 }
  0xa1   :  { %v65_v10 = vld [vmem:[#allocation2 + $0x8] sm:$0x3] }
  0xa2   :  { %68 = vst [vmem:[#allocation3 + $0x2] sm:$0x3] %v65_v10 }
  0xa5   :  { %v84_v11 = vld [vmem:[#allocation3] sm:$0x3] }
  0xa6   :  { %85 = vst [vmem:[%s132_s1] sm:$0x3] %v84_v11 }
  0xa9   :  { %v86_v12 = vld [vmem:[#allocation3 + $0x2] sm:$0x3] }
  0xaa   :  { %87 = vst [vmem:[%s132_s1 + $0x2] sm:$0x3] %v86_v12 }

// kernel: custom-call.16
= control target key start
LH: loop header
LB: loop body
LE: loop exit
PB: predicated region body
PF: predicated region fallthrough
CT: control target
= control target key end

     0   :  { %s793_s9 = smov 0   ;;  %s795_s10 = smov 0   ;;  %s1000_s0 = inlined_call_operand.vmem [shape: f32[2,2,16,16], index: 0, kind: input, shape index: {}]   ;;  %s1001_s1 = inlined_call_operand.vmem [shape: f32[2,2,16,16], index: 1, kind: output, shape index: {0}]   ;;  %s1002_s2 = inlined_call_operand.vmem [shape: f32[2,2,16], index: 2, kind: output, shape index: {1}]  }
   0x1   :  { %s797_s11 = smov 0   ;;  %s799_s12 = smov 0  }
   0x2   :  { %s801_s13 = smov 0   ;;  %s803_s14 = smov 0  }
   0x3   :  { %s805_s15 = smov 0  }
   0x4 LB: > { %s31_s16 = sadd.s32 1, %s762_s13  ;;  %s35_s17 = sadd.s32 1, %s766_s14  ;;  %s770_s15 = sphi %s805_s15, %s9_s15   ;;  %s766_s14 = sphi %s803_s14, %s1011_s14   ;;  %s762_s13 = sphi %s801_s13, %s1010_s13   ;;  %s758_s12 = sphi %s799_s12, %s1009_s12   ;;  %s754_s11 = sphi %s797_s11, %s1008_s11   ;;  %s750_s10 = sphi %s795_s10, %s1007_s10   ;;  %s746_s9 = sphi %s793_s9, %s1006_s9  }
   0x5   : > { %p33_p0 = scmp.ge.s32.totalorder %s31_s16, 2  ;;  %s40_s18 = ssub.s32 0, %s762_s13 }
   0x6   : > { %s605_s19 = smin.u32 %s762_s13, %s40_s18  ;;  %s603_s22 = sadd.s32 4294967295, %s770_s15  }
   0x7   : > { %s1013_s16 = smov (%p33_p0, %s31_s16), 0  ;;  %s1015_s17 = smov (!%p33_p0, %s35_s17), %s766_s14 }
   0x8   : > { %p37_p1 = scmp.ge.s32.totalorder %s1015_s17, 2  ;;  %s42_s20 = sshrl.u32 %s605_s19, 3 }
   0x9   : > { %s46_s21 = ssub.s32 0, %s1013_s16  ;;  %p66_p2 = scmp.ne.s32.totalorder %s750_s10, %s746_s9 }
   0xa   : > { %s1017_s17 = smov (%p37_p1, %s1015_s17), 0  ;;  %s606_s23 = smin.u32 %s46_s21, %s1013_s16 }
   0xb   : > { %s48_s24 = sshrl.u32 %s606_s23, 3  ;;  %s51_s25 = ssub.s32 %s766_s14, %s1017_s17 }
   0xc   : > { %p67_p3 = scmp.eq.s32.totalorder %s603_s22, 3  ;;  %s52_s26 = ssub.s32 %s42_s20, %s48_s24 }
   0xd   : > { %s56_s27 = sadd.s32 1, %s750_s10  ;;  %s53_s28 = sor.u32 %s52_s26, %s51_s25 }
   0xe   : > { %p847_p4 = por %p67_p3, %p66_p2  ;;  %p54_p5 = scmp.eq.s32.totalorder %s53_s28, 0 }
   0xf   : > { %p608_p6 = scmp.ge.s32.totalorder %s770_s15, 4 }
  0x10   : > { %s852_s30 = scalar_select %p54_p5, %s750_s10, %s56_s27  }
  0x11   : > { %89 = sbr.rel (%p608_p6) target bundleno = 25 (0x19), region = 16  ;;  %s91_s3 = sand.u32 (!%p608_p6), 1, %s770_s15  }
  0x12   : > { %s610_s4 = sshll.u32 (!%p608_p6), %s762_s13, 1  ;;  %s609_s5 = sshll.u32 (!%p608_p6), %s91_s3, 4 }
  0x13   : > { %s611_s6 = sshll.u32 (!%p608_p6), %s766_s14, 2  ;;  %s93_s21 = scalar_lea.vmem (!%p608_p6), [#allocation0], %s609_s5 }
  0x14   : > { %s99_s7 = sadd.s32 (!%p608_p6), %s611_s6, %s610_s4 }
  0x15   : > { %s612_s8 = sshll.u32 (!%p608_p6), %s99_s7, 3 }
  0x16   : > { %s101_s20 = scalar_lea.vmem (!%p608_p6), %s1000_s0, %s612_s8 }
  0x17   : > { %v131_v0 = vld [vmem:[%s101_s20] sm:$0xff] (!%p608_p6)  ;;  %v133_v1 = vld [vmem:[%s101_s20 + $0x8] sm:$0xff] (!%p608_p6) }
  0x18   : > { %132 = vst [vmem:[%s93_s21] sm:$0xff] %v131_v0  ;;  %134 = vst [vmem:[%s93_s21 + $0x8] sm:$0xff] %v133_v1 }
  0x19 PF: > { %p613_p7 = scmp.ge.s32.totalorder %s770_s15, 1  ;;  %p139_p8 = scmp.lt.s32.totalorder %s770_s15, 5 }
  0x1b   : > { %p140_p9 = pnand %p613_p7, %p139_p8 }
  0x1d   : > { %143 = sbr.rel (%p140_p9) target bundleno = 346 (0x15a), region = 54 }
  0x24   : > { %s146_s23 = sand.u32 1, %s603_s22   ;;  %s160_s24 = sand.u32 1, %s746_s9   ;;  %v776_v4 = vmov 0.0  }
  0x25   : > { %s614_s25 = sshll.u32 %s146_s23, 4  ;;  %s866_s26 = sshll.u32 %s160_s24, 1 }
  0x26   : > { %s171_s27 = sand.u32 7, %s754_s11   ;;  %s148_s28 = scalar_lea.vmem [#allocation0], %s614_s25 }
  0x27   : > { %v173_v2 = vld [vmem:[%s148_s28] sm:$0xff]  ;;  %v617_v3 = vld [vmem:[%s148_s28 + $0x8] sm:$0xff]  ;;  %s869_s3 = scalar_lea.vmem [#allocation1], %s614_s25  ;;  %s873_s4 = scalar_lea.vmem [#allocation2], %s171_s27 }
  0x28   : > { %174 = vst [vmem:[%s869_s3] sm:$0xff] %v173_v2  ;;  %618 = vst [vmem:[%s869_s3 + $0x8] sm:$0xff] %v617_v3  ;;  %s162_s9 = scalar_lea.vmem [#allocation3], %s866_s26  ;;  %s877_s22 = smov 0  }
  0x29   : > { %179 = vst [vmem:[%s873_s4] sm:$0x1] %v776_v4 }
  0x2a LB: >> { %v187_v5 = vlaneseq  ;;  %v887_v8 = vstv %s774_s22  ;;  %s224_s5 = scalar_lea.vmem %s869_s3, %s774_s22 [#allocation1]  ;;  %s300_s6 = scalar_lea.vmem [#allocation4], %s774_s22  ;;  %s774_s22 = sphi %s877_s22, %s185_s22  }
  0x2b   : >> { %s317_s7 = smov [#allocation4] }
  0x2c   : >> { %v884_v7 = vshrl.u32 %v187_v5, 7  ;;  %v916_v56 = vand.u32 127, %v187_v5 }
  0x2e   : >> { %vm191_vm0 = vcmp.gt.s32.totalorder %v884_v7, %v887_v8  ;;  %v198_v10 = vadd.s32 8, %v884_v7  ;;  %v263_v7 = vmov %v884_v7  ;;  %vm920_vm12 = vcmp.eq.s32.totalorder %v916_v56, %v887_v8 }
  0x2f   : >> { %v186_v6 = vld [vmem:[%s869_s3] sm:$0xff]  ;;  %v619_v9 = vld [vmem:[%s869_s3 + $0x8] sm:$0xff]  ;;  %v282_v52 = vadd.s32 8, %v263_v7  ;;  %s260_s3 = smov %s869_s3  ;;  %vm267_vm10 = vcmp.gt.s32.totalorder %v263_v7, %v887_v8  ;;  %v320_v7 = vmov %v884_v7 }
  0x30   : >> { %v192_v11 = vsel %vm191_vm0, %v186_v6, 0.0  ;;  %vm200_vm1 = vcmp.gt.s32.totalorder %v198_v10, %v887_v8  ;;  %v225_v22 = vld [vmem:[%s224_s5] ss:$0 sm:$0xff]  ;;  %v621_v55 = vld [vmem:[%s260_s3 + $0x8] sm:$0xff]  ;;  %vm353_vm0 = vcmp.gt.s32.totalorder %v916_v56, %v887_v8 }
  0x31   : >> { %v193_v12 = vmul.f32 %v192_v11, %v192_v11  ;;  %v203_v13 = vsel %vm200_vm1, %v619_v9, 0.0  ;;  %v226_v23 = vand.u32 2147483647, %v225_v22  ;;  %vm251_vm7 = vcmp.lt.f32.partialorder %v225_v22, 0.0  ;;  %v264_v54 = vld [vmem:[%s260_s3] sm:$0xff]  ;;  %s316_s3 = smov %s869_s3 }
  0x32   : >> { %v204_v14 = vmul.f32 %v203_v13, %v203_v13  ;;  %vm284_vm8 = vcmp.gt.s32.totalorder %v282_v52, %v887_v8  ;;  %vm285_vm9 = vcmp.lt.s32.totalorder %v282_v52, 16  ;;  %v268_v58 = vsel %vm267_vm10, %v264_v54, 0.0  ;;  %v313_v9 = vld [vmem:[%s873_s4] ss:$0 sm:$0xff] }
  0x33   : >> { %v227_v28 = vmax.f32 %v226_v23, 0.0  ;;  %vm286_vm11 = vmand %vm284_vm8, %vm285_vm9 }
  0x34   : >> { %v205_v15 = vadd.f32 %v204_v14, %v193_v12  ;;  %v287_v59 = vsel %vm286_vm11, %v621_v55, 0.0  ;;  %v777_v14 = vmov 1.0  }
  0x36   : >> { %v206_v16 = vrot.slane %v205_v15, 4 }
  0x38   : >> { %v207_v17 = vadd.f32 %v206_v16, %v205_v15  ;;  %v325_v15 = vadd.s32 8, %v320_v7  ;;  %v323_v16 = vld [vmem:[%s316_s3] sm:$0xff]  ;;  %v344_v7 = vmov %v884_v7 }
  0x39   : >> { %vm361_vm14 = vcmp.ge.s32.totalorder %v344_v7, %v887_v8 }
  0x3a   : >> { %v208_v18 = vrot.slane %v207_v17, 2  ;;  %vm331_vm13 = vcmp.lt.s32.totalorder %v325_v15, 16  ;;  %vm362_vm1 = vmand %vm920_vm12, %vm361_vm14 }
  0x3c   : >> { %v209_v19 = vadd.f32 %v208_v18, %v207_v17  ;;  %v623_v17 = vld [vmem:[%s316_s3 + $0x8] sm:$0xff]  ;;  %s340_s3 = smov %s316_s3 }
  0x3d   : >> { %s386_s8 = scalar_lea.vmem %s340_s3, %s774_s22  ;;  %s185_s22 = sadd.s32 1, %s774_s22  }
  0x3e   : >> { %v210_v20 = vrot.slane %v209_v19, 1  ;;  %p182_p10 = scmp.ge.s32.totalorder %s185_s22, 16  }
  0x3f   : > { %s629_s18 = sshll.u32 (%p182_p10), %s754_s11, 1  ;;  %s630_s19 = sshll.u32 (%p182_p10), %s758_s12, 2 }
  0x40   : >> { %v894_v21 = vadd.f32 %v210_v20, %v209_v19  ;;  %s413_s20 = sadd.s32 (%p182_p10), %s630_s19, %s629_s18 }
  0x41   : > { %s631_s21 = sshll.u32 (%p182_p10), %s413_s20, 3 }
  0x42   : >> { %702 = vrsqrt.f32 %v894_v21  ;;  %vm214_vm2 = vcmp.eq.f32.partialorder %v894_v21, inf  ;;  %v217_v25 = vand.u32 2147483648, %v894_v21  ;;  %vm216_vm3 = vcmp.eq.f32.partialorder %v894_v21, 0.0  ;;  %s415_s25 = scalar_lea.vmem (%p182_p10), %s1001_s1, %s631_s21 }
  0x4c   : >> { %v703_v24 = vpop.eup %702 }
  0x4d   : >> { %v213_v26 = vmul.f32 %v703_v24, %v894_v21 }
  0x4f   : >> { %v215_v27 = vsel %vm214_vm2, %v894_v21, %v213_v26 }
  0x50   : >> { %v218_v29 = vsel %vm216_vm3, %v217_v25, %v215_v27 }
  0x51   : >> { %v228_v30 = vand.u32 2147483647, %v218_v29  ;;  %v365_v29 = vadd.s32 8, %v344_v7 }
  0x53   : >> { %v229_v31 = vmax.f32 %v227_v28, %v228_v30  ;;  %vm382_vm15 = vcmp.ge.s32.totalorder %v365_v29, %v887_v8 }
  0x54   : >> { %vm383_vm2 = vmand %vm920_vm12, %vm382_vm15 }
  0x55   : >> { %704 = vrcp.f32 %v229_v31  ;;  %vm241_vm6 = vcmp.eq.f32.partialorder %v229_v31, 0.0 }
  0x5f   : >> { %v705_v32 = vpop.eup %704 }
  0x60   : >> { %v231_v33 = vmul.f32 %v705_v32, %v226_v23  ;;  %v234_v34 = vmul.f32 0.0, %v705_v32  ;;  %v238_v35 = vmul.f32 %v705_v32, %v228_v30 }
  0x62   : >> { %v232_v36 = vmul.f32 %v231_v33, %v231_v33  ;;  %v235_v37 = vmul.f32 %v234_v34, %v234_v34  ;;  %v239_v38 = vmul.f32 %v238_v35, %v238_v35  ;;  %v625_v35 = vld [vmem:[%s340_s3 + $0x8] sm:$0xff] }
  0x64   : >> { %v236_v39 = vadd.f32 %v235_v37, %v232_v36 }
  0x66   : >> { %v240_v40 = vadd.f32 %v239_v38, %v236_v39 }
  0x68   : >> { %706 = vrsqrt.f32 %v240_v40  ;;  %vm244_vm4 = vcmp.eq.f32.partialorder %v240_v40, inf  ;;  %v247_v42 = vand.u32 2147483648, %v240_v40  ;;  %vm246_vm5 = vcmp.eq.f32.partialorder %v240_v40, 0.0 }
  0x72   : >> { %v707_v41 = vpop.eup %706 }
  0x73   : >> { %v243_v43 = vmul.f32 %v707_v41, %v240_v40 }
  0x75   : >> { %v245_v44 = vsel %vm244_vm4, %v240_v40, %v243_v43 }
  0x76   : >> { %v248_v45 = vsel %vm246_vm5, %v247_v42, %v245_v44 }
  0x77   : >> { %v249_v46 = vmul.f32 %v248_v45, %v229_v31  ;;  %v351_v31 = vld [vmem:[%s340_s3] sm:$0xff] }
  0x79   : >> { %v250_v47 = vsel %vm241_vm6, 0.0, %v249_v46 }
  0x7a   : >> { %v252_v48 = vxor.u32 2147483648, %v250_v47 }
  0x7c   : >> { %v253_v49 = vsel %vm251_vm7, %v250_v47, %v252_v48 }
  0x7d   : >> { %v909_v50 = vsel %vm216_vm3, %v225_v22, %v253_v49  ;;  %708 = vrcp.f32 %v253_v49  ;;  %v254_v53 = vsub.f32 %v253_v49, %v225_v22 }
  0x7e   : >> { %v259_v51 = vsub.f32 %v225_v22, %v909_v50 }
  0x80   : >> { %710 = vrcp.f32 %v259_v51 }
  0x87   : >> { %v709_v57 = vpop.eup %708 }
  0x88   : >> { %v256_v60 = vmul.f32 %v709_v57, %v254_v53 }
  0x8a   : >> { %v711_v61 = vpop.eup %710  ;;  %v258_v63 = vsel %vm216_vm3, 0.0, %v256_v60 }
  0x8b   : >> { %v270_v0 = vmul.f32 %v711_v61, %v268_v58  ;;  %v289_v1 = vmul.f32 %v711_v61, %v287_v59  ;;  %v306_v2 = vsel %vm920_vm12, %v258_v63, 0.0 }
  0x8c   : >> { %307 = vadd.xlane.f32.xlu1 %v306_v2 }
  0x8d   : >> { %v271_v3 = vsel %vm216_vm3, 0.0, %v270_v0  ;;  %v290_v4 = vsel %vm216_vm3, 0.0, %v289_v1 }
  0x8e   : >> { %v276_v5 = vsel %vm920_vm12, %v271_v3, 0.0  ;;  %v295_v6 = vsel %vm920_vm12, %v290_v4, 0.0 }
  0x8f   : >> { %277 = vadd.xlane.f32.xlu0 %v276_v5 }
  0x93   : >> { %296 = vadd.xlane.f32.xlu0 %v295_v6 }
 0x119   : >> { %v308_v10 = vpop.xlane.xlu1 %307 }
 0x11a   : >> { %v314_v11 = vsel %vm920_vm12, %v308_v10, %v313_v9 }
 0x11b   : >> { %315 = vst [vmem:[%s873_s4] sm:$0x1] %v314_v11 }
 0x11c   : >> { %v278_v12 = vpop.xlane.xlu0 %277 }
 0x11d   : >> { %279 = vst [vmem:[#allocation4] sm:$0xff] %v278_v12 }
 0x120   : >> { %v297_v13 = vpop.xlane.xlu0 %296 }
 0x121   : >> { %299 = vst [vmem:[#allocation4 + $0x8] sm:$0xff] %v297_v13 }
 0x122   : >> { %301 = vst [vmem:[%s300_s6] sm:$0x1] %v777_v14  ;;  %v397_v44 = vld [vmem:[#allocation2] sm:$0x3] (%p182_p10) }
 0x123   : > { %399 = vst [vmem:[%s162_s9] sm:$0x3] (%p182_p10), %v397_v44 }
 0x129   : >> { %v322_v18 = vld [vmem:[%s317_s7] sm:$0xff]  ;;  %v622_v19 = vld [vmem:[%s317_s7 + $0x8] sm:$0xff]  ;;  %s341_s7 = smov %s317_s7 }
 0x12a   : >> { %v324_v20 = vmul.f32 %v323_v16, %v322_v18  ;;  %v330_v21 = vmul.f32 %v623_v17, %v622_v19  ;;  %v349_v33 = vld [vmem:[%s341_s7] sm:$0xff]  ;;  %v624_v34 = vld [vmem:[%s341_s7 + $0x8] sm:$0xff] }
 0x12c   : >> { %v332_v22 = vsel %vm331_vm13, %v330_v21, 0.0 }
 0x12d   : >> { %v333_v23 = vadd.f32 %v332_v22, %v324_v20 }
 0x12f   : >> { %v334_v24 = vrot.slane %v333_v23, 4 }
 0x131   : >> { %v335_v25 = vadd.f32 %v334_v24, %v333_v23 }
 0x133   : >> { %v336_v26 = vrot.slane %v335_v25, 2 }
 0x135   : >> { %v337_v27 = vadd.f32 %v336_v26, %v335_v25 }
 0x137   : >> { %v338_v28 = vrot.slane %v337_v27, 1 }
 0x139   : >> { %v339_v30 = vadd.f32 %v338_v28, %v337_v27 }
 0x13b   : >> { %v345_v32 = vmul.f32 %v339_v30, %v308_v10 }
 0x13d   : >> { %v350_v36 = vmul.f32 %v349_v33, %v345_v32  ;;  %v370_v37 = vmul.f32 %v624_v34, %v345_v32 }
 0x13f   : >> { %v354_v38 = vsub.f32 %v351_v31, %v350_v36  ;;  %v375_v7 = vsub.f32 %v625_v35, %v370_v37 }
 0x141   : >> { %v355_v39 = vsel %vm353_vm0, %v354_v38, %v351_v31  ;;  %v376_v40 = vsel %vm353_vm0, %v375_v7, %v625_v35 }
 0x142   : >> { %v363_v41 = vsel %vm362_vm1, %v349_v33, %v355_v39  ;;  %v384_v42 = vsel %vm383_vm2, %v624_v34, %v376_v40 }
 0x143   : >> { %364 = vst [vmem:[%s340_s3] sm:$0xff] %v363_v41  ;;  %626 = vst [vmem:[%s340_s3 + $0x8] sm:$0xff] %v384_v42 }
 0x146   : > { %184 = sbr.rel (!%p182_p10) target bundleno = 42 (0x2a), region = 184 }
 0x14a   : >> { %v387_v43 = vld [vmem:[%s386_s8] ss:$0 sm:$0xff] }
 0x14b   : >> { %v392_v8 = vsel %vm920_vm12, %v909_v50, %v387_v43 }
 0x14c   : >> { %393 = vst [vmem:[%s386_s8] sm:$0x1] %v392_v8 }
 0x14d   : > { %p455_p11 = scmp.lt.s32.totalorder (%p847_p4), %s754_s11, 0  ;;  %s456_s27 = ssub.s32 (%p847_p4), 0, %s754_s11  ;;  %v479_v47 = vld [vmem:[%s162_s9] sm:$0x3] (%p847_p4) }
 0x14e   : > { %454 = sbr.rel (!%p847_p4) target bundleno = 346 (0x15a), region = 99  ;;  %s632_s28 = smin.u32 (%p847_p4), %s754_s11, %s456_s27 }
 0x14f   : > { %s458_s4 = sshrl.u32 (%p847_p4), %s632_s28, 3 }
 0x153   : > { %v445_v45 = vld [vmem:[%s869_s3] sm:$0xff]  ;;  %v447_v46 = vld [vmem:[%s869_s3 + $0x8] sm:$0xff]  ;;  %s459_s3 = ssub.s32 (%p847_p4), 0, %s458_s4 }
 0x154   : > { %446 = vst [vmem:[%s415_s25] sm:$0xff] %v445_v45  ;;  %448 = vst [vmem:[%s415_s25 + $0x8] sm:$0xff] %v447_v46 }
 0x155   : > { %s1019_s3 = smov (!%p455_p11, %s459_s3), %s458_s4 }
 0x156   : > { %s461_s22 = sadd.s32 %s758_s12, %s1019_s3 }
 0x157   : > { %s633_s5 = sshll.u32 %s461_s22, 1 }
 0x158   : > { %s463_s29 = scalar_lea.vmem %s1002_s2, %s633_s5 }
 0x159   : > { %480 = vst [vmem:[%s463_s29] sm:$0x3] %v479_v47 }
 0x15a PF: > { %s9_s15 = sadd.s32 1, %s770_s15   ;;  %s1006_s9 = smov %s750_s10 }
 0x15b   : > { %p6_p12 = scmp.ge.s32.totalorder %s9_s15, 6   ;;  %s1007_s10 = smov %s852_s30 }
 0x15c   : > { %s1008_s11 = smov %s762_s13  ;;  %s1009_s12 = smov %s766_s14 }
 0x15d   : > { %s1010_s13 = smov %s1013_s16  ;;  %s1011_s14 = smov %s1017_s17 }
 0x15e   :  { %8 = sbr.rel (!%p6_p12) target bundleno = 4 (0x4), region = 195 }

// kernel: tile.8
= control target key start
LH: loop header
LB: loop body
LE: loop exit
PB: predicated region body
PF: predicated region fallthrough
CT: control target
= control target key end

     0   :  { %s22_s0 = inlined_call_operand.vmem [shape: f32[16], index: 0, kind: input, shape index: {}]   ;;  %s23_s1 = inlined_call_operand.vmem [shape: f32[2,16], index: 1, kind: output, shape index: {}]  }
   0x1   :  { %v4_v0 = vld [vmem:[%s22_s0] ss:$0 sm:$0xff] }
   0x2   :  { %5 = vst [vmem:[%s23_s1] sm:$0x3] %v4_v0 }

// kernel: derf_attention_forward.3
= control target key start
LH: loop header
LB: loop body
LE: loop exit
PB: predicated region body
PF: predicated region fallthrough
CT: control target
= control target key end

     0   :  { %13 = vsyncpa [#allocation6], 0  ;;  %s1769_s0 = inlined_call_operand.vmem [shape: f32[2,8,32], index: 0, kind: input, shape index: {}]   ;;  %s1770_s1 = inlined_call_operand.vmem [shape: f32[2,8,32], index: 1, kind: input, shape index: {}]   ;;  %s1771_s2 = inlined_call_operand.vmem [shape: f32[2,8,32], index: 2, kind: input, shape index: {}]   ;;  %s1772_s3 = inlined_call_operand.vmem [shape: bf16[2,32,32], index: 3, kind: input, shape index: {}]   ;;  %s1773_s4 = inlined_call_operand.vmem [shape: f32[2,1,32], index: 4, kind: input, shape index: {}]   ;;  %s1774_s5 = inlined_call_operand.vmem [shape: f32[32,32], index: 5, kind: input, shape index: {}]   ;;  %s1775_s6 = inlined_call_operand.vmem [shape: bf16[32,32], index: 6, kind: input, shape index: {}]   ;;  %s1776_s7 = inlined_call_operand.vmem [shape: f32[1,32], index: 7, kind: input, shape index: {}]   ;;  %s1777_s8 = inlined_call_operand.hbm [shape: f32[2,8,32], index: 8, kind: output, shape index: {}]  }
   0x1   :  { %15 = vsyncpa [#allocation6 + $0x1], 0  ;;  %s1562_s27 = smov 0   ;;  %s1564_s28 = smov 0  }
   0x2   :  { %s1566_s29 = smov 0   ;;  %s1568_s30 = smov 0  }
   0x3   :  { %s1570_s9 = smov 0   ;;  %s1572_s10 = smov 0  }
   0x4 LB: > { %s1203_s11 = sadd.s32 4294967295, %s1508_s10   ;;  %s1204_s12 = sadd.s32 4294967294, %s1508_s10   ;;  %s1508_s10 = sphi %s1572_s10, %s21_s10   ;;  %s1504_s9 = sphi %s1570_s9, %s1784_s9   ;;  %s1500_s30 = sphi %s1568_s30, %s1783_s30   ;;  %s1496_s29 = sphi %s1566_s29, %s1782_s29   ;;  %s1492_s28 = sphi %s1564_s28, %s1781_s28   ;;  %s1488_s27 = sphi %s1562_s27, %s1780_s27  }
   0x5   : > { %s40_s13 = sadd.s32 1, %s1504_s9  ;;  %s248_s14 = sadd.s32 1, %s1496_s29 }
   0x6   : > { %p42_p0 = scmp.ge.s32.totalorder %s40_s13, 2  ;;  %p258_p1 = scmp.ne.s32.totalorder %s1496_s29, %s1492_s28 }
   0x7   : > { %p259_p2 = scmp.eq.s32.totalorder %s1203_s11, 1  ;;  %p264_p3 = scmp.ne.s32.totalorder %s1492_s28, %s1488_s27 }
   0x8   : > { %s1786_s13 = smov (%p42_p0, %s40_s13), 0  ;;  %p265_p5 = scmp.eq.s32.totalorder %s1204_s12, 1 }
   0x9   : > { %p1602_p4 = por %p259_p2, %p258_p1  ;;  %s243_s16 = ssub.s32 %s1504_s9, %s1786_s13 }
   0xa   : > { %p1207_p6 = scmp.ge.s32.totalorder %s1508_s10, 1  ;;  %p246_p7 = scmp.eq.s32.totalorder %s243_s16, 0 }
   0xb   : > { %p1609_p8 = por %p265_p5, %p264_p3  ;;  %p336_p9 = scmp.lt.s32.totalorder %s1508_s10, 3 }
   0xc   : > { %s1615_s18 = scalar_select %p246_p7, %s1496_s29, %s248_s14  }
   0xd   : > { %p337_p10 = pnand %p1207_p6, %p336_p9 }
   0xe   : > { %p394_p11 = scmp.lt.s32.totalorder (!%p337_p10), %s1500_s30, 1  ;;  %v1510_v0 = vmov (!%p337_p10), 0.0   ;;  %vm1511_vm0 = vmmov (!%p337_p10), 0   ;;  %vm463_vm1 = vcmask (!%p337_p10), 261120   ;;  %v429_v20 = vld [vmem:[%s1774_s5] sm:$0xff] (!%p337_p10)  ;;  %v430_v21 = vld [vmem:[%s1774_s5 + $0x8] sm:$0xff] (!%p337_p10) }
   0xf   : > { %340 = sbr.rel (%p337_p10) target bundleno = 1753 (0x6d9), region = 52  ;;  %1264 = vmatprep.subr.bf16.mxu0 (!%p337_p10), %v1510_v0  ;;  %1268 = vmatprep.mubr.msk.bf16.mxu0 (!%p337_p10), %vm1511_vm0, %v1510_v0  ;;  %v1335_v22 = vpack.c.bf16 (!%p337_p10), %v430_v21, %v429_v20  ;;  %v1512_v23 = vmov (!%p337_p10), 0.0|0.0   ;;  %v431_v24 = vld [vmem:[%s1774_s5 + $0x10] sm:$0xff] (!%p337_p10)  ;;  %v432_v25 = vld [vmem:[%s1774_s5 + $0x18] sm:$0xff] (!%p337_p10)  ;;  %vm440_vm2 = vcmask (!%p337_p10), 130048   ;;  %vm591_vm3 = vcmask (!%p337_p10), 257024  }
  0x10   : > { %1280 = vmatprep.mubr.msk.f32.mxu1 (!%p337_p10), %vm1511_vm0, %v1510_v0  ;;  %1334 = vmatprep.subr.bf16.mxu1 (!%p337_p10), %v1512_v23  ;;  %v1338_v26 = vpack.c.bf16 (!%p337_p10), %v432_v25, %v431_v24  ;;  %441 = vst.msk [vmem:[#allocation4] sm:$0xff] (!%p337_p10), %vm440_vm2, %v1510_v0  ;;  %442 = vst.msk [vmem:[#allocation4 + $0x8] sm:$0xff] (!%p337_p10), %vm440_vm2, %v1510_v0  ;;  %vm806_vm4 = vcmask (!%p337_p10), 1043456   ;;  %vm437_vm5 = vcmask (!%p337_p10), 7168   ;;  %vm793_vm6 = vcmask (!%p337_p10), 64512   ;;  %s391_s12 = sand.u32 (!%p337_p10), 1, %s1492_s28  }
  0x11   : > { %1336 = vmatpush3.bf16.msra.mxu1 (!%p337_p10), %v1335_v22  ;;  %438 = vst.msk [vmem:[#allocation3] sm:$0xff] (!%p337_p10), %vm437_vm5, %v1510_v0  ;;  %439 = vst.msk [vmem:[#allocation3 + $0x8] sm:$0xff] (!%p337_p10), %vm437_vm5, %v1510_v0  ;;  %s1208_s14 = sshll.u32 (!%p337_p10), %s391_s12, 3  ;;  %s1232_s22 = sshll.u32 (!%p337_p10), %s1500_s30, 7 }
  0x12   : > { %1337 = vmatprep.subr.bf16.mxu1 (!%p337_p10), %v1512_v23 }
  0x15   : > { %1339 = vmatpush3.bf16.msra.mxu1 (!%p337_p10), %v1338_v26 }
  0x16   : > { %s395_s19 = scalar_select %p394_p11, %s1500_s30, 1  ;;  %1340 = vmatprep.subr.bf16.mxu1 %v1512_v23 }
  0x17   : > { %s1064_s30 = scalar_lea.sflag [#allocation6], %s391_s12 }
  0x18   : > { %s1235_s20 = sshll.u32 %s395_s19, 4  ;;  %s1624_s21 = sshll.u32 %s395_s19, 3  ;;  %v909_v25 = vld [vmem:[#allocation3 + $0x8] sm:$0xff] }
  0x19   : > { %s419_s24 = scalar_lea.vmem %s1772_s3, %s1235_s20  ;;  %s400_s11 = scalar_lea.vmem %s1769_s0, %s1624_s21 }
  0x1a   : > { %v1409_v1 = vld [vmem:[%s419_s24] sm:$0xff]   ;;  %v1410_v2 = vld [vmem:[%s419_s24 + $0x8] sm:$0xff]   ;;  %s407_s16 = scalar_lea.vmem %s1770_s1, %s1624_s21  ;;  %s422_s23 = scalar_lea.vmem %s1773_s4, %s395_s19 }
  0x1b   : > { %1265 = vmatpush3.bf16.msra.mxu0 %v1409_v1  ;;  %v443_v3 = vld [vmem:[%s400_s11] sm:$0xff]  ;;  %s1513_s24 = smov 112   ;;  %s1515_s11 = smov 16  }
  0x1c   : > { %1266 = vmatprep.subr.bf16.mxu0 %v1510_v0  ;;  %v444_v4 = vpack.c.bf16 %v443_v3, %v443_v3  ;;  %v593_v5 = vld [vmem:[%s407_s16] sm:$0xff]  ;;  %s1721_s19 = scalar_lea.hbm %s1777_s8, %s1232_s22 }
  0x1d   : > { %v594_v6 = vpack.c.bf16 %v593_v5, %v593_v5  ;;  %v1236_v7 = vld [vmem:[%s422_s23] ss:$0 sm:$0xff]  ;;  %s414_s23 = scalar_lea.vmem %s1771_s2, %s1624_s21  ;;  %v1514_v5 = vmov 0  }
  0x1e   : > { %v741_v46 = vld [vmem:[%s414_s23] sm:$0xff]  ;;  %1408 = vset.pattern.permute.xlu0 %v1514_v5  ;;  %1407 = vset.pattern.permute.xlu1 %v1514_v5  ;;  %s393_s23 = scalar_lea.vmem [#allocation5], %s1208_s14 }
  0x1f   : > { %1267 = vmatpush3.bf16.msra.mxu0 %v1410_v2  ;;  %v802_v47 = vpack.c.bf16 %v741_v46, %v741_v46  ;;  %v1227_v46 = vld [vmem:[%s1776_s7] ss:$0 sm:$0xff] }
  0x20   : > { %1283 = vmatprep.subr.bf16.mxu0 %v1510_v0 }
  0x21   : > { %v808_v54 = vsel %vm806_vm4, %v802_v47, 0 }
  0x22   : > { %1269 = vmatmul.mubr.msk.bf16.vlgmr.msra.gmra.mrb[0].mxu0 %vm463_vm1, %v444_v4 }
  0x23   : > { %1284 = vmatpush3.bf16.msra.mxu0 %v1409_v1  ;;  %1287 = vmatprep.mubr.msk.bf16.mxu0 %vm1511_vm0, %v1510_v0 }
  0x24   : > { %1285 = vmatprep.subr.bf16.mxu0 %v1510_v0 }
  0x27   : > { %1286 = vmatpush3.bf16.msra.mxu0 %v1410_v2 }
  0x28   : > { %1302 = vmatprep.subr.bf16.mxu0 %v1510_v0 }
  0x2a   : > { %1288 = vmatmul.mubr.msk.bf16.vlgmr.msra.gmra.mrb[4].mxu0 %vm463_vm1, %v594_v6  ;;  %v792_v6 = vld [vmem:[#allocation3] sm:$0xff] }
  0x2b   : > { %1304 = vmatprep.mubr.msk.bf16.mxu0 %vm1511_vm0, %v1510_v0 }
  0xf5   : > { %v501_v8 = vpop.f32.mrb[0].mxu0 }
  0xf6   : > { %v502_v9 = vadd.f32 %v1236_v7, %v501_v8  ;;  %v1270_v10 = vpop.f32.mrb[1].mxu0 }
  0xf7   : > { %v504_v11 = vpop.f32.mrb[2].mxu0 }
  0xf8   : > { %v1271_v12 = vpop.f32.mrb[3].mxu0  ;;  %v507_v13 = vsel %vm463_vm1, %v502_v9, -inf  ;;  %v800_v11 = vld [vmem:[#allocation4] sm:$0xff] }
  0xf9   : > { %508 = vmax.xlane.f32.xlu0 %v507_v13 }
  0xfd   : > { %v651_v14 = vpop.f32.mrb[4].mxu0 }
  0xfe   : > { %v652_v15 = vadd.f32 %v1236_v7, %v651_v14  ;;  %v1289_v16 = vpop.f32.mrb[5].mxu0 }
  0xff   : > { %v654_v17 = vpop.f32.mrb[6].mxu0 }
 0x100   : > { %v1290_v18 = vpop.f32.mrb[7].mxu0  ;;  %v657_v19 = vsel %vm463_vm1, %v652_v15, -inf }
 0x101   : > { %658 = vmax.xlane.f32.xlu0 %v657_v19 }
 0x117   : > { %919 = vrot.lane.b32.xlu0 %v802_v47, %s1513_s24 }
 0x186   : > { %v509_v27 = vpop.xlane.xlu0 %508 }
 0x187   : > { %v510_v28 = vsub.f32 %v502_v9, %v509_v27 }
 0x189   : > { %v511_v29 = vmul.f32 1.442695, %v510_v28 }
 0x18b   : > { %1414 = vpow2.f32 %v511_v29 }
 0x18e   : > { %v659_v30 = vpop.xlane.xlu0 %658 }
 0x18f   : > { %v660_v31 = vsub.f32 %v652_v15, %v659_v30  ;;  %v1412_v30 = vld [vmem:[%s1775_s6] sm:$0xff]  }
 0x191   : > { %v661_v32 = vmul.f32 1.442695, %v660_v31  ;;  %v916_v31 = vld [vmem:[#allocation4 + $0x8] sm:$0xff] }
 0x192   : > { %v920_v55 = vpop.permute.xlu0 %919 }
 0x193   : > { %1416 = vpow2.f32 %v661_v32  ;;  %v925_v56 = vsel %vm806_vm4, %v920_v55, 0 }
 0x195   : > { %v1415_v33 = vpop.eup %1414 }
 0x196   : > { %v513_v34 = vmul.f32 %v1415_v33, %v1415_v33 }
 0x198   : > { %1281 = vmatmul.mubr.msk.f32.vlgmr.msra.gmra.mrb[0].mxu1 %vm463_vm1, %v513_v34 }
 0x199   : > { %1342 = vmatpush3.bf16.msra.mxu1 %v1335_v22  ;;  %1299 = vmatprep.mubr.msk.f32.mxu1 %vm1511_vm0, %v1510_v0 }
 0x19a   : > { %1343 = vmatprep.subr.bf16.mxu1 %v1512_v23 }
 0x19d   : > { %v1417_v35 = vpop.eup %1416  ;;  %1345 = vmatpush3.bf16.msra.mxu1 %v1338_v26 }
 0x19e   : > { %v663_v36 = vmul.f32 %v1417_v35, %v1417_v35  ;;  %1308 = vmatprep.subr.bf16.mxu1 %v1510_v0 }
 0x1a0   : > { %1300 = vmatmul.mubr.msk.f32.vlgmr.msra.gmra.mrb[2].mxu1 %vm463_vm1, %v663_v36 }
 0x1a1   : > { %1310 = vmatprep.mubr.msk.bf16.mxu1 %vm1511_vm0, %v1510_v0  ;;  %1309 = vmatpush3.bf16.msra.mxu1 %v808_v54 }
 0x1a2   : > { %1314 = vmatprep.subr.bf16.mxu1 %v1510_v0 }
 0x26b   : > { %v583_v37 = vpop.f32.mrb[0].mxu1 }
 0x26c   : > { %v587_v38 = vmax.f32 %v583_v37, 1e-30  ;;  %v1282_v39 = vpop.f32.mrb[1].mxu1  ;;  %v1413_v37 = vld [vmem:[%s1775_s6 + $0x8] sm:$0xff]  }
 0x26e   : > { %1418 = vrsqrt.f32 %v587_v38 }
 0x273   : > { %v733_v40 = vpop.f32.mrb[2].mxu1 }
 0x274   : > { %v737_v41 = vmax.f32 %v733_v40, 1e-30  ;;  %v1301_v42 = vpop.f32.mrb[3].mxu1 }
 0x276   : > { %1420 = vrsqrt.f32 %v737_v41 }
 0x278   : > { %v1419_v43 = vpop.eup %1418 }
 0x279   : > { %v589_v44 = vmul.f32 %v1419_v43, %v1415_v33 }
 0x27b   : > { %v590_v45 = vpack.c.bf16 %v589_v44, %v589_v44 }
 0x27d   : > { %592 = vst.msk [vmem:[#allocation2] sm:$0xf] %vm591_vm3, %v590_v45 }
 0x280   : > { %v1421_v48 = vpop.eup %1420 }
 0x281   : > { %v739_v49 = vmul.f32 %v1421_v48, %v1417_v35 }
 0x283   : > { %v740_v50 = vpack.c.bf16 %v739_v49, %v739_v49 }
 0x284   : > { %v742_v51 = vld [vmem:[#allocation2] sm:$0xf] }
 0x285   : > { %858 = vrot.lane.b32.xlu1 %v740_v50, %s1513_s24  ;;  %v748_v52 = vsel %vm440_vm2, %v740_v50, 0  ;;  %v1224_v53 = vcombine.low %v742_v51, %v742_v51 }
 0x286   : > { %1303 = vmatpush3.bf16.xpose.msra.mxu0 %v748_v52 }
 0x287   : > { %1320 = vmatprep.subr.bf16.mxu0 %v1510_v0 }
 0x289   : > { %855 = vrot.lane.b32.xlu1 %v1224_v53, %s1513_s24  ;;  %s1078_s24 = sshll.u32 %s393_s23, 4  ;;  %s1723_s24 = int_to_ptr.vmem [resolvable:$true] %s1078_s24 }
 0x28a   : > { %s1430_s26 = scalar_lea.vmem %s1723_s24, 128 }
 0x28b   : > { %p1431_p12 = scmp.ne.s32.totalorder %s1723_s24, %s1430_s26 }
 0x28d   : > { %1305 = vmatmul.mubr.msk.bf16.vlgmr.msra.gmra.mrb[8].mxu0 %vm440_vm2, %v742_v51  ;;  %p1432_p13 = pnand %p1431_p12, %p1602_p4 }
 0x28e   : > { %1322 = vmatprep.mubr.msk.bf16.mxu0 %vm1511_vm0, %v1510_v0  ;;  %1321 = vmatpush3.bf16.msra.mxu0 %v925_v56 }
 0x28f   : > { %p1433_p0 = pneg %p1432_p13 }
 0x2f7   : > { %v859_v63 = vpop.permute.xlu1 %858 }
 0x2f8   : > { %v864_v3 = vsel %vm440_vm2, %v859_v63, 0 }
 0x2fb   : > { %v856_v4 = vpop.permute.xlu1 %855 }
 0x360   : > { %v784_v57 = vpop.f32.mrb[8].mxu0 }
 0x361   : > { %v790_v58 = vmul.f32 1.442695, %v784_v57  ;;  %v1306_v59 = vpop.f32.mrb[9].mxu0 }
 0x362   : > { %v787_v60 = vpop.f32.mrb[10].mxu0 }
 0x363   : > { %1422 = vpow2.f32 %v790_v58  ;;  %v1307_v61 = vpop.f32.mrb[11].mxu0 }
 0x36d   : > { %v1423_v62 = vpop.eup %1422 }
 0x36e   : > { %v794_v1 = vsel %vm793_vm6, %v1423_v62, 0.0  ;;  %v801_v2 = vpack.c.bf16 %v1423_v62, %v1423_v62 }
 0x36f   : > { %795 = vadd.xlane.f32.xlu0 %v794_v1 }
 0x370   : > { %1311 = vmatmul.mubr.msk.bf16.vlgmr.msra.gmra.mrb[4].mxu1 %vm793_vm6, %v801_v2 }
 0x371   : > { %1315 = vmatpush3.bf16.xpose.msra.mxu1 %v864_v3  ;;  %1316 = vmatprep.mubr.msk.bf16.mxu1 %vm1511_vm0, %v1510_v0 }
 0x372   : > { %1326 = vmatprep.subr.bf16.mxu1 %v1510_v0 }
 0x378   : > { %1317 = vmatmul.mubr.msk.bf16.vlgmr.msra.gmra.mrb[8].mxu1 %vm440_vm2, %v856_v4 }
 0x379   : > { %1330 = vmatprep.mubr.msk.bf16.mxu1 %vm1511_vm0, %v1510_v0  ;;  %1327 = vmatpush3.bf16.msra.mxu1 %v1412_v30 }
 0x37a   : > { %1328 = vmatprep.subr.bf16.mxu1 %v1510_v0 }
 0x37d   : > { %1329 = vmatpush3.bf16.msra.mxu1 %v1413_v37 }
 0x3fc   : > { %v796_v7 = vpop.xlane.xlu0 %795 }
 0x3fd   : > { %v797_v8 = vadd.f32 %v796_v7, %v792_v6 }
 0x3ff   : > { %799 = vst.msk [vmem:[#allocation3] sm:$0xff] %vm437_vm5, %v797_v8 }
 0x406   : > { %v972_v9 = vld [vmem:[#allocation3] sm:$0xff] }
 0x407   : > { %1424 = vrcp.f32 %v972_v9 }
 0x411   : > { %v1425_v10 = vpop.eup %1424 }
 0x412   : > { %977 = vperm.xlu0 %1408, %v1425_v10  }
 0x443   : > { %v844_v12 = vpop.f32.mrb[4].mxu1 }
 0x444   : > { %v850_v13 = vadd.f32 %v844_v12, %v800_v11  ;;  %v1312_v14 = vpop.f32.mrb[5].mxu1 }
 0x445   : > { %v847_v15 = vpop.f32.mrb[6].mxu1 }
 0x446   : > { %851 = vst.msk [vmem:[#allocation4] sm:$0xff] %vm440_vm2, %v850_v13  ;;  %v1313_v16 = vpop.f32.mrb[7].mxu1 }
 0x44b   : > { %v900_v17 = vpop.f32.mrb[8].mxu1 }
 0x44c   : > { %v906_v18 = vmul.f32 1.442695, %v900_v17  ;;  %v1318_v19 = vpop.f32.mrb[9].mxu1 }
 0x44d   : > { %v903_v20 = vpop.f32.mrb[10].mxu1  ;;  %v974_v41 = vld [vmem:[#allocation4] sm:$0xff] }
 0x44e   : > { %1426 = vpow2.f32 %v906_v18  ;;  %v1319_v21 = vpop.f32.mrb[11].mxu1 }
 0x458   : > { %v1427_v22 = vpop.eup %1426 }
 0x459   : > { %v910_v23 = vsel %vm793_vm6, %v1427_v22, 0.0  ;;  %v917_v24 = vpack.c.bf16 %v1427_v22, %v1427_v22 }
 0x45a   : > { %911 = vadd.xlane.f32.xlu1 %v910_v23 }
 0x45b   : > { %1323 = vmatmul.mubr.msk.bf16.vlgmr.msra.gmra.mrb[12].mxu0 %vm793_vm6, %v917_v24 }
 0x491   : > { %v978_v0 = vpop.permute.xlu0 %977 }
 0x492   : > { %v980_v42 = vmul.f32 %v978_v0, %v974_v41 }
 0x4e7   : > { %v912_v26 = vpop.xlane.xlu1 %911 }
 0x4e8   : > { %v913_v27 = vadd.f32 %v912_v26, %v909_v25 }
 0x4ea   : > { %914 = vst.msk [vmem:[#allocation3 + $0x8] sm:$0xff] %vm437_vm5, %v913_v27 }
 0x4f1   : > { %v981_v28 = vld [vmem:[#allocation3 + $0x8] sm:$0xff] }
 0x4f2   : > { %1428 = vrcp.f32 %v981_v28 }
 0x4fc   : > { %v1429_v29 = vpop.eup %1428 }
 0x4fd   : > { %986 = vperm.xlu1 %1407, %v1429_v29  }
 0x52e   : > { %v961_v32 = vpop.f32.mrb[12].mxu0 }
 0x52f   : > { %v967_v33 = vadd.f32 %v961_v32, %v916_v31  ;;  %v1324_v34 = vpop.f32.mrb[13].mxu0 }
 0x530   : > { %v964_v35 = vpop.f32.mrb[14].mxu0 }
 0x531   : > { %968 = vst.msk [vmem:[#allocation4 + $0x8] sm:$0xff] %vm440_vm2, %v967_v33  ;;  %v1325_v36 = vpop.f32.mrb[15].mxu0 }
 0x538   : > { %v983_v39 = vld [vmem:[#allocation4 + $0x8] sm:$0xff] }
 0x57c   : > { %v987_v38 = vpop.permute.xlu1 %986 }
 0x57d   : > { %v989_v40 = vmul.f32 %v987_v38, %v983_v39 }
 0x57f   : > { %991 = vrot.lane.b32.xlu1 %v989_v40, %s1515_s11  ;;  %s1516_s11 = smov [#allocation5]  }
 0x580   : > { %s1434_s14 = sshll.u32 %s1516_s11, 4  ;;  %s1435_s14 = int_to_ptr.vmem [resolvable:$false] %s1434_s14 }
 0x581   : > { %s1436_s16 = scalar_lea.vmem %s1435_s14, 256  ;;  %p1437_p1 = scmp.lt.s32.totalorder %s1723_s24, %s1435_s14 }
 0x582   : > { %p1438_p2 = scmp.lt.s32.totalorder %s1436_s16, %s1430_s26 }
 0x584   : > { %p1439_p3 = por %p1438_p2, %p1437_p1 }
 0x586   : > { %p1440_p5 = pnand %p1439_p3, %p1433_p0 }
 0x5f1   : > { %v992_v43 = vpop.permute.xlu1 %991 }
 0x5f2   : > { %v994_v44 = vsel %vm440_vm2, %v980_v42, %v992_v43 }
 0x5f3   : > { %v995_v45 = vpack.c.bf16 %v994_v44, %v994_v44 }
 0x5f5   : > { %1331 = vmatmul.mubr.msk.bf16.vlgmr.msra.gmra.mrb[12].mxu1 %vm463_vm1, %v995_v45 }
 0x6c8   : > { %v1056_v47 = vpop.f32.mrb[12].mxu1 }
 0x6c9   : > { %v1057_v48 = vadd.f32 %v1227_v46, %v1056_v47  ;;  %v1332_v49 = vpop.f32.mrb[13].mxu1 }
 0x6ca   : > { %v1059_v50 = vpop.f32.mrb[14].mxu1 }
 0x6cb   : > { %v1333_v51 = vpop.f32.mrb[15].mxu1  ;;  %1062 = vst.msk [vmem:[%s393_s23] sm:$0xff] %vm463_vm1, %v1057_v48 }
 0x6cc   : > { %1443 = shalt.err (!%p1440_p5)
}
 0x6cd   : > { %s1444_s12 = scalar_lea.hbm %s1721_s19, 128  ;;  %s1448_s23 = scalar_lea.hbm %s1777_s8, 256 }
 0x6ce   : > { %p1445_p6 = scmp.ne.s32.totalorder %s1721_s19, %s1444_s12  ;;  %p1449_p10 = scmp.lt.u32.totalorder %s1721_s19, %s1777_s8 }
 0x6cf   : > { %p1450_p11 = scmp.lt.u32.totalorder %s1448_s23, %s1444_s12  ;;  %p1452_p13 = scmp.lt.u32.totalorder %s1444_s12, %s1721_s19 }
 0x6d0   : > { %p1446_p7 = pnand %p1445_p6, %p1602_p4 }
 0x6d1   : > { %p1451_p12 = por %p1450_p11, %p1449_p10 }
 0x6d2   : > { %p1447_p9 = pneg %p1446_p7 }
 0x6d3   : > { %p1453_p0 = por %p1452_p13, %p1451_p12 }
 0x6d5   : > { %p1454_p1 = pnand %p1453_p0, %p1447_p9 }
 0x6d7   : > { %1457 = shalt.err (!%p1454_p1)
}
 0x6d8   : > { %1346 = dma.vmem_to_hbm [thread:$0]  (%p1602_p4), %s1723_s24, 128, %s1721_s19, %s1064_s30  }
 0x6d9 PF: > { %p1352_p2 = scmp.ge.s32.totalorder %s1508_s10, 2  ;;  %s1090_s26 = sand.u32 1, %s1488_s27  }
 0x6da   : > { %s1091_s11 = scalar_lea.sflag [#allocation6], %s1090_s26 }
 0x6db   : > { %p1349_p3 = pnand %p1352_p2, %p1609_p8 }
 0x6dd   : > { %1483 = dma.done.wait (!%p1349_p3), %s1091_s11, 128  }
 0x6de   : > { %1485 = vsyncadd (!%p1349_p3), %s1091_s11, 4294967168  ;;  %s21_s10 = sadd.s32 1, %s1508_s10   ;;  %s1780_s27 = smov %s1492_s28 }
 0x6df   : > { %p18_p5 = scmp.ge.s32.totalorder %s21_s10, 4   ;;  %s1781_s28 = smov %s1496_s29 }
 0x6e0   : > { %s1782_s29 = smov %s1615_s18  ;;  %s1783_s30 = smov %s1504_s9 }
 0x6e1   : > { %s1784_s9 = smov %s1786_s13  ;;  %20 = sbr.rel (!%p18_p5) target bundleno = 4 (0x4), region = 109 }
 0x6e8   :  { %1096 = vsyncpa [#allocation6], 1 }
 0x6e9   :  { %1098 = vsyncpa [#allocation6 + $0x1], 1 }

</bundles_post_ra>
